<compile_context>
chip_gen: v7x
topology: tpu7x:2x2x1
jax: 0.10.0
libtpu: 0.0.40
codegen_flags: <defaults>
</compile_context>

<pallas_src>
import functools

import jax
import jax.numpy as jnp
from jax.experimental import pallas as pl
from jax.experimental.pallas import tpu as pltpu

# ----------------------------- tiny BERT config -----------------------------
VOCAB = 128
HIDDEN = 128
N_LAYERS = 2
N_HEADS = 4
HEAD_DIM = HIDDEN // N_HEADS
INTERMEDIATE = 256
MAX_POS = 64
TYPE_VOCAB = 2
IMG_FEAT_DIM = 64
LOC_DIM = 5
NEG_INF = -10000.0
LN_EPS = 1e-12


# ------------------------------ helpers --------------------------------------
def _layernorm(x, g, b):
    """Row LayerNorm in f32 (x: [M, H]; g, b: [1, H])."""
    mu = jnp.mean(x, axis=-1, keepdims=True)
    var = jnp.mean(jnp.square(x - mu), axis=-1, keepdims=True)
    inv = jax.lax.rsqrt(var + LN_EPS)
    return (x - mu) * inv * g + b


def _bf16(x):
    return x.astype(jnp.bfloat16)


def _rep(shape):
    """Weight BlockSpec: whole array, same block every grid step (stays resident)."""
    n = len(shape)
    return pl.BlockSpec(shape, lambda b, n=n: (0,) * n)


def _per_batch(tail):
    """Activation BlockSpec: one batch element per grid step."""
    n = len(tail)
    return pl.BlockSpec((1,) + tuple(tail), lambda b, n=n: (b,) + (0,) * n)


# --------------------- single fused whole-model kernel ------------------------
def _fused_model_kernel(
        # per-batch activations
        emb_sum_ref, txt_loc_ref, img_feat_ref, img_loc_ref, mask_ref,
        # text-embedding weights
        tlw_ref, tlb_ref, eg_ref, ebb_ref,
        # image-embedding weights
        ifw_ref, ifb_ref, ilw_ref, ilb_ref, ig_ref, ibb_ref,
        # stacked per-layer encoder weights ([L, ...])
        qkv_w_ref, qkv_b_ref, wo_ref, bo_ref, ln1g_ref, ln1b_ref,
        w1_ref, b1_ref, w2_ref, b2_ref, ln2g_ref, ln2b_ref,
        # pooler + NSP head
        pw_ref, pb_ref, nw_ref, nb_ref,
        *rest,
        n_heads, output_lm):
    """Embeddings -> N transformer layers -> NSP (+ optional LM) for one batch elem."""
    if output_lm:
        (ltw_ref, ltb_ref, lg_ref, lbb_ref, ldw_ref, ldb_ref,
         nsp_ref, lm_ref, ctx_scr) = rest
    else:
        (nsp_ref, ctx_scr) = rest

    s_txt = emb_sum_ref.shape[1]
    s_img = img_feat_ref.shape[1]
    s_pad = mask_ref.shape[2]
    n_layers = qkv_w_ref.shape[0]
    H = qkv_w_ref.shape[1]
    d = H // n_heads
    scale = 1.0 / float(d) ** 0.5

    # ---------------- embeddings (text + image) -> padded joint sequence ------
    # text: LN(word+pos+type + loc @ Wloc + b); K=5 loc proj as VPU broadcast-MADDs
    acc_t = emb_sum_ref[0] + tlb_ref[...]
    loc_t = txt_loc_ref[0]
    tlw = tlw_ref[...]
    for i in range(LOC_DIM):
        acc_t = acc_t + loc_t[:, i:i + 1] * tlw[i:i + 1, :]
    txt_h = _layernorm(acc_t, eg_ref[...], ebb_ref[...])

    # image: LN(feat @ Wf + bf + loc @ Wl + bl) — feat proj on MXU, loc proj on VPU
    acc_i = (jnp.dot(_bf16(img_feat_ref[0]), ifw_ref[...],
                     preferred_element_type=jnp.float32)
             + ifb_ref[...] + ilb_ref[...])
    loc_i = img_loc_ref[0]
    ilw = ilw_ref[...]
    for i in range(LOC_DIM):
        acc_i = acc_i + loc_i[:, i:i + 1] * ilw[i:i + 1, :]
    img_h = _layernorm(acc_i, ig_ref[...], ibb_ref[...])

    # joint padded sequence built in-kernel (sublane concat, 8-row aligned pieces)
    parts = [txt_h, img_h]
    pad_rows = s_pad - s_txt - s_img
    if pad_rows:
        parts.append(jnp.zeros((pad_rows, H), jnp.float32))
    x = jnp.concatenate(parts, axis=0)                     # [S_pad, H] f32

    # additive attention bias from the raw 0/1 mask — one VPU FMA, computed once
    bias = (1.0 - mask_ref[0]) * NEG_INF                   # [1, S_pad]

    # --------------------------- transformer stack ----------------------------
    for l in range(n_layers):
        # fused QKV: one lane-dense (H, 3H) MXU matmul (bf16 x bf16 -> f32 acc)
        qkv = jnp.dot(_bf16(x), qkv_w_ref[l],
                      preferred_element_type=jnp.float32) + qkv_b_ref[l]
        q = qkv[:, 0:H] * scale            # pre-scale q (cheaper than scaling SxS)
        k = qkv[:, H:2 * H]
        v = qkv[:, 2 * H:3 * H]

        for hh in range(n_heads):
            sl = slice(hh * d, (hh + 1) * d)
            qh = _bf16(q[:, sl])
            kh = _bf16(k[:, sl])
            s = jax.lax.dot_general(qh, kh, (((1,), (1,)), ((), ())),
                                    preferred_element_type=jnp.float32) + bias
            s = s - jnp.max(s, axis=-1, keepdims=True)     # f32 softmax (v5e-safe)
            p = jnp.exp(s)
            p = p * pl.reciprocal(jnp.sum(p, axis=-1, keepdims=True), approx=True)
            ctx_h = jnp.dot(_bf16(p), _bf16(v[:, sl]),
                            preferred_element_type=jnp.float32)
            # place head context at its lane offset -> one K=128 Wo matmul below
            ctx_scr[:, sl] = _bf16(ctx_h)

        attn = jnp.dot(ctx_scr[...], wo_ref[l],
                       preferred_element_type=jnp.float32) + bo_ref[l]
        h1 = _layernorm(x + attn, ln1g_ref[l], ln1b_ref[l])

        f = jnp.dot(_bf16(h1), w1_ref[l],
                    preferred_element_type=jnp.float32) + b1_ref[l]
        # tanh-approx gelu (HF BERT uses erf-gelu; deviation < 1e-3, erf lowering
        # is not guaranteed in Mosaic so we keep the proven tanh path)
        f = jax.nn.gelu(f)
        f = jnp.dot(_bf16(f), w2_ref[l],
                    preferred_element_type=jnp.float32) + b2_ref[l]
        x = _layernorm(h1 + f, ln2g_ref[l], ln2b_ref[l])

    # ------------------- pooler + NSP head epilogue ---------------------------
    pooled = jnp.tanh(jnp.dot(_bf16(x[0:1, :]), pw_ref[...],
                              preferred_element_type=jnp.float32) + pb_ref[...])
    nsp_ref[0] = (jnp.dot(_bf16(pooled), nw_ref[...],
                          preferred_element_type=jnp.float32)
                  + nb_ref[...]).astype(nsp_ref.dtype)

    # ------------------- masked-LM head epilogue (optional) -------------------
    if output_lm:
        t = jnp.dot(_bf16(x[0:s_txt, :]), ltw_ref[...],
                    preferred_element_type=jnp.float32) + ltb_ref[...]
        t = jax.nn.gelu(t)
        t = _layernorm(t, lg_ref[...], lbb_ref[...])
        lm_ref[0] = (jnp.dot(_bf16(t), ldw_ref[...],
                             preferred_element_type=jnp.float32)
                     + ldb_ref[...]).astype(lm_ref.dtype)


def _fused_forward(emb_sum, txt_loc, image_feat, image_loc, mask, params, output_lm):
    """One pallas_call running the entire model; grid=(B,) parallel for v7x's 2 TCs."""
    B, S_txt, H = emb_sum.shape
    S_img = image_feat.shape[1]
    S_pad = mask.shape[-1]
    L = params["qkv_w"].shape[0]
    I = params["ffn1_w"].shape[-1]

    kern = functools.partial(_fused_model_kernel, n_heads=N_HEADS,
                             output_lm=output_lm)

    in_specs = [
        _per_batch((S_txt, H)), _per_batch((S_txt, LOC_DIM)),
        _per_batch((S_img, IMG_FEAT_DIM)), _per_batch((S_img, LOC_DIM)),
        _per_batch((1, S_pad)),
        _rep((LOC_DIM, H)), _rep((1, H)), _rep((1, H)), _rep((1, H)),
        _rep((IMG_FEAT_DIM, H)), _rep((1, H)), _rep((LOC_DIM, H)), _rep((1, H)),
        _rep((1, H)), _rep((1, H)),
        _rep((L, H, 3 * H)), _rep((L, 1, 3 * H)),
        _rep((L, H, H)), _rep((L, 1, H)), _rep((L, 1, H)), _rep((L, 1, H)),
        _rep((L, H, I)), _rep((L, 1, I)), _rep((L, I, H)), _rep((L, 1, H)),
        _rep((L, 1, H)), _rep((L, 1, H)),
        _rep((H, H)), _rep((1, H)), _rep((H, 2)), _rep((1, 2)),
    ]
    operands = [
        emb_sum, txt_loc, image_feat, image_loc, mask,
        params["txt_loc_w"], params["txt_loc_b"],
        params["emb_ln_g"], params["emb_ln_b"],
        params["img_feat_w"], params["img_feat_b"],
        params["img_loc_w"], params["img_loc_b"],
        params["img_ln_g"], params["img_ln_b"],
        params["qkv_w"], params["qkv_b"],
        params["attn_out_w"], params["attn_out_b"],
        params["attn_ln_g"], params["attn_ln_b"],
        params["ffn1_w"], params["ffn1_b"],
        params["ffn2_w"], params["ffn2_b"],
        params["ffn_ln_g"], params["ffn_ln_b"],
        params["pooler_w"], params["pooler_b"],
        params["nsp_w"], params["nsp_b"],
    ]
    out_shapes = [jax.ShapeDtypeStruct((B, 1, 2), jnp.float32)]
    out_specs = [_per_batch((1, 2))]

    if output_lm:
        # LM decoder weight tied to the word-embedding matrix (BERT weight tying)
        lm_decoder_w = _bf16(params["word_emb"].T)
        in_specs += [_rep((H, H)), _rep((1, H)), _rep((1, H)), _rep((1, H)),
                     _rep((H, VOCAB)), _rep((1, VOCAB))]
        operands += [params["lm_transform_w"], params["lm_transform_b"],
                     params["lm_ln_g"], params["lm_ln_b"],
                     lm_decoder_w, params["lm_decoder_b"]]
        out_shapes.append(jax.ShapeDtypeStruct((B, S_txt, VOCAB), jnp.float32))
        out_specs.append(_per_batch((S_txt, VOCAB)))

    outs = pl.pallas_call(
        kern,
        out_shape=tuple(out_shapes),
        grid=(B,),
        in_specs=in_specs,
        out_specs=tuple(out_specs),
        scratch_shapes=[pltpu.VMEM((S_pad, H), jnp.bfloat16)],   # head-ctx staging
        compiler_params=pltpu.CompilerParams(
            dimension_semantics=("parallel",),      # 2-way split -> both v7x TCs busy
            vmem_limit_bytes=16 * 1024 * 1024),     # actual use ~1-2 MiB (all chips)
    )(*operands)

    if output_lm:
        nsp, lm = outs
        return nsp.reshape(B, 2), lm
    (nsp,) = outs
    return nsp.reshape(B, 2), None


# ------------------------------- parameters -----------------------------------
def init_params(key):
    keys = iter(jax.random.split(key, 64))

    def nrm(shape, dtype=jnp.bfloat16):
        # matmul weights stored bf16 (MXU-native on v6e/v7x, 2x MXU rate on v5e)
        return (jax.random.normal(next(keys), shape, jnp.float32) * 0.02).astype(dtype)

    def zeros(shape):
        return jnp.zeros(shape, jnp.float32)

    def ones(shape):
        return jnp.ones(shape, jnp.float32)

    L = N_LAYERS
    p = {
        "word_emb": nrm((VOCAB, HIDDEN), jnp.float32),
        "pos_emb": nrm((MAX_POS, HIDDEN), jnp.float32),
        "type_emb": nrm((TYPE_VOCAB, HIDDEN), jnp.float32),
        # loc projections stay f32 (done as VPU broadcast-MADDs, not MXU)
        "txt_loc_w": nrm((LOC_DIM, HIDDEN), jnp.float32), "txt_loc_b": zeros((1, HIDDEN)),
        "emb_ln_g": ones((1, HIDDEN)), "emb_ln_b": zeros((1, HIDDEN)),
        "img_feat_w": nrm((IMG_FEAT_DIM, HIDDEN)), "img_feat_b": zeros((1, HIDDEN)),
        "img_loc_w": nrm((LOC_DIM, HIDDEN), jnp.float32), "img_loc_b": zeros((1, HIDDEN)),
        "img_ln_g": ones((1, HIDDEN)), "img_ln_b": zeros((1, HIDDEN)),
        "lm_transform_w": nrm((HIDDEN, HIDDEN)), "lm_transform_b": zeros((1, HIDDEN)),
        "lm_ln_g": ones((1, HIDDEN)), "lm_ln_b": zeros((1, HIDDEN)),
        "lm_decoder_b": zeros((1, VOCAB)),   # decoder weight is tied to word_emb.T
        "pooler_w": nrm((HIDDEN, HIDDEN)), "pooler_b": zeros((1, HIDDEN)),
        "nsp_w": nrm((HIDDEN, 2)), "nsp_b": zeros((1, 2)),
        # stacked per-layer encoder weights ([L, ...]) — one resident VMEM block
        "qkv_w": nrm((L, HIDDEN, 3 * HIDDEN)), "qkv_b": zeros((L, 1, 3 * HIDDEN)),
        "attn_out_w": nrm((L, HIDDEN, HIDDEN)), "attn_out_b": zeros((L, 1, HIDDEN)),
        "attn_ln_g": ones((L, 1, HIDDEN)), "attn_ln_b": zeros((L, 1, HIDDEN)),
        "ffn1_w": nrm((L, HIDDEN, INTERMEDIATE)), "ffn1_b": zeros((L, 1, INTERMEDIATE)),
        "ffn2_w": nrm((L, INTERMEDIATE, HIDDEN)), "ffn2_b": zeros((L, 1, HIDDEN)),
        "ffn_ln_g": ones((L, 1, HIDDEN)), "ffn_ln_b": zeros((L, 1, HIDDEN)),
    }
    return p


# ------------------------------ forward (glue) --------------------------------
def visual_dialog_encoder_forward(
    params, input_ids, txt_loc, image_feat, image_loc,
    sep_indices=None, sep_len=None, token_type_ids=None, attention_mask=None,
    masked_lm_labels=None, next_sentence_label=None, image_attention_mask=None,
    image_label=None, image_target=None, gt_reg=None, areas=None,
    legend_pred=None, output_nsp_scores=False, output_lm_scores=False,
):
    B, S_txt = input_ids.shape
    S_img = image_feat.shape[1]
    if token_type_ids is None:
        token_type_ids = jnp.zeros_like(input_ids)
    if attention_mask is None:
        attention_mask = jnp.ones((B, S_txt), jnp.float32)
    if image_attention_mask is None:
        image_attention_mask = jnp.ones((B, S_img), jnp.float32)

    # Token embedding gathers stay in plain JAX (data-dependent table lookups);
    # everything downstream runs inside ONE fused Pallas kernel.
    word = jnp.take(params["word_emb"], input_ids, axis=0)
    pos = params["pos_emb"][:S_txt][None]
    typ = jnp.take(params["type_emb"], token_type_ids, axis=0)
    emb_sum = word + pos + typ                                # [B, S_txt, H]

    # joint mask padded to a multiple of 16 (clean bf16 sublane packing);
    # the (1-mask)*NEG_INF bias and the padded h are built inside the kernel.
    S = S_txt + S_img
    S_pad = ((S + 15) // 16) * 16
    mask = jnp.concatenate([attention_mask.astype(jnp.float32),
                            image_attention_mask.astype(jnp.float32)], axis=1)
    mask = jnp.pad(mask, ((0, 0), (0, S_pad - S))).reshape(B, 1, S_pad)

    seq_relationship_score, prediction_scores_t = _fused_forward(
        emb_sum, txt_loc, image_feat, image_loc, mask, params, output_lm_scores)

    # Labels not provided in this synthetic setting -> wrapper's else-branch:
    masked_lm_loss = None
    masked_img_loss = None
    nsp_loss = None
    reg_loss = None
    legend_loss = None
    # TODO(synk): masked-LM / masked-image / NSP / box-regression / legend losses
    # require CRCT's exact label-dependent loss heads (checkpoint-specific); only
    # the label-free score-producing path of the wrapper is implemented here.

    out = (masked_lm_loss, masked_img_loss, nsp_loss, seq_relationship_score)
    if output_lm_scores:
        out = out + (prediction_scores_t,)
    return out + (reg_loss, legend_loss)


# ----------------------------------- demo ------------------------------------
if __name__ == "__main__":
    key = jax.random.PRNGKey(0)
    kp, k1, k2, k3, k4 = jax.random.split(key, 5)
    params = init_params(kp)

    B, S_txt, S_img = 2, 16, 8
    input_ids = jax.random.randint(k1, (B, S_txt), 0, VOCAB)
    txt_loc = jax.random.uniform(k2, (B, S_txt, LOC_DIM), jnp.float32)
    image_feat = jax.random.normal(k3, (B, S_img, IMG_FEAT_DIM), jnp.float32)
    image_loc = jax.random.uniform(k4, (B, S_img, LOC_DIM), jnp.float32)
    token_type_ids = jnp.zeros((B, S_txt), jnp.int32)
    attention_mask = jnp.ones((B, S_txt), jnp.float32)
    image_attention_mask = jnp.ones((B, S_img), jnp.float32)

    fwd = jax.jit(functools.partial(visual_dialog_encoder_forward,
                                    output_nsp_scores=True,
                                    output_lm_scores=True))
    out = fwd(params, input_ids, txt_loc, image_feat, image_loc,
              token_type_ids=token_type_ids,
              attention_mask=attention_mask,
              image_attention_mask=image_attention_mask)

    (masked_lm_loss, masked_img_loss, nsp_loss,
     seq_relationship_score, prediction_scores_t, reg_loss, legend_loss) = out

    jax.block_until_ready(seq_relationship_score)
    jax.block_until_ready(prediction_scores_t)
    assert seq_relationship_score.shape == (B, 2)
    assert prediction_scores_t.shape == (B, S_txt, VOCAB)
    assert bool(jnp.all(jnp.isfinite(seq_relationship_score)))
    assert bool(jnp.all(jnp.isfinite(prediction_scores_t)))
    assert masked_lm_loss is None and masked_img_loss is None and nsp_loss is None
    print("KERNEL_OK")
</pallas_src>

<mosaic_0001>
module attributes {stable_mosaic.version = 11 : i64} {
  func.func @_fused_model_kernel(%arg0: i32, %arg1: memref<1x16x128xf32, #tpu.memory_space<vmem>>, %arg2: memref<1x16x5xf32, #tpu.memory_space<vmem>>, %arg3: memref<1x8x64xf32, #tpu.memory_space<vmem>>, %arg4: memref<1x8x5xf32, #tpu.memory_space<vmem>>, %arg5: memref<1x1x32xf32, #tpu.memory_space<vmem>>, %arg6: memref<5x128xf32, #tpu.memory_space<vmem>>, %arg7: memref<1x128xf32, #tpu.memory_space<vmem>>, %arg8: memref<1x128xf32, #tpu.memory_space<vmem>>, %arg9: memref<1x128xf32, #tpu.memory_space<vmem>>, %arg10: memref<64x128xbf16, #tpu.memory_space<vmem>>, %arg11: memref<1x128xf32, #tpu.memory_space<vmem>>, %arg12: memref<5x128xf32, #tpu.memory_space<vmem>>, %arg13: memref<1x128xf32, #tpu.memory_space<vmem>>, %arg14: memref<1x128xf32, #tpu.memory_space<vmem>>, %arg15: memref<1x128xf32, #tpu.memory_space<vmem>>, %arg16: memref<2x128x384xbf16, #tpu.memory_space<vmem>>, %arg17: memref<2x1x384xf32, #tpu.memory_space<vmem>>, %arg18: memref<2x128x128xbf16, #tpu.memory_space<vmem>>, %arg19: memref<2x1x128xf32, #tpu.memory_space<vmem>>, %arg20: memref<2x1x128xf32, #tpu.memory_space<vmem>>, %arg21: memref<2x1x128xf32, #tpu.memory_space<vmem>>, %arg22: memref<2x128x256xbf16, #tpu.memory_space<vmem>>, %arg23: memref<2x1x256xf32, #tpu.memory_space<vmem>>, %arg24: memref<2x256x128xbf16, #tpu.memory_space<vmem>>, %arg25: memref<2x1x128xf32, #tpu.memory_space<vmem>>, %arg26: memref<2x1x128xf32, #tpu.memory_space<vmem>>, %arg27: memref<2x1x128xf32, #tpu.memory_space<vmem>>, %arg28: memref<128x128xbf16, #tpu.memory_space<vmem>>, %arg29: memref<1x128xf32, #tpu.memory_space<vmem>>, %arg30: memref<128x2xbf16, #tpu.memory_space<vmem>>, %arg31: memref<1x2xf32, #tpu.memory_space<vmem>>, %arg32: memref<128x128xbf16, #tpu.memory_space<vmem>>, %arg33: memref<1x128xf32, #tpu.memory_space<vmem>>, %arg34: memref<1x128xf32, #tpu.memory_space<vmem>>, %arg35: memref<1x128xf32, #tpu.memory_space<vmem>>, %arg36: memref<128x128xbf16, #tpu.memory_space<vmem>>, %arg37: memref<1x128xf32, #tpu.memory_space<vmem>>, %arg38: memref<1x1x2xf32, #tpu.memory_space<vmem>>, %arg39: memref<1x16x128xf32, #tpu.memory_space<vmem>>, %arg40: memref<32x128xbf16, #tpu.memory_space<vmem>>) attributes {dimension_semantics = [#tpu.dimension_semantics<parallel>], iteration_bounds = array<i64: 2>, scalar_prefetch = 0 : i64, scratch_operands = 1 : i64, tpu.core_type = #tpu.core_type<tc>, window_params = [{transform_indices = @transform_0, window_bounds = array<i64: 1, 16, 128>}, {transform_indices = @transform_1, window_bounds = array<i64: 1, 16, 5>}, {transform_indices = @transform_2, window_bounds = array<i64: 1, 8, 64>}, {transform_indices = @transform_3, window_bounds = array<i64: 1, 8, 5>}, {transform_indices = @transform_4, window_bounds = array<i64: 1, 1, 32>}, {pipeline_mode = #tpu.pipeline_mode<synchronous>, transform_indices = @transform_5, window_bounds = array<i64: 5, 128>}, {pipeline_mode = #tpu.pipeline_mode<synchronous>, transform_indices = @transform_6, window_bounds = array<i64: 1, 128>}, {pipeline_mode = #tpu.pipeline_mode<synchronous>, transform_indices = @transform_7, window_bounds = array<i64: 1, 128>}, {pipeline_mode = #tpu.pipeline_mode<synchronous>, transform_indices = @transform_8, window_bounds = array<i64: 1, 128>}, {pipeline_mode = #tpu.pipeline_mode<synchronous>, transform_indices = @transform_9, window_bounds = array<i64: 64, 128>}, {pipeline_mode = #tpu.pipeline_mode<synchronous>, transform_indices = @transform_10, window_bounds = array<i64: 1, 128>}, {pipeline_mode = #tpu.pipeline_mode<synchronous>, transform_indices = @transform_11, window_bounds = array<i64: 5, 128>}, {pipeline_mode = #tpu.pipeline_mode<synchronous>, transform_indices = @transform_12, window_bounds = array<i64: 1, 128>}, {pipeline_mode = #tpu.pipeline_mode<synchronous>, transform_indices = @transform_13, window_bounds = array<i64: 1, 128>}, {pipeline_mode = #tpu.pipeline_mode<synchronous>, transform_indices = @transform_14, window_bounds = array<i64: 1, 128>}, {pipeline_mode = #tpu.pipeline_mode<synchronous>, transform_indices = @transform_15, window_bounds = array<i64: 2, 128, 384>}, {pipeline_mode = #tpu.pipeline_mode<synchronous>, transform_indices = @transform_16, window_bounds = array<i64: 2, 1, 384>}, {pipeline_mode = #tpu.pipeline_mode<synchronous>, transform_indices = @transform_17, window_bounds = array<i64: 2, 128, 128>}, {pipeline_mode = #tpu.pipeline_mode<synchronous>, transform_indices = @transform_18, window_bounds = array<i64: 2, 1, 128>}, {pipeline_mode = #tpu.pipeline_mode<synchronous>, transform_indices = @transform_19, window_bounds = array<i64: 2, 1, 128>}, {pipeline_mode = #tpu.pipeline_mode<synchronous>, transform_indices = @transform_20, window_bounds = array<i64: 2, 1, 128>}, {pipeline_mode = #tpu.pipeline_mode<synchronous>, transform_indices = @transform_21, window_bounds = array<i64: 2, 128, 256>}, {pipeline_mode = #tpu.pipeline_mode<synchronous>, transform_indices = @transform_22, window_bounds = array<i64: 2, 1, 256>}, {pipeline_mode = #tpu.pipeline_mode<synchronous>, transform_indices = @transform_23, window_bounds = array<i64: 2, 256, 128>}, {pipeline_mode = #tpu.pipeline_mode<synchronous>, transform_indices = @transform_24, window_bounds = array<i64: 2, 1, 128>}, {pipeline_mode = #tpu.pipeline_mode<synchronous>, transform_indices = @transform_25, window_bounds = array<i64: 2, 1, 128>}, {pipeline_mode = #tpu.pipeline_mode<synchronous>, transform_indices = @transform_26, window_bounds = array<i64: 2, 1, 128>}, {pipeline_mode = #tpu.pipeline_mode<synchronous>, transform_indices = @transform_27, window_bounds = array<i64: 128, 128>}, {pipeline_mode = #tpu.pipeline_mode<synchronous>, transform_indices = @transform_28, window_bounds = array<i64: 1, 128>}, {pipeline_mode = #tpu.pipeline_mode<synchronous>, transform_indices = @transform_29, window_bounds = array<i64: 128, 2>}, {pipeline_mode = #tpu.pipeline_mode<synchronous>, transform_indices = @transform_30, window_bounds = array<i64: 1, 2>}, {pipeline_mode = #tpu.pipeline_mode<synchronous>, transform_indices = @transform_31, window_bounds = array<i64: 128, 128>}, {pipeline_mode = #tpu.pipeline_mode<synchronous>, transform_indices = @transform_32, window_bounds = array<i64: 1, 128>}, {pipeline_mode = #tpu.pipeline_mode<synchronous>, transform_indices = @transform_33, window_bounds = array<i64: 1, 128>}, {pipeline_mode = #tpu.pipeline_mode<synchronous>, transform_indices = @transform_34, window_bounds = array<i64: 1, 128>}, {pipeline_mode = #tpu.pipeline_mode<synchronous>, transform_indices = @transform_35, window_bounds = array<i64: 128, 128>}, {pipeline_mode = #tpu.pipeline_mode<synchronous>, transform_indices = @transform_36, window_bounds = array<i64: 1, 128>}, {transform_indices = @transform_37, window_bounds = array<i64: 1, 1, 2>}, {transform_indices = @transform_38, window_bounds = array<i64: 1, 16, 128>}]} {
    %c0 = arith.constant 0 : index
    %c0_0 = arith.constant 0 : index
    %c0_1 = arith.constant 0 : index
    %0 = vector.load %arg1[%c0, %c0_0, %c0_1] : memref<1x16x128xf32, #tpu.memory_space<vmem>>, vector<1x16x128xf32>
    %1 = vector.shape_cast %0 : vector<1x16x128xf32> to vector<16x128xf32>
    %c0_2 = arith.constant 0 : index
    %c0_3 = arith.constant 0 : index
    %2 = vector.load %arg7[%c0_2, %c0_3] : memref<1x128xf32, #tpu.memory_space<vmem>>, vector<1x128xf32>
    %3 = vector.broadcast %2 : vector<1x128xf32> to vector<16x128xf32>
    %4 = arith.addf %1, %3 : vector<16x128xf32>
    %c0_4 = arith.constant 0 : index
    %c0_5 = arith.constant 0 : index
    %c0_6 = arith.constant 0 : index
    %5 = vector.load %arg2[%c0_4, %c0_5, %c0_6] : memref<1x16x5xf32, #tpu.memory_space<vmem>>, vector<1x16x5xf32>
    %6 = vector.shape_cast %5 : vector<1x16x5xf32> to vector<16x5xf32>
    %c0_7 = arith.constant 0 : index
    %c0_8 = arith.constant 0 : index
    %7 = vector.load %arg6[%c0_7, %c0_8] : memref<5x128xf32, #tpu.memory_space<vmem>>, vector<5x128xf32>
    %8 = vector.extract_strided_slice %6 {offsets = [0, 0], sizes = [16, 1], strides = [1, 1]} : vector<16x5xf32> to vector<16x1xf32>
    %9 = vector.extract_strided_slice %7 {offsets = [0, 0], sizes = [1, 128], strides = [1, 1]} : vector<5x128xf32> to vector<1x128xf32>
    %10 = vector.broadcast %8 : vector<16x1xf32> to vector<16x128xf32>
    %11 = vector.broadcast %9 : vector<1x128xf32> to vector<16x128xf32>
    %12 = arith.mulf %10, %11 : vector<16x128xf32>
    %13 = arith.addf %4, %12 : vector<16x128xf32>
    %14 = vector.extract_strided_slice %6 {offsets = [0, 1], sizes = [16, 1], strides = [1, 1]} : vector<16x5xf32> to vector<16x1xf32>
    %15 = vector.extract_strided_slice %7 {offsets = [1, 0], sizes = [1, 128], strides = [1, 1]} : vector<5x128xf32> to vector<1x128xf32>
    %16 = vector.broadcast %14 : vector<16x1xf32> to vector<16x128xf32>
    %17 = vector.broadcast %15 : vector<1x128xf32> to vector<16x128xf32>
    %18 = arith.mulf %16, %17 : vector<16x128xf32>
    %19 = arith.addf %13, %18 : vector<16x128xf32>
    %20 = vector.extract_strided_slice %6 {offsets = [0, 2], sizes = [16, 1], strides = [1, 1]} : vector<16x5xf32> to vector<16x1xf32>
    %21 = vector.extract_strided_slice %7 {offsets = [2, 0], sizes = [1, 128], strides = [1, 1]} : vector<5x128xf32> to vector<1x128xf32>
    %22 = vector.broadcast %20 : vector<16x1xf32> to vector<16x128xf32>
    %23 = vector.broadcast %21 : vector<1x128xf32> to vector<16x128xf32>
    %24 = arith.mulf %22, %23 : vector<16x128xf32>
    %25 = arith.addf %19, %24 : vector<16x128xf32>
    %26 = vector.extract_strided_slice %6 {offsets = [0, 3], sizes = [16, 1], strides = [1, 1]} : vector<16x5xf32> to vector<16x1xf32>
    %27 = vector.extract_strided_slice %7 {offsets = [3, 0], sizes = [1, 128], strides = [1, 1]} : vector<5x128xf32> to vector<1x128xf32>
    %28 = vector.broadcast %26 : vector<16x1xf32> to vector<16x128xf32>
    %29 = vector.broadcast %27 : vector<1x128xf32> to vector<16x128xf32>
    %30 = arith.mulf %28, %29 : vector<16x128xf32>
    %31 = arith.addf %25, %30 : vector<16x128xf32>
    %32 = vector.extract_strided_slice %6 {offsets = [0, 4], sizes = [16, 1], strides = [1, 1]} : vector<16x5xf32> to vector<16x1xf32>
    %33 = vector.extract_strided_slice %7 {offsets = [4, 0], sizes = [1, 128], strides = [1, 1]} : vector<5x128xf32> to vector<1x128xf32>
    %34 = vector.broadcast %32 : vector<16x1xf32> to vector<16x128xf32>
    %35 = vector.broadcast %33 : vector<1x128xf32> to vector<16x128xf32>
    %36 = arith.mulf %34, %35 : vector<16x128xf32>
    %37 = arith.addf %31, %36 : vector<16x128xf32>
    %c0_9 = arith.constant 0 : index
    %c0_10 = arith.constant 0 : index
    %38 = vector.load %arg8[%c0_9, %c0_10] : memref<1x128xf32, #tpu.memory_space<vmem>>, vector<1x128xf32>
    %c0_11 = arith.constant 0 : index
    %c0_12 = arith.constant 0 : index
    %39 = vector.load %arg9[%c0_11, %c0_12] : memref<1x128xf32, #tpu.memory_space<vmem>>, vector<1x128xf32>
    %cst = arith.constant dense<0.000000e+00> : vector<16xf32>
    %40 = vector.multi_reduction <add>, %37, %cst [1] : vector<16x128xf32> to vector<16xf32>
    %41 = vector.shape_cast %40 : vector<16xf32> to vector<16x1xf32>
    %cst_13 = arith.constant 1.280000e+02 : f32
    %42 = vector.broadcast %cst_13 : f32 to vector<16x1xf32>
    %43 = arith.divf %41, %42 : vector<16x1xf32>
    %44 = vector.broadcast %43 : vector<16x1xf32> to vector<16x128xf32>
    %45 = arith.subf %37, %44 : vector<16x128xf32>
    %46 = arith.mulf %45, %45 : vector<16x128xf32>
    %cst_14 = arith.constant dense<0.000000e+00> : vector<16xf32>
    %47 = vector.multi_reduction <add>, %46, %cst_14 [1] : vector<16x128xf32> to vector<16xf32>
    %48 = vector.shape_cast %47 : vector<16xf32> to vector<16x1xf32>
    %cst_15 = arith.constant 1.280000e+02 : f32
    %49 = vector.broadcast %cst_15 : f32 to vector<16x1xf32>
    %50 = arith.divf %48, %49 : vector<16x1xf32>
    %cst_16 = arith.constant 9.99999996E-13 : f32
    %51 = vector.broadcast %cst_16 : f32 to vector<16x1xf32>
    %52 = arith.addf %50, %51 : vector<16x1xf32>
    %53 = math.rsqrt %52 : vector<16x1xf32>
    %54 = vector.broadcast %43 : vector<16x1xf32> to vector<16x128xf32>
    %55 = arith.subf %37, %54 : vector<16x128xf32>
    %56 = vector.broadcast %53 : vector<16x1xf32> to vector<16x128xf32>
    %57 = arith.mulf %55, %56 : vector<16x128xf32>
    %58 = vector.broadcast %38 : vector<1x128xf32> to vector<16x128xf32>
    %59 = arith.mulf %57, %58 : vector<16x128xf32>
    %60 = vector.broadcast %39 : vector<1x128xf32> to vector<16x128xf32>
    %61 = arith.addf %59, %60 : vector<16x128xf32>
    %c0_17 = arith.constant 0 : index
    %c0_18 = arith.constant 0 : index
    %c0_19 = arith.constant 0 : index
    %62 = vector.load %arg3[%c0_17, %c0_18, %c0_19] : memref<1x8x64xf32, #tpu.memory_space<vmem>>, vector<1x8x64xf32>
    %63 = vector.shape_cast %62 : vector<1x8x64xf32> to vector<8x64xf32>
    %64 = arith.truncf %63 : vector<8x64xf32> to vector<8x64xbf16>
    %c0_20 = arith.constant 0 : index
    %c0_21 = arith.constant 0 : index
    %65 = vector.load %arg10[%c0_20, %c0_21] : memref<64x128xbf16, #tpu.memory_space<vmem>>, vector<64x128xbf16>
    %cst_22 = arith.constant dense<0.000000e+00> : vector<8x128xf32>
    %66 = tpu.matmul %64, %65, %cst_22 {dimension_numbers = #tpu.dot_dimension_numbers<[1], [0], [0], [1], [0, 0, 1, 1], [], []>} : vector<8x64xbf16>, vector<64x128xbf16>, vector<8x128xf32> -> vector<8x128xf32>
    %c0_23 = arith.constant 0 : index
    %c0_24 = arith.constant 0 : index
    %67 = vector.load %arg11[%c0_23, %c0_24] : memref<1x128xf32, #tpu.memory_space<vmem>>, vector<1x128xf32>
    %68 = vector.broadcast %67 : vector<1x128xf32> to vector<8x128xf32>
    %69 = arith.addf %66, %68 : vector<8x128xf32>
    %c0_25 = arith.constant 0 : index
    %c0_26 = arith.constant 0 : index
    %70 = vector.load %arg13[%c0_25, %c0_26] : memref<1x128xf32, #tpu.memory_space<vmem>>, vector<1x128xf32>
    %71 = vector.broadcast %70 : vector<1x128xf32> to vector<8x128xf32>
    %72 = arith.addf %69, %71 : vector<8x128xf32>
    %c0_27 = arith.constant 0 : index
    %c0_28 = arith.constant 0 : index
    %c0_29 = arith.constant 0 : index
    %73 = vector.load %arg4[%c0_27, %c0_28, %c0_29] : memref<1x8x5xf32, #tpu.memory_space<vmem>>, vector<1x8x5xf32>
    %74 = vector.shape_cast %73 : vector<1x8x5xf32> to vector<8x5xf32>
    %c0_30 = arith.constant 0 : index
    %c0_31 = arith.constant 0 : index
    %75 = vector.load %arg12[%c0_30, %c0_31] : memref<5x128xf32, #tpu.memory_space<vmem>>, vector<5x128xf32>
    %76 = vector.extract_strided_slice %74 {offsets = [0, 0], sizes = [8, 1], strides = [1, 1]} : vector<8x5xf32> to vector<8x1xf32>
    %77 = vector.extract_strided_slice %75 {offsets = [0, 0], sizes = [1, 128], strides = [1, 1]} : vector<5x128xf32> to vector<1x128xf32>
    %78 = vector.broadcast %76 : vector<8x1xf32> to vector<8x128xf32>
    %79 = vector.broadcast %77 : vector<1x128xf32> to vector<8x128xf32>
    %80 = arith.mulf %78, %79 : vector<8x128xf32>
    %81 = arith.addf %72, %80 : vector<8x128xf32>
    %82 = vector.extract_strided_slice %74 {offsets = [0, 1], sizes = [8, 1], strides = [1, 1]} : vector<8x5xf32> to vector<8x1xf32>
    %83 = vector.extract_strided_slice %75 {offsets = [1, 0], sizes = [1, 128], strides = [1, 1]} : vector<5x128xf32> to vector<1x128xf32>
    %84 = vector.broadcast %82 : vector<8x1xf32> to vector<8x128xf32>
    %85 = vector.broadcast %83 : vector<1x128xf32> to vector<8x128xf32>
    %86 = arith.mulf %84, %85 : vector<8x128xf32>
    %87 = arith.addf %81, %86 : vector<8x128xf32>
    %88 = vector.extract_strided_slice %74 {offsets = [0, 2], sizes = [8, 1], strides = [1, 1]} : vector<8x5xf32> to vector<8x1xf32>
    %89 = vector.extract_strided_slice %75 {offsets = [2, 0], sizes = [1, 128], strides = [1, 1]} : vector<5x128xf32> to vector<1x128xf32>
    %90 = vector.broadcast %88 : vector<8x1xf32> to vector<8x128xf32>
    %91 = vector.broadcast %89 : vector<1x128xf32> to vector<8x128xf32>
    %92 = arith.mulf %90, %91 : vector<8x128xf32>
    %93 = arith.addf %87, %92 : vector<8x128xf32>
    %94 = vector.extract_strided_slice %74 {offsets = [0, 3], sizes = [8, 1], strides = [1, 1]} : vector<8x5xf32> to vector<8x1xf32>
    %95 = vector.extract_strided_slice %75 {offsets = [3, 0], sizes = [1, 128], strides = [1, 1]} : vector<5x128xf32> to vector<1x128xf32>
    %96 = vector.broadcast %94 : vector<8x1xf32> to vector<8x128xf32>
    %97 = vector.broadcast %95 : vector<1x128xf32> to vector<8x128xf32>
    %98 = arith.mulf %96, %97 : vector<8x128xf32>
    %99 = arith.addf %93, %98 : vector<8x128xf32>
    %100 = vector.extract_strided_slice %74 {offsets = [0, 4], sizes = [8, 1], strides = [1, 1]} : vector<8x5xf32> to vector<8x1xf32>
    %101 = vector.extract_strided_slice %75 {offsets = [4, 0], sizes = [1, 128], strides = [1, 1]} : vector<5x128xf32> to vector<1x128xf32>
    %102 = vector.broadcast %100 : vector<8x1xf32> to vector<8x128xf32>
    %103 = vector.broadcast %101 : vector<1x128xf32> to vector<8x128xf32>
    %104 = arith.mulf %102, %103 : vector<8x128xf32>
    %105 = arith.addf %99, %104 : vector<8x128xf32>
    %c0_32 = arith.constant 0 : index
    %c0_33 = arith.constant 0 : index
    %106 = vector.load %arg14[%c0_32, %c0_33] : memref<1x128xf32, #tpu.memory_space<vmem>>, vector<1x128xf32>
    %c0_34 = arith.constant 0 : index
    %c0_35 = arith.constant 0 : index
    %107 = vector.load %arg15[%c0_34, %c0_35] : memref<1x128xf32, #tpu.memory_space<vmem>>, vector<1x128xf32>
    %cst_36 = arith.constant dense<0.000000e+00> : vector<8xf32>
    %108 = vector.multi_reduction <add>, %105, %cst_36 [1] : vector<8x128xf32> to vector<8xf32>
    %109 = vector.shape_cast %108 : vector<8xf32> to vector<8x1xf32>
    %cst_37 = arith.constant 1.280000e+02 : f32
    %110 = vector.broadcast %cst_37 : f32 to vector<8x1xf32>
    %111 = arith.divf %109, %110 : vector<8x1xf32>
    %112 = vector.broadcast %111 : vector<8x1xf32> to vector<8x128xf32>
    %113 = arith.subf %105, %112 : vector<8x128xf32>
    %114 = arith.mulf %113, %113 : vector<8x128xf32>
    %cst_38 = arith.constant dense<0.000000e+00> : vector<8xf32>
    %115 = vector.multi_reduction <add>, %114, %cst_38 [1] : vector<8x128xf32> to vector<8xf32>
    %116 = vector.shape_cast %115 : vector<8xf32> to vector<8x1xf32>
    %cst_39 = arith.constant 1.280000e+02 : f32
    %117 = vector.broadcast %cst_39 : f32 to vector<8x1xf32>
    %118 = arith.divf %116, %117 : vector<8x1xf32>
    %cst_40 = arith.constant 9.99999996E-13 : f32
    %119 = vector.broadcast %cst_40 : f32 to vector<8x1xf32>
    %120 = arith.addf %118, %119 : vector<8x1xf32>
    %121 = math.rsqrt %120 : vector<8x1xf32>
    %122 = vector.broadcast %111 : vector<8x1xf32> to vector<8x128xf32>
    %123 = arith.subf %105, %122 : vector<8x128xf32>
    %124 = vector.broadcast %121 : vector<8x1xf32> to vector<8x128xf32>
    %125 = arith.mulf %123, %124 : vector<8x128xf32>
    %126 = vector.broadcast %106 : vector<1x128xf32> to vector<8x128xf32>
    %127 = arith.mulf %125, %126 : vector<8x128xf32>
    %128 = vector.broadcast %107 : vector<1x128xf32> to vector<8x128xf32>
    %129 = arith.addf %127, %128 : vector<8x128xf32>
    %cst_41 = arith.constant 0.000000e+00 : f32
    %130 = vector.broadcast %cst_41 : f32 to vector<8x128xf32>
    %131 = tpu.concatenate %61, %129, %130 in 0 : vector<16x128xf32>, vector<8x128xf32>, vector<8x128xf32> -> vector<32x128xf32>
    %c0_42 = arith.constant 0 : index
    %c0_43 = arith.constant 0 : index
    %c0_44 = arith.constant 0 : index
    %132 = vector.load %arg5[%c0_42, %c0_43, %c0_44] : memref<1x1x32xf32, #tpu.memory_space<vmem>>, vector<1x1x32xf32>
    %133 = vector.shape_cast %132 : vector<1x1x32xf32> to vector<1x32xf32>
    %cst_45 = arith.constant 1.000000e+00 : f32
    %134 = vector.broadcast %cst_45 : f32 to vector<1x32xf32>
    %135 = arith.subf %134, %133 : vector<1x32xf32>
    %cst_46 = arith.constant -1.000000e+04 : f32
    %136 = vector.broadcast %cst_46 : f32 to vector<1x32xf32>
    %137 = arith.mulf %135, %136 : vector<1x32xf32>
    %138 = arith.truncf %131 : vector<32x128xf32> to vector<32x128xbf16>
    %c0_47 = arith.constant 0 : index
    %c0_48 = arith.constant 0 : index
    %c0_49 = arith.constant 0 : index
    %139 = vector.load %arg16[%c0_47, %c0_48, %c0_49] : memref<2x128x384xbf16, #tpu.memory_space<vmem>>, vector<1x128x384xbf16>
    %140 = vector.shape_cast %139 : vector<1x128x384xbf16> to vector<128x384xbf16>
    %cst_50 = arith.constant dense<0.000000e+00> : vector<32x384xf32>
    %141 = tpu.matmul %138, %140, %cst_50 {dimension_numbers = #tpu.dot_dimension_numbers<[1], [0], [0], [1], [0, 0, 1, 1], [], []>} : vector<32x128xbf16>, vector<128x384xbf16>, vector<32x384xf32> -> vector<32x384xf32>
    %c0_51 = arith.constant 0 : index
    %c0_52 = arith.constant 0 : index
    %c0_53 = arith.constant 0 : index
    %142 = vector.load %arg17[%c0_51, %c0_52, %c0_53] : memref<2x1x384xf32, #tpu.memory_space<vmem>>, vector<1x1x384xf32>
    %143 = vector.shape_cast %142 : vector<1x1x384xf32> to vector<1x384xf32>
    %144 = vector.broadcast %143 : vector<1x384xf32> to vector<32x384xf32>
    %145 = arith.addf %141, %144 : vector<32x384xf32>
    %146 = vector.extract_strided_slice %145 {offsets = [0, 0], sizes = [32, 128], strides = [1, 1]} : vector<32x384xf32> to vector<32x128xf32>
    %cst_54 = arith.constant 0.176776692 : f32
    %147 = vector.broadcast %cst_54 : f32 to vector<32x128xf32>
    %148 = arith.mulf %146, %147 : vector<32x128xf32>
    %149 = vector.extract_strided_slice %145 {offsets = [0, 128], sizes = [32, 128], strides = [1, 1]} : vector<32x384xf32> to vector<32x128xf32>
    %150 = vector.extract_strided_slice %145 {offsets = [0, 256], sizes = [32, 128], strides = [1, 1]} : vector<32x384xf32> to vector<32x128xf32>
    %151 = vector.extract_strided_slice %148 {offsets = [0, 0], sizes = [32, 32], strides = [1, 1]} : vector<32x128xf32> to vector<32x32xf32>
    %152 = arith.truncf %151 : vector<32x32xf32> to vector<32x32xbf16>
    %153 = vector.extract_strided_slice %149 {offsets = [0, 0], sizes = [32, 32], strides = [1, 1]} : vector<32x128xf32> to vector<32x32xf32>
    %154 = arith.truncf %153 : vector<32x32xf32> to vector<32x32xbf16>
    %cst_55 = arith.constant dense<0.000000e+00> : vector<32x32xf32>
    %155 = tpu.matmul %152, %154, %cst_55 {dimension_numbers = #tpu.dot_dimension_numbers<[1], [1], [0], [0], [0, 0, 1, 0], [], []>} : vector<32x32xbf16>, vector<32x32xbf16>, vector<32x32xf32> -> vector<32x32xf32>
    %156 = vector.broadcast %137 : vector<1x32xf32> to vector<32x32xf32>
    %157 = arith.addf %155, %156 : vector<32x32xf32>
    %cst_56 = arith.constant dense<0xFF800000> : vector<32xf32>
    %158 = vector.multi_reduction <maximumf>, %157, %cst_56 [1] : vector<32x32xf32> to vector<32xf32>
    %159 = vector.shape_cast %158 : vector<32xf32> to vector<32x1xf32>
    %160 = vector.broadcast %159 : vector<32x1xf32> to vector<32x32xf32>
    %161 = arith.subf %157, %160 : vector<32x32xf32>
    %162 = math.exp %161 : vector<32x32xf32>
    %cst_57 = arith.constant dense<0.000000e+00> : vector<32xf32>
    %163 = vector.multi_reduction <add>, %162, %cst_57 [1] : vector<32x32xf32> to vector<32xf32>
    %164 = vector.shape_cast %163 : vector<32xf32> to vector<32x1xf32>
    %165 = tpu.reciprocal %164 {approx = true} : vector<32x1xf32> -> vector<32x1xf32>
    %166 = vector.broadcast %165 : vector<32x1xf32> to vector<32x32xf32>
    %167 = arith.mulf %162, %166 : vector<32x32xf32>
    %168 = arith.truncf %167 : vector<32x32xf32> to vector<32x32xbf16>
    %169 = vector.extract_strided_slice %150 {offsets = [0, 0], sizes = [32, 32], strides = [1, 1]} : vector<32x128xf32> to vector<32x32xf32>
    %170 = arith.truncf %169 : vector<32x32xf32> to vector<32x32xbf16>
    %cst_58 = arith.constant dense<0.000000e+00> : vector<32x32xf32>
    %171 = tpu.matmul %168, %170, %cst_58 {dimension_numbers = #tpu.dot_dimension_numbers<[1], [0], [0], [1], [0, 0, 1, 1], [], []>} : vector<32x32xbf16>, vector<32x32xbf16>, vector<32x32xf32> -> vector<32x32xf32>
    %172 = arith.truncf %171 : vector<32x32xf32> to vector<32x32xbf16>
    %c0_59 = arith.constant 0 : index
    %c0_60 = arith.constant 0 : index
    %173 = vector.load %arg40[%c0_59, %c0_60] : memref<32x128xbf16, #tpu.memory_space<vmem>>, vector<32x32xbf16>
    tpu.vector_store %arg40[%c0_59, %c0_60], %172 {strides = array<i32>} : memref<32x128xbf16, #tpu.memory_space<vmem>>, vector<32x32xbf16>,
    %174 = vector.extract_strided_slice %148 {offsets = [0, 32], sizes = [32, 32], strides = [1, 1]} : vector<32x128xf32> to vector<32x32xf32>
    %175 = arith.truncf %174 : vector<32x32xf32> to vector<32x32xbf16>
    %176 = vector.extract_strided_slice %149 {offsets = [0, 32], sizes = [32, 32], strides = [1, 1]} : vector<32x128xf32> to vector<32x32xf32>
    %177 = arith.truncf %176 : vector<32x32xf32> to vector<32x32xbf16>
    %cst_61 = arith.constant dense<0.000000e+00> : vector<32x32xf32>
    %178 = tpu.matmul %175, %177, %cst_61 {dimension_numbers = #tpu.dot_dimension_numbers<[1], [1], [0], [0], [0, 0, 1, 0], [], []>} : vector<32x32xbf16>, vector<32x32xbf16>, vector<32x32xf32> -> vector<32x32xf32>
    %179 = vector.broadcast %137 : vector<1x32xf32> to vector<32x32xf32>
    %180 = arith.addf %178, %179 : vector<32x32xf32>
    %cst_62 = arith.constant dense<0xFF800000> : vector<32xf32>
    %181 = vector.multi_reduction <maximumf>, %180, %cst_62 [1] : vector<32x32xf32> to vector<32xf32>
    %182 = vector.shape_cast %181 : vector<32xf32> to vector<32x1xf32>
    %183 = vector.broadcast %182 : vector<32x1xf32> to vector<32x32xf32>
    %184 = arith.subf %180, %183 : vector<32x32xf32>
    %185 = math.exp %184 : vector<32x32xf32>
    %cst_63 = arith.constant dense<0.000000e+00> : vector<32xf32>
    %186 = vector.multi_reduction <add>, %185, %cst_63 [1] : vector<32x32xf32> to vector<32xf32>
    %187 = vector.shape_cast %186 : vector<32xf32> to vector<32x1xf32>
    %188 = tpu.reciprocal %187 {approx = true} : vector<32x1xf32> -> vector<32x1xf32>
    %189 = vector.broadcast %188 : vector<32x1xf32> to vector<32x32xf32>
    %190 = arith.mulf %185, %189 : vector<32x32xf32>
    %191 = arith.truncf %190 : vector<32x32xf32> to vector<32x32xbf16>
    %192 = vector.extract_strided_slice %150 {offsets = [0, 32], sizes = [32, 32], strides = [1, 1]} : vector<32x128xf32> to vector<32x32xf32>
    %193 = arith.truncf %192 : vector<32x32xf32> to vector<32x32xbf16>
    %cst_64 = arith.constant dense<0.000000e+00> : vector<32x32xf32>
    %194 = tpu.matmul %191, %193, %cst_64 {dimension_numbers = #tpu.dot_dimension_numbers<[1], [0], [0], [1], [0, 0, 1, 1], [], []>} : vector<32x32xbf16>, vector<32x32xbf16>, vector<32x32xf32> -> vector<32x32xf32>
    %195 = arith.truncf %194 : vector<32x32xf32> to vector<32x32xbf16>
    %c0_65 = arith.constant 0 : index
    %c32 = arith.constant 32 : index
    %196 = vector.load %arg40[%c0_65, %c32] : memref<32x128xbf16, #tpu.memory_space<vmem>>, vector<32x32xbf16>
    tpu.vector_store %arg40[%c0_65, %c32], %195 {strides = array<i32>} : memref<32x128xbf16, #tpu.memory_space<vmem>>, vector<32x32xbf16>,
    %197 = vector.extract_strided_slice %148 {offsets = [0, 64], sizes = [32, 32], strides = [1, 1]} : vector<32x128xf32> to vector<32x32xf32>
    %198 = arith.truncf %197 : vector<32x32xf32> to vector<32x32xbf16>
    %199 = vector.extract_strided_slice %149 {offsets = [0, 64], sizes = [32, 32], strides = [1, 1]} : vector<32x128xf32> to vector<32x32xf32>
    %200 = arith.truncf %199 : vector<32x32xf32> to vector<32x32xbf16>
    %cst_66 = arith.constant dense<0.000000e+00> : vector<32x32xf32>
    %201 = tpu.matmul %198, %200, %cst_66 {dimension_numbers = #tpu.dot_dimension_numbers<[1], [1], [0], [0], [0, 0, 1, 0], [], []>} : vector<32x32xbf16>, vector<32x32xbf16>, vector<32x32xf32> -> vector<32x32xf32>
    %202 = vector.broadcast %137 : vector<1x32xf32> to vector<32x32xf32>
    %203 = arith.addf %201, %202 : vector<32x32xf32>
    %cst_67 = arith.constant dense<0xFF800000> : vector<32xf32>
    %204 = vector.multi_reduction <maximumf>, %203, %cst_67 [1] : vector<32x32xf32> to vector<32xf32>
    %205 = vector.shape_cast %204 : vector<32xf32> to vector<32x1xf32>
    %206 = vector.broadcast %205 : vector<32x1xf32> to vector<32x32xf32>
    %207 = arith.subf %203, %206 : vector<32x32xf32>
    %208 = math.exp %207 : vector<32x32xf32>
    %cst_68 = arith.constant dense<0.000000e+00> : vector<32xf32>
    %209 = vector.multi_reduction <add>, %208, %cst_68 [1] : vector<32x32xf32> to vector<32xf32>
    %210 = vector.shape_cast %209 : vector<32xf32> to vector<32x1xf32>
    %211 = tpu.reciprocal %210 {approx = true} : vector<32x1xf32> -> vector<32x1xf32>
    %212 = vector.broadcast %211 : vector<32x1xf32> to vector<32x32xf32>
    %213 = arith.mulf %208, %212 : vector<32x32xf32>
    %214 = arith.truncf %213 : vector<32x32xf32> to vector<32x32xbf16>
    %215 = vector.extract_strided_slice %150 {offsets = [0, 64], sizes = [32, 32], strides = [1, 1]} : vector<32x128xf32> to vector<32x32xf32>
    %216 = arith.truncf %215 : vector<32x32xf32> to vector<32x32xbf16>
    %cst_69 = arith.constant dense<0.000000e+00> : vector<32x32xf32>
    %217 = tpu.matmul %214, %216, %cst_69 {dimension_numbers = #tpu.dot_dimension_numbers<[1], [0], [0], [1], [0, 0, 1, 1], [], []>} : vector<32x32xbf16>, vector<32x32xbf16>, vector<32x32xf32> -> vector<32x32xf32>
    %218 = arith.truncf %217 : vector<32x32xf32> to vector<32x32xbf16>
    %c0_70 = arith.constant 0 : index
    %c64 = arith.constant 64 : index
    %219 = vector.load %arg40[%c0_70, %c64] : memref<32x128xbf16, #tpu.memory_space<vmem>>, vector<32x32xbf16>
    tpu.vector_store %arg40[%c0_70, %c64], %218 {strides = array<i32>} : memref<32x128xbf16, #tpu.memory_space<vmem>>, vector<32x32xbf16>,
    %220 = vector.extract_strided_slice %148 {offsets = [0, 96], sizes = [32, 32], strides = [1, 1]} : vector<32x128xf32> to vector<32x32xf32>
    %221 = arith.truncf %220 : vector<32x32xf32> to vector<32x32xbf16>
    %222 = vector.extract_strided_slice %149 {offsets = [0, 96], sizes = [32, 32], strides = [1, 1]} : vector<32x128xf32> to vector<32x32xf32>
    %223 = arith.truncf %222 : vector<32x32xf32> to vector<32x32xbf16>
    %cst_71 = arith.constant dense<0.000000e+00> : vector<32x32xf32>
    %224 = tpu.matmul %221, %223, %cst_71 {dimension_numbers = #tpu.dot_dimension_numbers<[1], [1], [0], [0], [0, 0, 1, 0], [], []>} : vector<32x32xbf16>, vector<32x32xbf16>, vector<32x32xf32> -> vector<32x32xf32>
    %225 = vector.broadcast %137 : vector<1x32xf32> to vector<32x32xf32>
    %226 = arith.addf %224, %225 : vector<32x32xf32>
    %cst_72 = arith.constant dense<0xFF800000> : vector<32xf32>
    %227 = vector.multi_reduction <maximumf>, %226, %cst_72 [1] : vector<32x32xf32> to vector<32xf32>
    %228 = vector.shape_cast %227 : vector<32xf32> to vector<32x1xf32>
    %229 = vector.broadcast %228 : vector<32x1xf32> to vector<32x32xf32>
    %230 = arith.subf %226, %229 : vector<32x32xf32>
    %231 = math.exp %230 : vector<32x32xf32>
    %cst_73 = arith.constant dense<0.000000e+00> : vector<32xf32>
    %232 = vector.multi_reduction <add>, %231, %cst_73 [1] : vector<32x32xf32> to vector<32xf32>
    %233 = vector.shape_cast %232 : vector<32xf32> to vector<32x1xf32>
    %234 = tpu.reciprocal %233 {approx = true} : vector<32x1xf32> -> vector<32x1xf32>
    %235 = vector.broadcast %234 : vector<32x1xf32> to vector<32x32xf32>
    %236 = arith.mulf %231, %235 : vector<32x32xf32>
    %237 = arith.truncf %236 : vector<32x32xf32> to vector<32x32xbf16>
    %238 = vector.extract_strided_slice %150 {offsets = [0, 96], sizes = [32, 32], strides = [1, 1]} : vector<32x128xf32> to vector<32x32xf32>
    %239 = arith.truncf %238 : vector<32x32xf32> to vector<32x32xbf16>
    %cst_74 = arith.constant dense<0.000000e+00> : vector<32x32xf32>
    %240 = tpu.matmul %237, %239, %cst_74 {dimension_numbers = #tpu.dot_dimension_numbers<[1], [0], [0], [1], [0, 0, 1, 1], [], []>} : vector<32x32xbf16>, vector<32x32xbf16>, vector<32x32xf32> -> vector<32x32xf32>
    %241 = arith.truncf %240 : vector<32x32xf32> to vector<32x32xbf16>
    %c0_75 = arith.constant 0 : index
    %c96 = arith.constant 96 : index
    %242 = vector.load %arg40[%c0_75, %c96] : memref<32x128xbf16, #tpu.memory_space<vmem>>, vector<32x32xbf16>
    tpu.vector_store %arg40[%c0_75, %c96], %241 {strides = array<i32>} : memref<32x128xbf16, #tpu.memory_space<vmem>>, vector<32x32xbf16>,
    %c0_76 = arith.constant 0 : index
    %c0_77 = arith.constant 0 : index
    %243 = vector.load %arg40[%c0_76, %c0_77] : memref<32x128xbf16, #tpu.memory_space<vmem>>, vector<32x128xbf16>
    %c0_78 = arith.constant 0 : index
    %c0_79 = arith.constant 0 : index
    %c0_80 = arith.constant 0 : index
    %244 = vector.load %arg18[%c0_78, %c0_79, %c0_80] : memref<2x128x128xbf16, #tpu.memory_space<vmem>>, vector<1x128x128xbf16>
    %245 = vector.shape_cast %244 : vector<1x128x128xbf16> to vector<128x128xbf16>
    %cst_81 = arith.constant dense<0.000000e+00> : vector<32x128xf32>
    %246 = tpu.matmul %243, %245, %cst_81 {dimension_numbers = #tpu.dot_dimension_numbers<[1], [0], [0], [1], [0, 0, 1, 1], [], []>} : vector<32x128xbf16>, vector<128x128xbf16>, vector<32x128xf32> -> vector<32x128xf32>
    %c0_82 = arith.constant 0 : index
    %c0_83 = arith.constant 0 : index
    %c0_84 = arith.constant 0 : index
    %247 = vector.load %arg19[%c0_82, %c0_83, %c0_84] : memref<2x1x128xf32, #tpu.memory_space<vmem>>, vector<1x1x128xf32>
    %248 = vector.shape_cast %247 : vector<1x1x128xf32> to vector<1x128xf32>
    %249 = vector.broadcast %248 : vector<1x128xf32> to vector<32x128xf32>
    %250 = arith.addf %246, %249 : vector<32x128xf32>
    %251 = arith.addf %131, %250 : vector<32x128xf32>
    %c0_85 = arith.constant 0 : index
    %c0_86 = arith.constant 0 : index
    %c0_87 = arith.constant 0 : index
    %252 = vector.load %arg20[%c0_85, %c0_86, %c0_87] : memref<2x1x128xf32, #tpu.memory_space<vmem>>, vector<1x1x128xf32>
    %253 = vector.shape_cast %252 : vector<1x1x128xf32> to vector<1x128xf32>
    %c0_88 = arith.constant 0 : index
    %c0_89 = arith.constant 0 : index
    %c0_90 = arith.constant 0 : index
    %254 = vector.load %arg21[%c0_88, %c0_89, %c0_90] : memref<2x1x128xf32, #tpu.memory_space<vmem>>, vector<1x1x128xf32>
    %255 = vector.shape_cast %254 : vector<1x1x128xf32> to vector<1x128xf32>
    %cst_91 = arith.constant dense<0.000000e+00> : vector<32xf32>
    %256 = vector.multi_reduction <add>, %251, %cst_91 [1] : vector<32x128xf32> to vector<32xf32>
    %257 = vector.shape_cast %256 : vector<32xf32> to vector<32x1xf32>
    %cst_92 = arith.constant 1.280000e+02 : f32
    %258 = vector.broadcast %cst_92 : f32 to vector<32x1xf32>
    %259 = arith.divf %257, %258 : vector<32x1xf32>
    %260 = vector.broadcast %259 : vector<32x1xf32> to vector<32x128xf32>
    %261 = arith.subf %251, %260 : vector<32x128xf32>
    %262 = arith.mulf %261, %261 : vector<32x128xf32>
    %cst_93 = arith.constant dense<0.000000e+00> : vector<32xf32>
    %263 = vector.multi_reduction <add>, %262, %cst_93 [1] : vector<32x128xf32> to vector<32xf32>
    %264 = vector.shape_cast %263 : vector<32xf32> to vector<32x1xf32>
    %cst_94 = arith.constant 1.280000e+02 : f32
    %265 = vector.broadcast %cst_94 : f32 to vector<32x1xf32>
    %266 = arith.divf %264, %265 : vector<32x1xf32>
    %cst_95 = arith.constant 9.99999996E-13 : f32
    %267 = vector.broadcast %cst_95 : f32 to vector<32x1xf32>
    %268 = arith.addf %266, %267 : vector<32x1xf32>
    %269 = math.rsqrt %268 : vector<32x1xf32>
    %270 = vector.broadcast %259 : vector<32x1xf32> to vector<32x128xf32>
    %271 = arith.subf %251, %270 : vector<32x128xf32>
    %272 = vector.broadcast %269 : vector<32x1xf32> to vector<32x128xf32>
    %273 = arith.mulf %271, %272 : vector<32x128xf32>
    %274 = vector.broadcast %253 : vector<1x128xf32> to vector<32x128xf32>
    %275 = arith.mulf %273, %274 : vector<32x128xf32>
    %276 = vector.broadcast %255 : vector<1x128xf32> to vector<32x128xf32>
    %277 = arith.addf %275, %276 : vector<32x128xf32>
    %278 = arith.truncf %277 : vector<32x128xf32> to vector<32x128xbf16>
    %c0_96 = arith.constant 0 : index
    %c0_97 = arith.constant 0 : index
    %c0_98 = arith.constant 0 : index
    %279 = vector.load %arg22[%c0_96, %c0_97, %c0_98] : memref<2x128x256xbf16, #tpu.memory_space<vmem>>, vector<1x128x256xbf16>
    %280 = vector.shape_cast %279 : vector<1x128x256xbf16> to vector<128x256xbf16>
    %cst_99 = arith.constant dense<0.000000e+00> : vector<32x256xf32>
    %281 = tpu.matmul %278, %280, %cst_99 {dimension_numbers = #tpu.dot_dimension_numbers<[1], [0], [0], [1], [0, 0, 1, 1], [], []>} : vector<32x128xbf16>, vector<128x256xbf16>, vector<32x256xf32> -> vector<32x256xf32>
    %c0_100 = arith.constant 0 : index
    %c0_101 = arith.constant 0 : index
    %c0_102 = arith.constant 0 : index
    %282 = vector.load %arg23[%c0_100, %c0_101, %c0_102] : memref<2x1x256xf32, #tpu.memory_space<vmem>>, vector<1x1x256xf32>
    %283 = vector.shape_cast %282 : vector<1x1x256xf32> to vector<1x256xf32>
    %284 = vector.broadcast %283 : vector<1x256xf32> to vector<32x256xf32>
    %285 = arith.addf %281, %284 : vector<32x256xf32>
    %286 = arith.mulf %285, %285 : vector<32x256xf32>
    %287 = arith.mulf %285, %286 : vector<32x256xf32>
    %cst_103 = arith.constant 4.471500e-02 : f32
    %288 = vector.broadcast %cst_103 : f32 to vector<32x256xf32>
    %289 = arith.mulf %288, %287 : vector<32x256xf32>
    %290 = arith.addf %285, %289 : vector<32x256xf32>
    %cst_104 = arith.constant 0.797884583 : f32
    %291 = vector.broadcast %cst_104 : f32 to vector<32x256xf32>
    %292 = arith.mulf %291, %290 : vector<32x256xf32>
    %293 = math.tanh %292 : vector<32x256xf32>
    %cst_105 = arith.constant 1.000000e+00 : f32
    %294 = vector.broadcast %cst_105 : f32 to vector<32x256xf32>
    %295 = arith.addf %294, %293 : vector<32x256xf32>
    %cst_106 = arith.constant 5.000000e-01 : f32
    %296 = vector.broadcast %cst_106 : f32 to vector<32x256xf32>
    %297 = arith.mulf %296, %295 : vector<32x256xf32>
    %298 = arith.mulf %285, %297 : vector<32x256xf32>
    %299 = arith.truncf %298 : vector<32x256xf32> to vector<32x256xbf16>
    %c0_107 = arith.constant 0 : index
    %c0_108 = arith.constant 0 : index
    %c0_109 = arith.constant 0 : index
    %300 = vector.load %arg24[%c0_107, %c0_108, %c0_109] : memref<2x256x128xbf16, #tpu.memory_space<vmem>>, vector<1x256x128xbf16>
    %301 = vector.shape_cast %300 : vector<1x256x128xbf16> to vector<256x128xbf16>
    %cst_110 = arith.constant dense<0.000000e+00> : vector<32x128xf32>
    %302 = tpu.matmul %299, %301, %cst_110 {dimension_numbers = #tpu.dot_dimension_numbers<[1], [0], [0], [1], [0, 0, 1, 1], [], []>} : vector<32x256xbf16>, vector<256x128xbf16>, vector<32x128xf32> -> vector<32x128xf32>
    %c0_111 = arith.constant 0 : index
    %c0_112 = arith.constant 0 : index
    %c0_113 = arith.constant 0 : index
    %303 = vector.load %arg25[%c0_111, %c0_112, %c0_113] : memref<2x1x128xf32, #tpu.memory_space<vmem>>, vector<1x1x128xf32>
    %304 = vector.shape_cast %303 : vector<1x1x128xf32> to vector<1x128xf32>
    %305 = vector.broadcast %304 : vector<1x128xf32> to vector<32x128xf32>
    %306 = arith.addf %302, %305 : vector<32x128xf32>
    %307 = arith.addf %277, %306 : vector<32x128xf32>
    %c0_114 = arith.constant 0 : index
    %c0_115 = arith.constant 0 : index
    %c0_116 = arith.constant 0 : index
    %308 = vector.load %arg26[%c0_114, %c0_115, %c0_116] : memref<2x1x128xf32, #tpu.memory_space<vmem>>, vector<1x1x128xf32>
    %309 = vector.shape_cast %308 : vector<1x1x128xf32> to vector<1x128xf32>
    %c0_117 = arith.constant 0 : index
    %c0_118 = arith.constant 0 : index
    %c0_119 = arith.constant 0 : index
    %310 = vector.load %arg27[%c0_117, %c0_118, %c0_119] : memref<2x1x128xf32, #tpu.memory_space<vmem>>, vector<1x1x128xf32>
    %311 = vector.shape_cast %310 : vector<1x1x128xf32> to vector<1x128xf32>
    %cst_120 = arith.constant dense<0.000000e+00> : vector<32xf32>
    %312 = vector.multi_reduction <add>, %307, %cst_120 [1] : vector<32x128xf32> to vector<32xf32>
    %313 = vector.shape_cast %312 : vector<32xf32> to vector<32x1xf32>
    %cst_121 = arith.constant 1.280000e+02 : f32
    %314 = vector.broadcast %cst_121 : f32 to vector<32x1xf32>
    %315 = arith.divf %313, %314 : vector<32x1xf32>
    %316 = vector.broadcast %315 : vector<32x1xf32> to vector<32x128xf32>
    %317 = arith.subf %307, %316 : vector<32x128xf32>
    %318 = arith.mulf %317, %317 : vector<32x128xf32>
    %cst_122 = arith.constant dense<0.000000e+00> : vector<32xf32>
    %319 = vector.multi_reduction <add>, %318, %cst_122 [1] : vector<32x128xf32> to vector<32xf32>
    %320 = vector.shape_cast %319 : vector<32xf32> to vector<32x1xf32>
    %cst_123 = arith.constant 1.280000e+02 : f32
    %321 = vector.broadcast %cst_123 : f32 to vector<32x1xf32>
    %322 = arith.divf %320, %321 : vector<32x1xf32>
    %cst_124 = arith.constant 9.99999996E-13 : f32
    %323 = vector.broadcast %cst_124 : f32 to vector<32x1xf32>
    %324 = arith.addf %322, %323 : vector<32x1xf32>
    %325 = math.rsqrt %324 : vector<32x1xf32>
    %326 = vector.broadcast %315 : vector<32x1xf32> to vector<32x128xf32>
    %327 = arith.subf %307, %326 : vector<32x128xf32>
    %328 = vector.broadcast %325 : vector<32x1xf32> to vector<32x128xf32>
    %329 = arith.mulf %327, %328 : vector<32x128xf32>
    %330 = vector.broadcast %309 : vector<1x128xf32> to vector<32x128xf32>
    %331 = arith.mulf %329, %330 : vector<32x128xf32>
    %332 = vector.broadcast %311 : vector<1x128xf32> to vector<32x128xf32>
    %333 = arith.addf %331, %332 : vector<32x128xf32>
    %334 = arith.truncf %333 : vector<32x128xf32> to vector<32x128xbf16>
    %c1 = arith.constant 1 : index
    %c0_125 = arith.constant 0 : index
    %c0_126 = arith.constant 0 : index
    %335 = vector.load %arg16[%c1, %c0_125, %c0_126] : memref<2x128x384xbf16, #tpu.memory_space<vmem>>, vector<1x128x384xbf16>
    %336 = vector.shape_cast %335 : vector<1x128x384xbf16> to vector<128x384xbf16>
    %cst_127 = arith.constant dense<0.000000e+00> : vector<32x384xf32>
    %337 = tpu.matmul %334, %336, %cst_127 {dimension_numbers = #tpu.dot_dimension_numbers<[1], [0], [0], [1], [0, 0, 1, 1], [], []>} : vector<32x128xbf16>, vector<128x384xbf16>, vector<32x384xf32> -> vector<32x384xf32>
    %c1_128 = arith.constant 1 : index
    %c0_129 = arith.constant 0 : index
    %c0_130 = arith.constant 0 : index
    %338 = vector.load %arg17[%c1_128, %c0_129, %c0_130] : memref<2x1x384xf32, #tpu.memory_space<vmem>>, vector<1x1x384xf32>
    %339 = vector.shape_cast %338 : vector<1x1x384xf32> to vector<1x384xf32>
    %340 = vector.broadcast %339 : vector<1x384xf32> to vector<32x384xf32>
    %341 = arith.addf %337, %340 : vector<32x384xf32>
    %342 = vector.extract_strided_slice %341 {offsets = [0, 0], sizes = [32, 128], strides = [1, 1]} : vector<32x384xf32> to vector<32x128xf32>
    %cst_131 = arith.constant 0.176776692 : f32
    %343 = vector.broadcast %cst_131 : f32 to vector<32x128xf32>
    %344 = arith.mulf %342, %343 : vector<32x128xf32>
    %345 = vector.extract_strided_slice %341 {offsets = [0, 128], sizes = [32, 128], strides = [1, 1]} : vector<32x384xf32> to vector<32x128xf32>
    %346 = vector.extract_strided_slice %341 {offsets = [0, 256], sizes = [32, 128], strides = [1, 1]} : vector<32x384xf32> to vector<32x128xf32>
    %347 = vector.extract_strided_slice %344 {offsets = [0, 0], sizes = [32, 32], strides = [1, 1]} : vector<32x128xf32> to vector<32x32xf32>
    %348 = arith.truncf %347 : vector<32x32xf32> to vector<32x32xbf16>
    %349 = vector.extract_strided_slice %345 {offsets = [0, 0], sizes = [32, 32], strides = [1, 1]} : vector<32x128xf32> to vector<32x32xf32>
    %350 = arith.truncf %349 : vector<32x32xf32> to vector<32x32xbf16>
    %cst_132 = arith.constant dense<0.000000e+00> : vector<32x32xf32>
    %351 = tpu.matmul %348, %350, %cst_132 {dimension_numbers = #tpu.dot_dimension_numbers<[1], [1], [0], [0], [0, 0, 1, 0], [], []>} : vector<32x32xbf16>, vector<32x32xbf16>, vector<32x32xf32> -> vector<32x32xf32>
    %352 = vector.broadcast %137 : vector<1x32xf32> to vector<32x32xf32>
    %353 = arith.addf %351, %352 : vector<32x32xf32>
    %cst_133 = arith.constant dense<0xFF800000> : vector<32xf32>
    %354 = vector.multi_reduction <maximumf>, %353, %cst_133 [1] : vector<32x32xf32> to vector<32xf32>
    %355 = vector.shape_cast %354 : vector<32xf32> to vector<32x1xf32>
    %356 = vector.broadcast %355 : vector<32x1xf32> to vector<32x32xf32>
    %357 = arith.subf %353, %356 : vector<32x32xf32>
    %358 = math.exp %357 : vector<32x32xf32>
    %cst_134 = arith.constant dense<0.000000e+00> : vector<32xf32>
    %359 = vector.multi_reduction <add>, %358, %cst_134 [1] : vector<32x32xf32> to vector<32xf32>
    %360 = vector.shape_cast %359 : vector<32xf32> to vector<32x1xf32>
    %361 = tpu.reciprocal %360 {approx = true} : vector<32x1xf32> -> vector<32x1xf32>
    %362 = vector.broadcast %361 : vector<32x1xf32> to vector<32x32xf32>
    %363 = arith.mulf %358, %362 : vector<32x32xf32>
    %364 = arith.truncf %363 : vector<32x32xf32> to vector<32x32xbf16>
    %365 = vector.extract_strided_slice %346 {offsets = [0, 0], sizes = [32, 32], strides = [1, 1]} : vector<32x128xf32> to vector<32x32xf32>
    %366 = arith.truncf %365 : vector<32x32xf32> to vector<32x32xbf16>
    %cst_135 = arith.constant dense<0.000000e+00> : vector<32x32xf32>
    %367 = tpu.matmul %364, %366, %cst_135 {dimension_numbers = #tpu.dot_dimension_numbers<[1], [0], [0], [1], [0, 0, 1, 1], [], []>} : vector<32x32xbf16>, vector<32x32xbf16>, vector<32x32xf32> -> vector<32x32xf32>
    %368 = arith.truncf %367 : vector<32x32xf32> to vector<32x32xbf16>
    %c0_136 = arith.constant 0 : index
    %c0_137 = arith.constant 0 : index
    %369 = vector.load %arg40[%c0_136, %c0_137] : memref<32x128xbf16, #tpu.memory_space<vmem>>, vector<32x32xbf16>
    tpu.vector_store %arg40[%c0_136, %c0_137], %368 {strides = array<i32>} : memref<32x128xbf16, #tpu.memory_space<vmem>>, vector<32x32xbf16>,
    %370 = vector.extract_strided_slice %344 {offsets = [0, 32], sizes = [32, 32], strides = [1, 1]} : vector<32x128xf32> to vector<32x32xf32>
    %371 = arith.truncf %370 : vector<32x32xf32> to vector<32x32xbf16>
    %372 = vector.extract_strided_slice %345 {offsets = [0, 32], sizes = [32, 32], strides = [1, 1]} : vector<32x128xf32> to vector<32x32xf32>
    %373 = arith.truncf %372 : vector<32x32xf32> to vector<32x32xbf16>
    %cst_138 = arith.constant dense<0.000000e+00> : vector<32x32xf32>
    %374 = tpu.matmul %371, %373, %cst_138 {dimension_numbers = #tpu.dot_dimension_numbers<[1], [1], [0], [0], [0, 0, 1, 0], [], []>} : vector<32x32xbf16>, vector<32x32xbf16>, vector<32x32xf32> -> vector<32x32xf32>
    %375 = vector.broadcast %137 : vector<1x32xf32> to vector<32x32xf32>
    %376 = arith.addf %374, %375 : vector<32x32xf32>
    %cst_139 = arith.constant dense<0xFF800000> : vector<32xf32>
    %377 = vector.multi_reduction <maximumf>, %376, %cst_139 [1] : vector<32x32xf32> to vector<32xf32>
    %378 = vector.shape_cast %377 : vector<32xf32> to vector<32x1xf32>
    %379 = vector.broadcast %378 : vector<32x1xf32> to vector<32x32xf32>
    %380 = arith.subf %376, %379 : vector<32x32xf32>
    %381 = math.exp %380 : vector<32x32xf32>
    %cst_140 = arith.constant dense<0.000000e+00> : vector<32xf32>
    %382 = vector.multi_reduction <add>, %381, %cst_140 [1] : vector<32x32xf32> to vector<32xf32>
    %383 = vector.shape_cast %382 : vector<32xf32> to vector<32x1xf32>
    %384 = tpu.reciprocal %383 {approx = true} : vector<32x1xf32> -> vector<32x1xf32>
    %385 = vector.broadcast %384 : vector<32x1xf32> to vector<32x32xf32>
    %386 = arith.mulf %381, %385 : vector<32x32xf32>
    %387 = arith.truncf %386 : vector<32x32xf32> to vector<32x32xbf16>
    %388 = vector.extract_strided_slice %346 {offsets = [0, 32], sizes = [32, 32], strides = [1, 1]} : vector<32x128xf32> to vector<32x32xf32>
    %389 = arith.truncf %388 : vector<32x32xf32> to vector<32x32xbf16>
    %cst_141 = arith.constant dense<0.000000e+00> : vector<32x32xf32>
    %390 = tpu.matmul %387, %389, %cst_141 {dimension_numbers = #tpu.dot_dimension_numbers<[1], [0], [0], [1], [0, 0, 1, 1], [], []>} : vector<32x32xbf16>, vector<32x32xbf16>, vector<32x32xf32> -> vector<32x32xf32>
    %391 = arith.truncf %390 : vector<32x32xf32> to vector<32x32xbf16>
    %c0_142 = arith.constant 0 : index
    %c32_143 = arith.constant 32 : index
    %392 = vector.load %arg40[%c0_142, %c32_143] : memref<32x128xbf16, #tpu.memory_space<vmem>>, vector<32x32xbf16>
    tpu.vector_store %arg40[%c0_142, %c32_143], %391 {strides = array<i32>} : memref<32x128xbf16, #tpu.memory_space<vmem>>, vector<32x32xbf16>,
    %393 = vector.extract_strided_slice %344 {offsets = [0, 64], sizes = [32, 32], strides = [1, 1]} : vector<32x128xf32> to vector<32x32xf32>
    %394 = arith.truncf %393 : vector<32x32xf32> to vector<32x32xbf16>
    %395 = vector.extract_strided_slice %345 {offsets = [0, 64], sizes = [32, 32], strides = [1, 1]} : vector<32x128xf32> to vector<32x32xf32>
    %396 = arith.truncf %395 : vector<32x32xf32> to vector<32x32xbf16>
    %cst_144 = arith.constant dense<0.000000e+00> : vector<32x32xf32>
    %397 = tpu.matmul %394, %396, %cst_144 {dimension_numbers = #tpu.dot_dimension_numbers<[1], [1], [0], [0], [0, 0, 1, 0], [], []>} : vector<32x32xbf16>, vector<32x32xbf16>, vector<32x32xf32> -> vector<32x32xf32>
    %398 = vector.broadcast %137 : vector<1x32xf32> to vector<32x32xf32>
    %399 = arith.addf %397, %398 : vector<32x32xf32>
    %cst_145 = arith.constant dense<0xFF800000> : vector<32xf32>
    %400 = vector.multi_reduction <maximumf>, %399, %cst_145 [1] : vector<32x32xf32> to vector<32xf32>
    %401 = vector.shape_cast %400 : vector<32xf32> to vector<32x1xf32>
    %402 = vector.broadcast %401 : vector<32x1xf32> to vector<32x32xf32>
    %403 = arith.subf %399, %402 : vector<32x32xf32>
    %404 = math.exp %403 : vector<32x32xf32>
    %cst_146 = arith.constant dense<0.000000e+00> : vector<32xf32>
    %405 = vector.multi_reduction <add>, %404, %cst_146 [1] : vector<32x32xf32> to vector<32xf32>
    %406 = vector.shape_cast %405 : vector<32xf32> to vector<32x1xf32>
    %407 = tpu.reciprocal %406 {approx = true} : vector<32x1xf32> -> vector<32x1xf32>
    %408 = vector.broadcast %407 : vector<32x1xf32> to vector<32x32xf32>
    %409 = arith.mulf %404, %408 : vector<32x32xf32>
    %410 = arith.truncf %409 : vector<32x32xf32> to vector<32x32xbf16>
    %411 = vector.extract_strided_slice %346 {offsets = [0, 64], sizes = [32, 32], strides = [1, 1]} : vector<32x128xf32> to vector<32x32xf32>
    %412 = arith.truncf %411 : vector<32x32xf32> to vector<32x32xbf16>
    %cst_147 = arith.constant dense<0.000000e+00> : vector<32x32xf32>
    %413 = tpu.matmul %410, %412, %cst_147 {dimension_numbers = #tpu.dot_dimension_numbers<[1], [0], [0], [1], [0, 0, 1, 1], [], []>} : vector<32x32xbf16>, vector<32x32xbf16>, vector<32x32xf32> -> vector<32x32xf32>
    %414 = arith.truncf %413 : vector<32x32xf32> to vector<32x32xbf16>
    %c0_148 = arith.constant 0 : index
    %c64_149 = arith.constant 64 : index
    %415 = vector.load %arg40[%c0_148, %c64_149] : memref<32x128xbf16, #tpu.memory_space<vmem>>, vector<32x32xbf16>
    tpu.vector_store %arg40[%c0_148, %c64_149], %414 {strides = array<i32>} : memref<32x128xbf16, #tpu.memory_space<vmem>>, vector<32x32xbf16>,
    %416 = vector.extract_strided_slice %344 {offsets = [0, 96], sizes = [32, 32], strides = [1, 1]} : vector<32x128xf32> to vector<32x32xf32>
    %417 = arith.truncf %416 : vector<32x32xf32> to vector<32x32xbf16>
    %418 = vector.extract_strided_slice %345 {offsets = [0, 96], sizes = [32, 32], strides = [1, 1]} : vector<32x128xf32> to vector<32x32xf32>
    %419 = arith.truncf %418 : vector<32x32xf32> to vector<32x32xbf16>
    %cst_150 = arith.constant dense<0.000000e+00> : vector<32x32xf32>
    %420 = tpu.matmul %417, %419, %cst_150 {dimension_numbers = #tpu.dot_dimension_numbers<[1], [1], [0], [0], [0, 0, 1, 0], [], []>} : vector<32x32xbf16>, vector<32x32xbf16>, vector<32x32xf32> -> vector<32x32xf32>
    %421 = vector.broadcast %137 : vector<1x32xf32> to vector<32x32xf32>
    %422 = arith.addf %420, %421 : vector<32x32xf32>
    %cst_151 = arith.constant dense<0xFF800000> : vector<32xf32>
    %423 = vector.multi_reduction <maximumf>, %422, %cst_151 [1] : vector<32x32xf32> to vector<32xf32>
    %424 = vector.shape_cast %423 : vector<32xf32> to vector<32x1xf32>
    %425 = vector.broadcast %424 : vector<32x1xf32> to vector<32x32xf32>
    %426 = arith.subf %422, %425 : vector<32x32xf32>
    %427 = math.exp %426 : vector<32x32xf32>
    %cst_152 = arith.constant dense<0.000000e+00> : vector<32xf32>
    %428 = vector.multi_reduction <add>, %427, %cst_152 [1] : vector<32x32xf32> to vector<32xf32>
    %429 = vector.shape_cast %428 : vector<32xf32> to vector<32x1xf32>
    %430 = tpu.reciprocal %429 {approx = true} : vector<32x1xf32> -> vector<32x1xf32>
    %431 = vector.broadcast %430 : vector<32x1xf32> to vector<32x32xf32>
    %432 = arith.mulf %427, %431 : vector<32x32xf32>
    %433 = arith.truncf %432 : vector<32x32xf32> to vector<32x32xbf16>
    %434 = vector.extract_strided_slice %346 {offsets = [0, 96], sizes = [32, 32], strides = [1, 1]} : vector<32x128xf32> to vector<32x32xf32>
    %435 = arith.truncf %434 : vector<32x32xf32> to vector<32x32xbf16>
    %cst_153 = arith.constant dense<0.000000e+00> : vector<32x32xf32>
    %436 = tpu.matmul %433, %435, %cst_153 {dimension_numbers = #tpu.dot_dimension_numbers<[1], [0], [0], [1], [0, 0, 1, 1], [], []>} : vector<32x32xbf16>, vector<32x32xbf16>, vector<32x32xf32> -> vector<32x32xf32>
    %437 = arith.truncf %436 : vector<32x32xf32> to vector<32x32xbf16>
    %c0_154 = arith.constant 0 : index
    %c96_155 = arith.constant 96 : index
    %438 = vector.load %arg40[%c0_154, %c96_155] : memref<32x128xbf16, #tpu.memory_space<vmem>>, vector<32x32xbf16>
    tpu.vector_store %arg40[%c0_154, %c96_155], %437 {strides = array<i32>} : memref<32x128xbf16, #tpu.memory_space<vmem>>, vector<32x32xbf16>,
    %c0_156 = arith.constant 0 : index
    %c0_157 = arith.constant 0 : index
    %439 = vector.load %arg40[%c0_156, %c0_157] : memref<32x128xbf16, #tpu.memory_space<vmem>>, vector<32x128xbf16>
    %c1_158 = arith.constant 1 : index
    %c0_159 = arith.constant 0 : index
    %c0_160 = arith.constant 0 : index
    %440 = vector.load %arg18[%c1_158, %c0_159, %c0_160] : memref<2x128x128xbf16, #tpu.memory_space<vmem>>, vector<1x128x128xbf16>
    %441 = vector.shape_cast %440 : vector<1x128x128xbf16> to vector<128x128xbf16>
    %cst_161 = arith.constant dense<0.000000e+00> : vector<32x128xf32>
    %442 = tpu.matmul %439, %441, %cst_161 {dimension_numbers = #tpu.dot_dimension_numbers<[1], [0], [0], [1], [0, 0, 1, 1], [], []>} : vector<32x128xbf16>, vector<128x128xbf16>, vector<32x128xf32> -> vector<32x128xf32>
    %c1_162 = arith.constant 1 : index
    %c0_163 = arith.constant 0 : index
    %c0_164 = arith.constant 0 : index
    %443 = vector.load %arg19[%c1_162, %c0_163, %c0_164] : memref<2x1x128xf32, #tpu.memory_space<vmem>>, vector<1x1x128xf32>
    %444 = vector.shape_cast %443 : vector<1x1x128xf32> to vector<1x128xf32>
    %445 = vector.broadcast %444 : vector<1x128xf32> to vector<32x128xf32>
    %446 = arith.addf %442, %445 : vector<32x128xf32>
    %447 = arith.addf %333, %446 : vector<32x128xf32>
    %c1_165 = arith.constant 1 : index
    %c0_166 = arith.constant 0 : index
    %c0_167 = arith.constant 0 : index
    %448 = vector.load %arg20[%c1_165, %c0_166, %c0_167] : memref<2x1x128xf32, #tpu.memory_space<vmem>>, vector<1x1x128xf32>
    %449 = vector.shape_cast %448 : vector<1x1x128xf32> to vector<1x128xf32>
    %c1_168 = arith.constant 1 : index
    %c0_169 = arith.constant 0 : index
    %c0_170 = arith.constant 0 : index
    %450 = vector.load %arg21[%c1_168, %c0_169, %c0_170] : memref<2x1x128xf32, #tpu.memory_space<vmem>>, vector<1x1x128xf32>
    %451 = vector.shape_cast %450 : vector<1x1x128xf32> to vector<1x128xf32>
    %cst_171 = arith.constant dense<0.000000e+00> : vector<32xf32>
    %452 = vector.multi_reduction <add>, %447, %cst_171 [1] : vector<32x128xf32> to vector<32xf32>
    %453 = vector.shape_cast %452 : vector<32xf32> to vector<32x1xf32>
    %cst_172 = arith.constant 1.280000e+02 : f32
    %454 = vector.broadcast %cst_172 : f32 to vector<32x1xf32>
    %455 = arith.divf %453, %454 : vector<32x1xf32>
    %456 = vector.broadcast %455 : vector<32x1xf32> to vector<32x128xf32>
    %457 = arith.subf %447, %456 : vector<32x128xf32>
    %458 = arith.mulf %457, %457 : vector<32x128xf32>
    %cst_173 = arith.constant dense<0.000000e+00> : vector<32xf32>
    %459 = vector.multi_reduction <add>, %458, %cst_173 [1] : vector<32x128xf32> to vector<32xf32>
    %460 = vector.shape_cast %459 : vector<32xf32> to vector<32x1xf32>
    %cst_174 = arith.constant 1.280000e+02 : f32
    %461 = vector.broadcast %cst_174 : f32 to vector<32x1xf32>
    %462 = arith.divf %460, %461 : vector<32x1xf32>
    %cst_175 = arith.constant 9.99999996E-13 : f32
    %463 = vector.broadcast %cst_175 : f32 to vector<32x1xf32>
    %464 = arith.addf %462, %463 : vector<32x1xf32>
    %465 = math.rsqrt %464 : vector<32x1xf32>
    %466 = vector.broadcast %455 : vector<32x1xf32> to vector<32x128xf32>
    %467 = arith.subf %447, %466 : vector<32x128xf32>
    %468 = vector.broadcast %465 : vector<32x1xf32> to vector<32x128xf32>
    %469 = arith.mulf %467, %468 : vector<32x128xf32>
    %470 = vector.broadcast %449 : vector<1x128xf32> to vector<32x128xf32>
    %471 = arith.mulf %469, %470 : vector<32x128xf32>
    %472 = vector.broadcast %451 : vector<1x128xf32> to vector<32x128xf32>
    %473 = arith.addf %471, %472 : vector<32x128xf32>
    %474 = arith.truncf %473 : vector<32x128xf32> to vector<32x128xbf16>
    %c1_176 = arith.constant 1 : index
    %c0_177 = arith.constant 0 : index
    %c0_178 = arith.constant 0 : index
    %475 = vector.load %arg22[%c1_176, %c0_177, %c0_178] : memref<2x128x256xbf16, #tpu.memory_space<vmem>>, vector<1x128x256xbf16>
    %476 = vector.shape_cast %475 : vector<1x128x256xbf16> to vector<128x256xbf16>
    %cst_179 = arith.constant dense<0.000000e+00> : vector<32x256xf32>
    %477 = tpu.matmul %474, %476, %cst_179 {dimension_numbers = #tpu.dot_dimension_numbers<[1], [0], [0], [1], [0, 0, 1, 1], [], []>} : vector<32x128xbf16>, vector<128x256xbf16>, vector<32x256xf32> -> vector<32x256xf32>
    %c1_180 = arith.constant 1 : index
    %c0_181 = arith.constant 0 : index
    %c0_182 = arith.constant 0 : index
    %478 = vector.load %arg23[%c1_180, %c0_181, %c0_182] : memref<2x1x256xf32, #tpu.memory_space<vmem>>, vector<1x1x256xf32>
    %479 = vector.shape_cast %478 : vector<1x1x256xf32> to vector<1x256xf32>
    %480 = vector.broadcast %479 : vector<1x256xf32> to vector<32x256xf32>
    %481 = arith.addf %477, %480 : vector<32x256xf32>
    %482 = arith.mulf %481, %481 : vector<32x256xf32>
    %483 = arith.mulf %481, %482 : vector<32x256xf32>
    %cst_183 = arith.constant 4.471500e-02 : f32
    %484 = vector.broadcast %cst_183 : f32 to vector<32x256xf32>
    %485 = arith.mulf %484, %483 : vector<32x256xf32>
    %486 = arith.addf %481, %485 : vector<32x256xf32>
    %cst_184 = arith.constant 0.797884583 : f32
    %487 = vector.broadcast %cst_184 : f32 to vector<32x256xf32>
    %488 = arith.mulf %487, %486 : vector<32x256xf32>
    %489 = math.tanh %488 : vector<32x256xf32>
    %cst_185 = arith.constant 1.000000e+00 : f32
    %490 = vector.broadcast %cst_185 : f32 to vector<32x256xf32>
    %491 = arith.addf %490, %489 : vector<32x256xf32>
    %cst_186 = arith.constant 5.000000e-01 : f32
    %492 = vector.broadcast %cst_186 : f32 to vector<32x256xf32>
    %493 = arith.mulf %492, %491 : vector<32x256xf32>
    %494 = arith.mulf %481, %493 : vector<32x256xf32>
    %495 = arith.truncf %494 : vector<32x256xf32> to vector<32x256xbf16>
    %c1_187 = arith.constant 1 : index
    %c0_188 = arith.constant 0 : index
    %c0_189 = arith.constant 0 : index
    %496 = vector.load %arg24[%c1_187, %c0_188, %c0_189] : memref<2x256x128xbf16, #tpu.memory_space<vmem>>, vector<1x256x128xbf16>
    %497 = vector.shape_cast %496 : vector<1x256x128xbf16> to vector<256x128xbf16>
    %cst_190 = arith.constant dense<0.000000e+00> : vector<32x128xf32>
    %498 = tpu.matmul %495, %497, %cst_190 {dimension_numbers = #tpu.dot_dimension_numbers<[1], [0], [0], [1], [0, 0, 1, 1], [], []>} : vector<32x256xbf16>, vector<256x128xbf16>, vector<32x128xf32> -> vector<32x128xf32>
    %c1_191 = arith.constant 1 : index
    %c0_192 = arith.constant 0 : index
    %c0_193 = arith.constant 0 : index
    %499 = vector.load %arg25[%c1_191, %c0_192, %c0_193] : memref<2x1x128xf32, #tpu.memory_space<vmem>>, vector<1x1x128xf32>
    %500 = vector.shape_cast %499 : vector<1x1x128xf32> to vector<1x128xf32>
    %501 = vector.broadcast %500 : vector<1x128xf32> to vector<32x128xf32>
    %502 = arith.addf %498, %501 : vector<32x128xf32>
    %503 = arith.addf %473, %502 : vector<32x128xf32>
    %c1_194 = arith.constant 1 : index
    %c0_195 = arith.constant 0 : index
    %c0_196 = arith.constant 0 : index
    %504 = vector.load %arg26[%c1_194, %c0_195, %c0_196] : memref<2x1x128xf32, #tpu.memory_space<vmem>>, vector<1x1x128xf32>
    %505 = vector.shape_cast %504 : vector<1x1x128xf32> to vector<1x128xf32>
    %c1_197 = arith.constant 1 : index
    %c0_198 = arith.constant 0 : index
    %c0_199 = arith.constant 0 : index
    %506 = vector.load %arg27[%c1_197, %c0_198, %c0_199] : memref<2x1x128xf32, #tpu.memory_space<vmem>>, vector<1x1x128xf32>
    %507 = vector.shape_cast %506 : vector<1x1x128xf32> to vector<1x128xf32>
    %cst_200 = arith.constant dense<0.000000e+00> : vector<32xf32>
    %508 = vector.multi_reduction <add>, %503, %cst_200 [1] : vector<32x128xf32> to vector<32xf32>
    %509 = vector.shape_cast %508 : vector<32xf32> to vector<32x1xf32>
    %cst_201 = arith.constant 1.280000e+02 : f32
    %510 = vector.broadcast %cst_201 : f32 to vector<32x1xf32>
    %511 = arith.divf %509, %510 : vector<32x1xf32>
    %512 = vector.broadcast %511 : vector<32x1xf32> to vector<32x128xf32>
    %513 = arith.subf %503, %512 : vector<32x128xf32>
    %514 = arith.mulf %513, %513 : vector<32x128xf32>
    %cst_202 = arith.constant dense<0.000000e+00> : vector<32xf32>
    %515 = vector.multi_reduction <add>, %514, %cst_202 [1] : vector<32x128xf32> to vector<32xf32>
    %516 = vector.shape_cast %515 : vector<32xf32> to vector<32x1xf32>
    %cst_203 = arith.constant 1.280000e+02 : f32
    %517 = vector.broadcast %cst_203 : f32 to vector<32x1xf32>
    %518 = arith.divf %516, %517 : vector<32x1xf32>
    %cst_204 = arith.constant 9.99999996E-13 : f32
    %519 = vector.broadcast %cst_204 : f32 to vector<32x1xf32>
    %520 = arith.addf %518, %519 : vector<32x1xf32>
    %521 = math.rsqrt %520 : vector<32x1xf32>
    %522 = vector.broadcast %511 : vector<32x1xf32> to vector<32x128xf32>
    %523 = arith.subf %503, %522 : vector<32x128xf32>
    %524 = vector.broadcast %521 : vector<32x1xf32> to vector<32x128xf32>
    %525 = arith.mulf %523, %524 : vector<32x128xf32>
    %526 = vector.broadcast %505 : vector<1x128xf32> to vector<32x128xf32>
    %527 = arith.mulf %525, %526 : vector<32x128xf32>
    %528 = vector.broadcast %507 : vector<1x128xf32> to vector<32x128xf32>
    %529 = arith.addf %527, %528 : vector<32x128xf32>
    %530 = vector.extract_strided_slice %529 {offsets = [0, 0], sizes = [1, 128], strides = [1, 1]} : vector<32x128xf32> to vector<1x128xf32>
    %531 = arith.truncf %530 : vector<1x128xf32> to vector<1x128xbf16>
    %c0_205 = arith.constant 0 : index
    %c0_206 = arith.constant 0 : index
    %532 = vector.load %arg28[%c0_205, %c0_206] : memref<128x128xbf16, #tpu.memory_space<vmem>>, vector<128x128xbf16>
    %cst_207 = arith.constant dense<0.000000e+00> : vector<1x128xf32>
    %533 = tpu.matmul %531, %532, %cst_207 {dimension_numbers = #tpu.dot_dimension_numbers<[1], [0], [0], [1], [0, 0, 1, 1], [], []>} : vector<1x128xbf16>, vector<128x128xbf16>, vector<1x128xf32> -> vector<1x128xf32>
    %c0_208 = arith.constant 0 : index
    %c0_209 = arith.constant 0 : index
    %534 = vector.load %arg29[%c0_208, %c0_209] : memref<1x128xf32, #tpu.memory_space<vmem>>, vector<1x128xf32>
    %535 = arith.addf %533, %534 : vector<1x128xf32>
    %536 = math.tanh %535 : vector<1x128xf32>
    %537 = arith.truncf %536 : vector<1x128xf32> to vector<1x128xbf16>
    %c0_210 = arith.constant 0 : index
    %c0_211 = arith.constant 0 : index
    %538 = vector.load %arg30[%c0_210, %c0_211] : memref<128x2xbf16, #tpu.memory_space<vmem>>, vector<128x2xbf16>
    %cst_212 = arith.constant dense<0.000000e+00> : vector<1x2xf32>
    %539 = tpu.matmul %537, %538, %cst_212 {dimension_numbers = #tpu.dot_dimension_numbers<[1], [0], [0], [1], [0, 0, 1, 1], [], []>} : vector<1x128xbf16>, vector<128x2xbf16>, vector<1x2xf32> -> vector<1x2xf32>
    %c0_213 = arith.constant 0 : index
    %c0_214 = arith.constant 0 : index
    %540 = vector.load %arg31[%c0_213, %c0_214] : memref<1x2xf32, #tpu.memory_space<vmem>>, vector<1x2xf32>
    %541 = arith.addf %539, %540 : vector<1x2xf32>
    %c0_215 = arith.constant 0 : index
    %c0_216 = arith.constant 0 : index
    %c0_217 = arith.constant 0 : index
    %542 = vector.load %arg38[%c0_215, %c0_216, %c0_217] : memref<1x1x2xf32, #tpu.memory_space<vmem>>, vector<1x1x2xf32>
    %543 = vector.shape_cast %542 : vector<1x1x2xf32> to vector<1x2xf32>
    %544 = vector.shape_cast %541 : vector<1x2xf32> to vector<1x1x2xf32>
    tpu.vector_store %arg38[%c0_215, %c0_216, %c0_217], %544 {strides = array<i32>} : memref<1x1x2xf32, #tpu.memory_space<vmem>>, vector<1x1x2xf32>,
    %545 = vector.extract_strided_slice %529 {offsets = [0, 0], sizes = [16, 128], strides = [1, 1]} : vector<32x128xf32> to vector<16x128xf32>
    %546 = arith.truncf %545 : vector<16x128xf32> to vector<16x128xbf16>
    %c0_218 = arith.constant 0 : index
    %c0_219 = arith.constant 0 : index
    %547 = vector.load %arg32[%c0_218, %c0_219] : memref<128x128xbf16, #tpu.memory_space<vmem>>, vector<128x128xbf16>
    %cst_220 = arith.constant dense<0.000000e+00> : vector<16x128xf32>
    %548 = tpu.matmul %546, %547, %cst_220 {dimension_numbers = #tpu.dot_dimension_numbers<[1], [0], [0], [1], [0, 0, 1, 1], [], []>} : vector<16x128xbf16>, vector<128x128xbf16>, vector<16x128xf32> -> vector<16x128xf32>
    %c0_221 = arith.constant 0 : index
    %c0_222 = arith.constant 0 : index
    %549 = vector.load %arg33[%c0_221, %c0_222] : memref<1x128xf32, #tpu.memory_space<vmem>>, vector<1x128xf32>
    %550 = vector.broadcast %549 : vector<1x128xf32> to vector<16x128xf32>
    %551 = arith.addf %548, %550 : vector<16x128xf32>
    %552 = arith.mulf %551, %551 : vector<16x128xf32>
    %553 = arith.mulf %551, %552 : vector<16x128xf32>
    %cst_223 = arith.constant 4.471500e-02 : f32
    %554 = vector.broadcast %cst_223 : f32 to vector<16x128xf32>
    %555 = arith.mulf %554, %553 : vector<16x128xf32>
    %556 = arith.addf %551, %555 : vector<16x128xf32>
    %cst_224 = arith.constant 0.797884583 : f32
    %557 = vector.broadcast %cst_224 : f32 to vector<16x128xf32>
    %558 = arith.mulf %557, %556 : vector<16x128xf32>
    %559 = math.tanh %558 : vector<16x128xf32>
    %cst_225 = arith.constant 1.000000e+00 : f32
    %560 = vector.broadcast %cst_225 : f32 to vector<16x128xf32>
    %561 = arith.addf %560, %559 : vector<16x128xf32>
    %cst_226 = arith.constant 5.000000e-01 : f32
    %562 = vector.broadcast %cst_226 : f32 to vector<16x128xf32>
    %563 = arith.mulf %562, %561 : vector<16x128xf32>
    %564 = arith.mulf %551, %563 : vector<16x128xf32>
    %c0_227 = arith.constant 0 : index
    %c0_228 = arith.constant 0 : index
    %565 = vector.load %arg34[%c0_227, %c0_228] : memref<1x128xf32, #tpu.memory_space<vmem>>, vector<1x128xf32>
    %c0_229 = arith.constant 0 : index
    %c0_230 = arith.constant 0 : index
    %566 = vector.load %arg35[%c0_229, %c0_230] : memref<1x128xf32, #tpu.memory_space<vmem>>, vector<1x128xf32>
    %cst_231 = arith.constant dense<0.000000e+00> : vector<16xf32>
    %567 = vector.multi_reduction <add>, %564, %cst_231 [1] : vector<16x128xf32> to vector<16xf32>
    %568 = vector.shape_cast %567 : vector<16xf32> to vector<16x1xf32>
    %cst_232 = arith.constant 1.280000e+02 : f32
    %569 = vector.broadcast %cst_232 : f32 to vector<16x1xf32>
    %570 = arith.divf %568, %569 : vector<16x1xf32>
    %571 = vector.broadcast %570 : vector<16x1xf32> to vector<16x128xf32>
    %572 = arith.subf %564, %571 : vector<16x128xf32>
    %573 = arith.mulf %572, %572 : vector<16x128xf32>
    %cst_233 = arith.constant dense<0.000000e+00> : vector<16xf32>
    %574 = vector.multi_reduction <add>, %573, %cst_233 [1] : vector<16x128xf32> to vector<16xf32>
    %575 = vector.shape_cast %574 : vector<16xf32> to vector<16x1xf32>
    %cst_234 = arith.constant 1.280000e+02 : f32
    %576 = vector.broadcast %cst_234 : f32 to vector<16x1xf32>
    %577 = arith.divf %575, %576 : vector<16x1xf32>
    %cst_235 = arith.constant 9.99999996E-13 : f32
    %578 = vector.broadcast %cst_235 : f32 to vector<16x1xf32>
    %579 = arith.addf %577, %578 : vector<16x1xf32>
    %580 = math.rsqrt %579 : vector<16x1xf32>
    %581 = vector.broadcast %570 : vector<16x1xf32> to vector<16x128xf32>
    %582 = arith.subf %564, %581 : vector<16x128xf32>
    %583 = vector.broadcast %580 : vector<16x1xf32> to vector<16x128xf32>
    %584 = arith.mulf %582, %583 : vector<16x128xf32>
    %585 = vector.broadcast %565 : vector<1x128xf32> to vector<16x128xf32>
    %586 = arith.mulf %584, %585 : vector<16x128xf32>
    %587 = vector.broadcast %566 : vector<1x128xf32> to vector<16x128xf32>
    %588 = arith.addf %586, %587 : vector<16x128xf32>
    %589 = arith.truncf %588 : vector<16x128xf32> to vector<16x128xbf16>
    %c0_236 = arith.constant 0 : index
    %c0_237 = arith.constant 0 : index
    %590 = vector.load %arg36[%c0_236, %c0_237] : memref<128x128xbf16, #tpu.memory_space<vmem>>, vector<128x128xbf16>
    %cst_238 = arith.constant dense<0.000000e+00> : vector<16x128xf32>
    %591 = tpu.matmul %589, %590, %cst_238 {dimension_numbers = #tpu.dot_dimension_numbers<[1], [0], [0], [1], [0, 0, 1, 1], [], []>} : vector<16x128xbf16>, vector<128x128xbf16>, vector<16x128xf32> -> vector<16x128xf32>
    %c0_239 = arith.constant 0 : index
    %c0_240 = arith.constant 0 : index
    %592 = vector.load %arg37[%c0_239, %c0_240] : memref<1x128xf32, #tpu.memory_space<vmem>>, vector<1x128xf32>
    %593 = vector.broadcast %592 : vector<1x128xf32> to vector<16x128xf32>
    %594 = arith.addf %591, %593 : vector<16x128xf32>
    %c0_241 = arith.constant 0 : index
    %c0_242 = arith.constant 0 : index
    %c0_243 = arith.constant 0 : index
    %595 = vector.load %arg39[%c0_241, %c0_242, %c0_243] : memref<1x16x128xf32, #tpu.memory_space<vmem>>, vector<1x16x128xf32>
    %596 = vector.shape_cast %595 : vector<1x16x128xf32> to vector<16x128xf32>
    %597 = vector.shape_cast %594 : vector<16x128xf32> to vector<1x16x128xf32>
    tpu.vector_store %arg39[%c0_241, %c0_242, %c0_243], %597 {strides = array<i32>} : memref<1x16x128xf32, #tpu.memory_space<vmem>>, vector<1x16x128xf32>,
    return
  }
  func.func @transform_0(%arg0: i32) -> (i32, i32, i32) {
    %c0_i32 = arith.constant 0 : i32
    %c0_i32_0 = arith.constant 0 : i32
    %c0_i32_1 = arith.constant 0 : i32
    return %arg0, %c0_i32, %c0_i32_0 : i32, i32, i32
  }
  func.func @transform_1(%arg0: i32) -> (i32, i32, i32) {
    %c0_i32 = arith.constant 0 : i32
    %c0_i32_0 = arith.constant 0 : i32
    %c0_i32_1 = arith.constant 0 : i32
    return %arg0, %c0_i32, %c0_i32_0 : i32, i32, i32
  }
  func.func @transform_2(%arg0: i32) -> (i32, i32, i32) {
    %c0_i32 = arith.constant 0 : i32
    %c0_i32_0 = arith.constant 0 : i32
    %c0_i32_1 = arith.constant 0 : i32
    return %arg0, %c0_i32, %c0_i32_0 : i32, i32, i32
  }
  func.func @transform_3(%arg0: i32) -> (i32, i32, i32) {
    %c0_i32 = arith.constant 0 : i32
    %c0_i32_0 = arith.constant 0 : i32
    %c0_i32_1 = arith.constant 0 : i32
    return %arg0, %c0_i32, %c0_i32_0 : i32, i32, i32
  }
  func.func @transform_4(%arg0: i32) -> (i32, i32, i32) {
    %c0_i32 = arith.constant 0 : i32
    %c0_i32_0 = arith.constant 0 : i32
    %c0_i32_1 = arith.constant 0 : i32
    return %arg0, %c0_i32, %c0_i32_0 : i32, i32, i32
  }
  func.func @transform_5(%arg0: i32) -> (i32, i32) {
    %c0_i32 = arith.constant 0 : i32
    %c0_i32_0 = arith.constant 0 : i32
    %c0_i32_1 = arith.constant 0 : i32
    return %c0_i32, %c0_i32_0 : i32, i32
  }
  func.func @transform_6(%arg0: i32) -> (i32, i32) {
    %c0_i32 = arith.constant 0 : i32
    %c0_i32_0 = arith.constant 0 : i32
    %c0_i32_1 = arith.constant 0 : i32
    return %c0_i32, %c0_i32_0 : i32, i32
  }
  func.func @transform_7(%arg0: i32) -> (i32, i32) {
    %c0_i32 = arith.constant 0 : i32
    %c0_i32_0 = arith.constant 0 : i32
    %c0_i32_1 = arith.constant 0 : i32
    return %c0_i32, %c0_i32_0 : i32, i32
  }
  func.func @transform_8(%arg0: i32) -> (i32, i32) {
    %c0_i32 = arith.constant 0 : i32
    %c0_i32_0 = arith.constant 0 : i32
    %c0_i32_1 = arith.constant 0 : i32
    return %c0_i32, %c0_i32_0 : i32, i32
  }
  func.func @transform_9(%arg0: i32) -> (i32, i32) {
    %c0_i32 = arith.constant 0 : i32
    %c0_i32_0 = arith.constant 0 : i32
    %c0_i32_1 = arith.constant 0 : i32
    return %c0_i32, %c0_i32_0 : i32, i32
  }
  func.func @transform_10(%arg0: i32) -> (i32, i32) {
    %c0_i32 = arith.constant 0 : i32
    %c0_i32_0 = arith.constant 0 : i32
    %c0_i32_1 = arith.constant 0 : i32
    return %c0_i32, %c0_i32_0 : i32, i32
  }
  func.func @transform_11(%arg0: i32) -> (i32, i32) {
    %c0_i32 = arith.constant 0 : i32
    %c0_i32_0 = arith.constant 0 : i32
    %c0_i32_1 = arith.constant 0 : i32
    return %c0_i32, %c0_i32_0 : i32, i32
  }
  func.func @transform_12(%arg0: i32) -> (i32, i32) {
    %c0_i32 = arith.constant 0 : i32
    %c0_i32_0 = arith.constant 0 : i32
    %c0_i32_1 = arith.constant 0 : i32
    return %c0_i32, %c0_i32_0 : i32, i32
  }
  func.func @transform_13(%arg0: i32) -> (i32, i32) {
    %c0_i32 = arith.constant 0 : i32
    %c0_i32_0 = arith.constant 0 : i32
    %c0_i32_1 = arith.constant 0 : i32
    return %c0_i32, %c0_i32_0 : i32, i32
  }
  func.func @transform_14(%arg0: i32) -> (i32, i32) {
    %c0_i32 = arith.constant 0 : i32
    %c0_i32_0 = arith.constant 0 : i32
    %c0_i32_1 = arith.constant 0 : i32
    return %c0_i32, %c0_i32_0 : i32, i32
  }
  func.func @transform_15(%arg0: i32) -> (i32, i32, i32) {
    %c0_i32 = arith.constant 0 : i32
    %c0_i32_0 = arith.constant 0 : i32
    %c0_i32_1 = arith.constant 0 : i32
    %c0_i32_2 = arith.constant 0 : i32
    return %c0_i32, %c0_i32_0, %c0_i32_1 : i32, i32, i32
  }
  func.func @transform_16(%arg0: i32) -> (i32, i32, i32) {
    %c0_i32 = arith.constant 0 : i32
    %c0_i32_0 = arith.constant 0 : i32
    %c0_i32_1 = arith.constant 0 : i32
    %c0_i32_2 = arith.constant 0 : i32
    return %c0_i32, %c0_i32_0, %c0_i32_1 : i32, i32, i32
  }
  func.func @transform_17(%arg0: i32) -> (i32, i32, i32) {
    %c0_i32 = arith.constant 0 : i32
    %c0_i32_0 = arith.constant 0 : i32
    %c0_i32_1 = arith.constant 0 : i32
    %c0_i32_2 = arith.constant 0 : i32
    return %c0_i32, %c0_i32_0, %c0_i32_1 : i32, i32, i32
  }
  func.func @transform_18(%arg0: i32) -> (i32, i32, i32) {
    %c0_i32 = arith.constant 0 : i32
    %c0_i32_0 = arith.constant 0 : i32
    %c0_i32_1 = arith.constant 0 : i32
    %c0_i32_2 = arith.constant 0 : i32
    return %c0_i32, %c0_i32_0, %c0_i32_1 : i32, i32, i32
  }
  func.func @transform_19(%arg0: i32) -> (i32, i32, i32) {
    %c0_i32 = arith.constant 0 : i32
    %c0_i32_0 = arith.constant 0 : i32
    %c0_i32_1 = arith.constant 0 : i32
    %c0_i32_2 = arith.constant 0 : i32
    return %c0_i32, %c0_i32_0, %c0_i32_1 : i32, i32, i32
  }
  func.func @transform_20(%arg0: i32) -> (i32, i32, i32) {
    %c0_i32 = arith.constant 0 : i32
    %c0_i32_0 = arith.constant 0 : i32
    %c0_i32_1 = arith.constant 0 : i32
    %c0_i32_2 = arith.constant 0 : i32
    return %c0_i32, %c0_i32_0, %c0_i32_1 : i32, i32, i32
  }
  func.func @transform_21(%arg0: i32) -> (i32, i32, i32) {
    %c0_i32 = arith.constant 0 : i32
    %c0_i32_0 = arith.constant 0 : i32
    %c0_i32_1 = arith.constant 0 : i32
    %c0_i32_2 = arith.constant 0 : i32
    return %c0_i32, %c0_i32_0, %c0_i32_1 : i32, i32, i32
  }
  func.func @transform_22(%arg0: i32) -> (i32, i32, i32) {
    %c0_i32 = arith.constant 0 : i32
    %c0_i32_0 = arith.constant 0 : i32
    %c0_i32_1 = arith.constant 0 : i32
    %c0_i32_2 = arith.constant 0 : i32
    return %c0_i32, %c0_i32_0, %c0_i32_1 : i32, i32, i32
  }
  func.func @transform_23(%arg0: i32) -> (i32, i32, i32) {
    %c0_i32 = arith.constant 0 : i32
    %c0_i32_0 = arith.constant 0 : i32
    %c0_i32_1 = arith.constant 0 : i32
    %c0_i32_2 = arith.constant 0 : i32
    return %c0_i32, %c0_i32_0, %c0_i32_1 : i32, i32, i32
  }
  func.func @transform_24(%arg0: i32) -> (i32, i32, i32) {
    %c0_i32 = arith.constant 0 : i32
    %c0_i32_0 = arith.constant 0 : i32
    %c0_i32_1 = arith.constant 0 : i32
    %c0_i32_2 = arith.constant 0 : i32
    return %c0_i32, %c0_i32_0, %c0_i32_1 : i32, i32, i32
  }
  func.func @transform_25(%arg0: i32) -> (i32, i32, i32) {
    %c0_i32 = arith.constant 0 : i32
    %c0_i32_0 = arith.constant 0 : i32
    %c0_i32_1 = arith.constant 0 : i32
    %c0_i32_2 = arith.constant 0 : i32
    return %c0_i32, %c0_i32_0, %c0_i32_1 : i32, i32, i32
  }
  func.func @transform_26(%arg0: i32) -> (i32, i32, i32) {
    %c0_i32 = arith.constant 0 : i32
    %c0_i32_0 = arith.constant 0 : i32
    %c0_i32_1 = arith.constant 0 : i32
    %c0_i32_2 = arith.constant 0 : i32
    return %c0_i32, %c0_i32_0, %c0_i32_1 : i32, i32, i32
  }
  func.func @transform_27(%arg0: i32) -> (i32, i32) {
    %c0_i32 = arith.constant 0 : i32
    %c0_i32_0 = arith.constant 0 : i32
    %c0_i32_1 = arith.constant 0 : i32
    return %c0_i32, %c0_i32_0 : i32, i32
  }
  func.func @transform_28(%arg0: i32) -> (i32, i32) {
    %c0_i32 = arith.constant 0 : i32
    %c0_i32_0 = arith.constant 0 : i32
    %c0_i32_1 = arith.constant 0 : i32
    return %c0_i32, %c0_i32_0 : i32, i32
  }
  func.func @transform_29(%arg0: i32) -> (i32, i32) {
    %c0_i32 = arith.constant 0 : i32
    %c0_i32_0 = arith.constant 0 : i32
    %c0_i32_1 = arith.constant 0 : i32
    return %c0_i32, %c0_i32_0 : i32, i32
  }
  func.func @transform_30(%arg0: i32) -> (i32, i32) {
    %c0_i32 = arith.constant 0 : i32
    %c0_i32_0 = arith.constant 0 : i32
    %c0_i32_1 = arith.constant 0 : i32
    return %c0_i32, %c0_i32_0 : i32, i32
  }
  func.func @transform_31(%arg0: i32) -> (i32, i32) {
    %c0_i32 = arith.constant 0 : i32
    %c0_i32_0 = arith.constant 0 : i32
    %c0_i32_1 = arith.constant 0 : i32
    return %c0_i32, %c0_i32_0 : i32, i32
  }
  func.func @transform_32(%arg0: i32) -> (i32, i32) {
    %c0_i32 = arith.constant 0 : i32
    %c0_i32_0 = arith.constant 0 : i32
    %c0_i32_1 = arith.constant 0 : i32
    return %c0_i32, %c0_i32_0 : i32, i32
  }
  func.func @transform_33(%arg0: i32) -> (i32, i32) {
    %c0_i32 = arith.constant 0 : i32
    %c0_i32_0 = arith.constant 0 : i32
    %c0_i32_1 = arith.constant 0 : i32
    return %c0_i32, %c0_i32_0 : i32, i32
  }
  func.func @transform_34(%arg0: i32) -> (i32, i32) {
    %c0_i32 = arith.constant 0 : i32
    %c0_i32_0 = arith.constant 0 : i32
    %c0_i32_1 = arith.constant 0 : i32
    return %c0_i32, %c0_i32_0 : i32, i32
  }
  func.func @transform_35(%arg0: i32) -> (i32, i32) {
    %c0_i32 = arith.constant 0 : i32
    %c0_i32_0 = arith.constant 0 : i32
    %c0_i32_1 = arith.constant 0 : i32
    return %c0_i32, %c0_i32_0 : i32, i32
  }
  func.func @transform_36(%arg0: i32) -> (i32, i32) {
    %c0_i32 = arith.constant 0 : i32
    %c0_i32_0 = arith.constant 0 : i32
    %c0_i32_1 = arith.constant 0 : i32
    return %c0_i32, %c0_i32_0 : i32, i32
  }
  func.func @transform_37(%arg0: i32) -> (i32, i32, i32) {
    %c0_i32 = arith.constant 0 : i32
    %c0_i32_0 = arith.constant 0 : i32
    %c0_i32_1 = arith.constant 0 : i32
    return %arg0, %c0_i32, %c0_i32_0 : i32, i32, i32
  }
  func.func @transform_38(%arg0: i32) -> (i32, i32, i32) {
    %c0_i32 = arith.constant 0 : i32
    %c0_i32_0 = arith.constant 0 : i32
    %c0_i32_1 = arith.constant 0 : i32
    return %arg0, %c0_i32, %c0_i32_0 : i32, i32, i32
  }
}

</mosaic_0001>

<bundles_post_ra>
// kernel: visual_dialog_encoder_forward.1
= control target key start
LH: loop header
LB: loop body
LE: loop exit
PB: predicated region body
PF: predicated region fallthrough
CT: control target
= control target key end

     0   :  { %s8756_s6 = smov 1   ;;  %s8757_s10 = smov 2   ;;  %s10353_s0 = inlined_call_operand.smem [shape: u32[39], index: -1, kind: input, shape index: {}] }
   0x1   :  { %s8849_s5 = sld [smem:[%s10353_s0]]   ;;  %s8758_s14 = smov 3  }
   0x2   :  { %s8854_s9 = sld [smem:[%s10353_s0 + %s8756_s6]]   ;;  %s8759_s18 = smov 4  }
   0x3   :  { %s8859_s13 = sld [smem:[%s10353_s0 + %s8757_s10]]   ;;  %s8760_s22 = smov 5  }
   0x4   :  { %s8864_s17 = sld [smem:[%s10353_s0 + %s8758_s14]]   ;;  %s8761_s26 = smov 6  }
   0x5   :  { %s8869_s21 = sld [smem:[%s10353_s0 + %s8759_s18]]   ;;  %s8762_s30 = smov 7  }
   0x6   :  { %s8874_s25 = sld [smem:[%s10353_s0 + %s8760_s22]]   ;;  %s8763_s4 = smov 8  }
   0x7   :  { %10402 = sst [smem:[#allocation60_spill]] %s8849_s5  ;;  %s8764_s10 = smov 9  }
   0x8   :  { %10403 = sst [smem:[#allocation61_spill]] %s8854_s9  ;;  %s8765_s15 = smov 10  }
   0x9   :  { %10404 = sst [smem:[#allocation62_spill]] %s8859_s13  ;;  %s8766_s20 = smov 11  }
   0xa   :  { %10405 = sst [smem:[#allocation63_spill]] %s8864_s17  ;;  %s8768_s1 = smov 13  }
   0xb   :  { %10406 = sst [smem:[#allocation64_spill]] %s8869_s21  ;;  %s8769_s7 = smov 14  }
   0xc   :  { %s8879_s29 = sld [smem:[%s10353_s0 + %s8761_s26]]   ;;  %s8767_s26 = smov 12  }
   0xd   :  { %s8884_s3 = sld [smem:[%s10353_s0 + %s8762_s30]]   ;;  %s8771_s22 = smov 16  }
   0xe   :  { %s8889_s8 = sld [smem:[%s10353_s0 + %s8763_s4]]   ;;  %s8772_s28 = smov 17  }
   0xf   :  { %s8894_s14 = sld [smem:[%s10353_s0 + %s8764_s10]]  }
  0x10   :  { %s8899_s19 = sld [smem:[%s10353_s0 + %s8765_s15]]   ;;  %s8770_s15 = smov 15  }
  0x11   :  { %s8904_s24 = sld [smem:[%s10353_s0 + %s8766_s20]]  }
  0x12   :  { %10407 = sst [smem:[#allocation65_spill]] %s8879_s29 }
  0x13   :  { %10408 = sst [smem:[#allocation66_spill]] %s8884_s3 }
  0x14   :  { %10409 = sst [smem:[#allocation67_spill]] %s8889_s8 }
  0x15   :  { %10410 = sst [smem:[#allocation68_spill]] %s8894_s14 }
  0x16   :  { %10411 = sst [smem:[#allocation69_spill]] %s8899_s19 }
  0x17   :  { %10412 = sst [smem:[#allocation70_spill]] %s8904_s24 }
  0x18   :  { %s8909_s30 = sld [smem:[%s10353_s0 + %s8767_s26]]  }
  0x19   :  { %s8914_s6 = sld [smem:[%s10353_s0 + %s8768_s1]]  }
  0x1a   :  { %s8919_s12 = sld [smem:[%s10353_s0 + %s8769_s7]]   ;;  %s8773_s7 = smov 18  }
  0x1b   :  { %s8924_s20 = sld [smem:[%s10353_s0 + %s8770_s15]]   ;;  %s8774_s15 = smov 19  }
  0x1c   :  { %s8929_s27 = sld [smem:[%s10353_s0 + %s8771_s22]]   ;;  %s8775_s22 = smov 20  }
  0x1d   :  { %s8934_s4 = sld [smem:[%s10353_s0 + %s8772_s28]]   ;;  %s8776_s28 = smov 21  }
  0x1e   :  { %s8939_s21 = sld [smem:[%s10353_s0 + %s8773_s7]]   ;;  %s8777_s7 = smov 22  }
  0x1f   :  { %10413 = sst [smem:[#allocation71_spill]] %s8914_s6 }
  0x20   :  { %10414 = sst [smem:[#allocation72_spill]] %s8919_s12 }
  0x21   :  { %10415 = sst [smem:[#allocation73_spill]] %s8924_s20 }
  0x22   :  { %10416 = sst [smem:[#allocation74_spill]] %s8929_s27 }
  0x23   :  { %10417 = sst [smem:[#allocation75_spill]] %s8934_s4 }
  0x24   :  { %s8944_s20 = sld [smem:[%s10353_s0 + %s8774_s15]]   ;;  %s8778_s15 = smov 23  }
  0x25   :  { %s8949_s5 = sld [smem:[%s10353_s0 + %s8775_s22]]   ;;  %s8779_s22 = smov 24  }
  0x26   :  { %s8954_s4 = sld [smem:[%s10353_s0 + %s8776_s28]]   ;;  %s8780_s28 = smov 25  }
  0x27   :  { %s8959_s17 = sld [smem:[%s10353_s0 + %s8777_s7]]   ;;  %s8781_s7 = smov 26  }
  0x28   :  { %s8964_s13 = sld [smem:[%s10353_s0 + %s8778_s15]]   ;;  %s8782_s15 = smov 27  }
  0x29   :  { %s8969_s9 = sld [smem:[%s10353_s0 + %s8779_s22]]   ;;  %s8783_s22 = smov 28  }
  0x2a   :  { %10418 = sst [smem:[#allocation76_spill]] %s8944_s20 }
  0x2b   :  { %10419 = sst [smem:[#allocation77_spill]] %s8949_s5 }
  0x2c   :  { %10420 = sst [smem:[#allocation78_spill]] %s8954_s4 }
  0x2d   :  { %10421 = sst [smem:[#allocation79_spill]] %s8959_s17 }
  0x2e   :  { %10422 = sst [smem:[#allocation80_spill]] %s8964_s13 }
  0x2f   :  { %10423 = sst [smem:[#allocation81_spill]] %s8969_s9 }
  0x30   :  { %s8974_s4 = sld [smem:[%s10353_s0 + %s8780_s28]]   ;;  %s8784_s28 = smov 29  }
  0x31   :  { %s8979_s17 = sld [smem:[%s10353_s0 + %s8781_s7]]   ;;  %s8785_s7 = smov 30  }
  0x32   :  { %s8984_s13 = sld [smem:[%s10353_s0 + %s8782_s15]]   ;;  %s8786_s15 = smov 31  }
  0x33   :  { %s8989_s20 = sld [smem:[%s10353_s0 + %s8783_s22]]   ;;  %s8787_s22 = smov 32  }
  0x34   :  { %s8999_s27 = sld [smem:[%s10353_s0 + %s8785_s7]]   ;;  %s8789_s7 = smov 34  }
  0x35   :  { %s9019_s6 = sld [smem:[%s10353_s0 + %s8789_s7]]   ;;  %s8793_s7 = smov 38  }
  0x36   :  { %10424 = sst [smem:[#allocation82_spill]] %s8974_s4 }
  0x37   :  { %10425 = sst [smem:[#allocation83_spill]] %s8979_s17 }
  0x38   :  { %10426 = sst [smem:[#allocation84_spill]] %s8984_s13 }
  0x39   :  { %10427 = sst [smem:[#allocation85_spill]] %s8989_s20 }
  0x3a   :  { %s8994_s4 = sld [smem:[%s10353_s0 + %s8784_s28]]   ;;  %s8788_s28 = smov 33  }
  0x3b   :  { %s9004_s13 = sld [smem:[%s10353_s0 + %s8786_s15]]   ;;  %s8790_s15 = smov 35  }
  0x3c   :  { %s9009_s20 = sld [smem:[%s10353_s0 + %s8787_s22]]   ;;  %s8791_s22 = smov 36  }
  0x3d   :  { %10432 = sst [smem:[#allocation90_spill]] %s9019_s6 }
  0x3e   :  { %s9029_s24 = sld [smem:[%s10353_s0 + %s8791_s22]]  }
  0x3f   :  { %s9039_s14 = sld [smem:[%s10353_s0 + %s8793_s7]]  }
  0x40   :  { %10428 = sst [smem:[#allocation86_spill]] %s8994_s4 }
  0x41   :  { %10429 = sst [smem:[#allocation87_spill]] %s9004_s13 }
  0x42   :  { %10430 = sst [smem:[#allocation88_spill]] %s9009_s20 }
  0x43   :  { %s9014_s4 = sld [smem:[%s10353_s0 + %s8788_s28]]   ;;  %s8792_s28 = smov 37  }
  0x44   :  { %s9024_s13 = sld [smem:[%s10353_s0 + %s8790_s15]]  }
  0x49   :  { %10431 = sst [smem:[#allocation89_spill]] %s9014_s4 }
  0x4a   :  { %s9034_s4 = sld [smem:[%s10353_s0 + %s8792_s28]]  }
  0x50   :  { %10433 = sst [smem:[#allocation91_spill]] %s9034_s4 }
  0x51   :  { %83 = vsyncpa [#allocation4], 0 }
  0x52   :  { %84 = vsyncpa [#allocation7], 0 }
  0x53   :  { %85 = vsyncpa [#allocation10], 0 }
  0x54   :  { %86 = vsyncpa [#allocation13], 0 }
  0x55   :  { %87 = vsyncpa [#allocation16], 0 }
  0x56   :  { %88 = vsyncpa [#allocation19], 0 }
  0x57   :  { %89 = vsyncpa [#allocation22], 0 }
  0x58   :  { %90 = vsyncpa [#allocation25], 0 }
  0x59   :  { %91 = vsyncpa [#allocation28], 0 }
  0x5a   :  { %92 = vsyncpa [#allocation31], 0 }
  0x5b   :  { %93 = vsyncpa [#allocation34], 0 }
  0x5c   :  { %94 = vsyncpa [#allocation37], 0 }
  0x5d   :  { %95 = vsyncpa [#allocation40], 0 }
  0x5e   :  { %96 = vsyncpa [#allocation5], 0 }
  0x5f   :  { %98 = vsyncpa [#allocation5 + $0x1], 0 }
  0x60   :  { %99 = vsyncpa [#allocation44], 0 }
  0x61   :  { %101 = vsyncpa [#allocation44 + $0x1], 0  ;;  %s9041_s15 = smov 0   ;;  %s9043_s0 = smov 0  }
  0x62   :  { %s9045_s16 = smov 0   ;;  %s9047_s18 = smov 0  }
  0x63 LB: > { %s10434_s4 = sld [smem:[#allocation91_spill]]  ;;  %s10435_s20 = sld [smem:[#allocation88_spill]]  ;;  %s8750_s16 = sphi %s9045_s16, %s10515_s16   ;;  %s8746_s0 = sphi %s9043_s0, %s10517_s0   ;;  %s8742_s15 = sphi %s9041_s15, %s10516_s15   ;;  %s8754_s18 = sphi %s9047_s18, %s10513_s18  }
  0x64   : > { %s10436_s19 = sld [smem:[#allocation69_spill]]  ;;  %s10437_s17 = sld [smem:[#allocation83_spill]] }
  0x65   : > { %s10438_s9 = sld [smem:[#allocation81_spill]]  ;;  %s10439_s6 = sld [smem:[#allocation90_spill]] }
  0x66   : > { %s10440_s5 = sld [smem:[#allocation77_spill]]  ;;  %s10441_s3 = sld [smem:[#allocation66_spill]] }
  0x67   : > { %s10442_s12 = sld [smem:[#allocation72_spill]]  ;;  %s10443_s29 = sld [smem:[#allocation65_spill]] }
  0x68   : > { %s10444_s8 = sld [smem:[#allocation67_spill]]  ;;  %10445 = sst [smem:[#allocation92_spill]] %s8742_s15 }
  0x69   : > { %10446 = sst [smem:[#allocation93_spill]] %s8750_s16  ;;  %s9062_s22 = sadd.s32 4294967295, %s8754_s18  }
  0x6a   : > { %s6239_s23 = sadd.s32 4294967294, %s8754_s18   ;;  %s9066_s26 = sadd.s32 1, %s8754_s18  }
  0x6b   : > { %10447 = sst [smem:[#allocation94_spill]] %s9066_s26  ;;  %s916_s28 = sadd.s32 1, %s8750_s16 }
  0x6c   : > { %s913_s1 = ssub.s32 %s8754_s18, %s9066_s26  ;;  %p926_p0 = scmp.ne.s32.totalorder %s8750_s16, %s8746_s0 }
  0x6d   : > { %p914_p1 = scmp.eq.s32.totalorder %s913_s1, 0  ;;  %p927_p2 = scmp.eq.s32.totalorder %s9062_s22, 1 }
  0x6e   : > { %p932_p3 = scmp.ne.s32.totalorder %s8746_s0, %s8742_s15  ;;  %p933_p4 = scmp.eq.s32.totalorder %s6239_s23, 1 }
  0x6f   : > { %s9077_s2 = scalar_select %p914_p1, %s8750_s16, %s916_s28  }
  0x70   : > { %p9079_p5 = por %p927_p2, %p926_p0  ;;  %p9083_p6 = por %p933_p4, %p932_p3 }
  0x71   : > { %10448 = sst [smem:[#allocation95_spill]] %s9077_s2  ;;  %p6240_p7 = scmp.ge.s32.totalorder %s8754_s18, 1 }
  0x72   : > { %s10449_s7 = scalar_select %p9079_p5, 1, 0 }
  0x73   : > { %s10450_s10 = scalar_select %p9083_p6, 1, 0 }
  0x74   : > { %p966_p8 = scmp.lt.s32.totalorder %s8754_s18, 3  ;;  %p10375_p9 = scmp.eq.s32.totalorder %s9062_s22, 0 }
  0x75   : > { %10451 = sst [smem:[#allocation96_spill]] %s10450_s10  ;;  %s8794_s23 = smov [#allocation6]  }
  0x76   : > { %p9090_p10 = pnand %p6240_p7, %p966_p8  ;;  %s990_s28 = sshll.u32 %s8794_s23, 4  ;;  %s991_s28 = int_to_ptr.vmem [resolvable:$true] %s990_s28 }
  0x77   : > { %s8795_s1 = smov [#allocation9]   ;;  %s8796_s26 = smov [#allocation12]  }
  0x78   : > { %s10452_s11 = scalar_select %p9090_p10, 1, 0 }
  0x79   : > { %p7246_p11 = pneg %p9090_p10  ;;  %s1012_s2 = sshll.u32 %s8795_s1, 4  ;;  %s9102_s2 = int_to_ptr.vmem [resolvable:$true] %s1012_s2 }
  0x7a   : > { %s1036_s10 = sshll.u32 %s8796_s26, 4  ;;  %s7908_s15 = scalar_lea.hbm %s10443_s29, 16  ;;  %s9104_s10 = int_to_ptr.vmem [resolvable:$true] %s1036_s10 }
  0x7b   : > { %p9098_p12 = pnand %p10375_p9, %p7246_p11  ;;  %p7909_p13 = scmp.ne.s32.totalorder %s10443_s29, %s7908_s15 }
  0x7c   : > { %p7915_p3 = scmp.lt.u32.totalorder %s7908_s15, %s10443_s29 }
  0x7d   : > { %p9110_p0 = pneg %p9098_p12 }
  0x7f   : > { %p7911_p1 = pnand %p9110_p0, %p7909_p13 }
  0x81   : > { %p7912_p2 = pneg %p7911_p1 }
  0x83   : > { %p7917_p4 = pnand %p7915_p3, %p7912_p2 }
  0x85   : > { %7920 = shalt.err (!%p7917_p4)
}
  0x86   : > { %s7921_s1 = scalar_lea.vmem %s991_s28, 16  ;;  %s7928_s26 = scalar_lea.vmem %s991_s28, 32 }
  0x87   : > { %p7922_p7 = scmp.ne.s32.totalorder %s991_s28, %s7921_s1  ;;  %p7929_p9 = scmp.lt.s32.totalorder %s991_s28, %s991_s28 }
  0x88   : > { %p7930_p6 = scmp.lt.s32.totalorder %s7928_s26, %s7921_s1 }
  0x89   : > { %p7924_p8 = pnand %p7922_p7, %p9110_p0 }
  0x8a   : > { %p7931_p5 = por %p7930_p6, %p7929_p9 }
  0x8b   : > { %p7925_p11 = pneg %p7924_p8 }
  0x8d   : > { %p7932_p10 = pnand %p7931_p5, %p7925_p11 }
  0x8f   : > { %7935 = shalt.err (!%p7932_p10)
}
  0x90   : > { %7252 = dma.hbm_to_vmem [thread:$0]  (!%p9098_p12), %s10443_s29, 16, %s991_s28, [#allocation7]  }
  0x91   : > { %s7936_s15 = scalar_lea.hbm %s10444_s8, 16 }
  0x92   : > { %p7937_p13 = scmp.ne.s32.totalorder %s10444_s8, %s7936_s15  ;;  %p7943_p3 = scmp.lt.u32.totalorder %s7936_s15, %s10444_s8 }
  0x94   : > { %p7939_p1 = pnand %p7937_p13, %p9110_p0 }
  0x96   : > { %p7940_p2 = pneg %p7939_p1 }
  0x98   : > { %p7945_p4 = pnand %p7943_p3, %p7940_p2 }
  0x9a   : > { %7948 = shalt.err (!%p7945_p4)
}
  0x9b   : > { %s7949_s1 = scalar_lea.vmem %s9102_s2, 16  ;;  %s7956_s26 = scalar_lea.vmem %s9102_s2, 32 }
  0x9c   : > { %p7950_p5 = scmp.ne.s32.totalorder %s9102_s2, %s7949_s1  ;;  %p7957_p10 = scmp.lt.s32.totalorder %s9102_s2, %s9102_s2 }
  0x9d   : > { %p7958_p7 = scmp.lt.s32.totalorder %s7956_s26, %s7949_s1 }
  0x9e   : > { %p7952_p6 = pnand %p7950_p5, %p9110_p0 }
  0x9f   : > { %p7959_p8 = por %p7958_p7, %p7957_p10 }
  0xa0   : > { %p7953_p9 = pneg %p7952_p6 }
  0xa2   : > { %p7960_p11 = pnand %p7959_p8, %p7953_p9 }
  0xa4   : > { %7963 = shalt.err (!%p7960_p11)
}
  0xa5   : > { %7258 = dma.hbm_to_vmem [thread:$0]  (!%p9098_p12), %s10444_s8, 16, %s9102_s2, [#allocation10]  }
  0xa6   : > { %s7964_s28 = scalar_lea.hbm %s10436_s19, 16 }
  0xa7   : > { %p7965_p13 = scmp.ne.s32.totalorder %s10436_s19, %s7964_s28  ;;  %p7971_p3 = scmp.lt.u32.totalorder %s7964_s28, %s10436_s19 }
  0xa9   : > { %p7967_p1 = pnand %p7965_p13, %p9110_p0 }
  0xab   : > { %p7968_p2 = pneg %p7967_p1 }
  0xad   : > { %p7973_p4 = pnand %p7971_p3, %p7968_p2 }
  0xaf   : > { %7976 = shalt.err (!%p7973_p4)
}
  0xb0   : > { %s7977_s15 = scalar_lea.vmem %s9104_s10, 16  ;;  %s7984_s1 = scalar_lea.vmem %s9104_s10, 32 }
  0xb1   : > { %p7978_p5 = scmp.ne.s32.totalorder %s9104_s10, %s7977_s15  ;;  %p7985_p10 = scmp.lt.s32.totalorder %s9104_s10, %s9104_s10 }
  0xb2   : > { %p7986_p7 = scmp.lt.s32.totalorder %s7984_s1, %s7977_s15 }
  0xb3   : > { %p7980_p6 = pnand %p7978_p5, %p9110_p0 }
  0xb4   : > { %p7987_p8 = por %p7986_p7, %p7985_p10 }
  0xb5   : > { %p7981_p9 = pneg %p7980_p6 }
  0xb7   : > { %p7988_p11 = pnand %p7987_p8, %p7981_p9 }
  0xb9   : > { %7991 = shalt.err (!%p7988_p11)
}
  0xba   : > { %7264 = dma.hbm_to_vmem [thread:$0]  (!%p9098_p12), %s10436_s19, 16, %s9104_s10, [#allocation13]  }
  0xbb   : > { %s8797_s2 = smov [#allocation15]   ;;  %s8798_s28 = smov [#allocation18]  }
  0xbc   : > { %s1058_s26 = sshll.u32 %s8797_s2, 4  ;;  %s1080_s8 = sshll.u32 %s8798_s28, 4  ;;  %s1059_s26 = int_to_ptr.vmem [resolvable:$true] %s1058_s26  ;;  %s1081_s8 = int_to_ptr.vmem [resolvable:$true] %s1080_s8 }
  0xbd   : > { %s7992_s29 = scalar_lea.hbm %s8909_s30, 16 }
  0xbe   : > { %p7993_p13 = scmp.ne.s32.totalorder %s8909_s30, %s7992_s29  ;;  %p7999_p3 = scmp.lt.u32.totalorder %s7992_s29, %s8909_s30 }
  0xc0   : > { %p7995_p1 = pnand %p7993_p13, %p9110_p0 }
  0xc2   : > { %p7996_p2 = pneg %p7995_p1 }
  0xc4   : > { %p8001_p4 = pnand %p7999_p3, %p7996_p2 }
  0xc6   : > { %8004 = shalt.err (!%p8001_p4)
}
  0xc7   : > { %s8005_s15 = scalar_lea.vmem %s1059_s26, 16  ;;  %s8012_s10 = scalar_lea.vmem %s1059_s26, 32 }
  0xc8   : > { %p8006_p5 = scmp.ne.s32.totalorder %s1059_s26, %s8005_s15  ;;  %p8013_p10 = scmp.lt.s32.totalorder %s1059_s26, %s1059_s26 }
  0xc9   : > { %p8014_p7 = scmp.lt.s32.totalorder %s8012_s10, %s8005_s15 }
  0xca   : > { %p8008_p6 = pnand %p8006_p5, %p9110_p0 }
  0xcb   : > { %p8015_p8 = por %p8014_p7, %p8013_p10 }
  0xcc   : > { %p8009_p9 = pneg %p8008_p6 }
  0xce   : > { %p8016_p11 = pnand %p8015_p8, %p8009_p9 }
  0xd0   : > { %8019 = shalt.err (!%p8016_p11)
}
  0xd1   : > { %7270 = dma.hbm_to_vmem [thread:$0]  (!%p9098_p12), %s8909_s30, 16, %s1059_s26, [#allocation16]  }
  0xd2   : > { %s8020_s29 = scalar_lea.hbm %s10442_s12, 16 }
  0xd3   : > { %p8021_p13 = scmp.ne.s32.totalorder %s10442_s12, %s8020_s29  ;;  %p8027_p3 = scmp.lt.u32.totalorder %s8020_s29, %s10442_s12 }
  0xd5   : > { %p8023_p1 = pnand %p8021_p13, %p9110_p0 }
  0xd7   : > { %p8024_p2 = pneg %p8023_p1 }
  0xd9   : > { %p8029_p4 = pnand %p8027_p3, %p8024_p2 }
  0xdb   : > { %8032 = shalt.err (!%p8029_p4)
}
  0xdc   : > { %s8033_s1 = scalar_lea.vmem %s1081_s8, 16  ;;  %s8040_s2 = scalar_lea.vmem %s1081_s8, 32 }
  0xdd   : > { %p8034_p5 = scmp.ne.s32.totalorder %s1081_s8, %s8033_s1  ;;  %p8041_p10 = scmp.lt.s32.totalorder %s1081_s8, %s1081_s8 }
  0xde   : > { %p8042_p7 = scmp.lt.s32.totalorder %s8040_s2, %s8033_s1 }
  0xdf   : > { %p8036_p6 = pnand %p8034_p5, %p9110_p0 }
  0xe0   : > { %p8043_p8 = por %p8042_p7, %p8041_p10 }
  0xe1   : > { %p8037_p9 = pneg %p8036_p6 }
  0xe3   : > { %p8044_p11 = pnand %p8043_p8, %p8037_p9 }
  0xe5   : > { %8047 = shalt.err (!%p8044_p11)
}
  0xe6   : > { %7276 = dma.hbm_to_vmem [thread:$0]  (!%p9098_p12), %s10442_s12, 16, %s1081_s8, [#allocation19]  }
  0xe7   : > { %s8799_s26 = smov [#allocation21]   ;;  %s8048_s15 = scalar_lea.hbm %s8939_s21, 32 }
  0xe8   : > { %s1109_s28 = sshll.u32 %s8799_s26, 4  ;;  %p8049_p13 = scmp.ne.s32.totalorder %s8939_s21, %s8048_s15  ;;  %s1110_s28 = int_to_ptr.vmem [resolvable:$true] %s1109_s28 }
  0xe9   : > { %p8055_p3 = scmp.lt.u32.totalorder %s8048_s15, %s8939_s21 }
  0xea   : > { %p8051_p1 = pnand %p8049_p13, %p9110_p0 }
  0xec   : > { %p8052_p2 = pneg %p8051_p1 }
  0xee   : > { %p8057_p4 = pnand %p8055_p3, %p8052_p2 }
  0xf0   : > { %8060 = shalt.err (!%p8057_p4)
}
  0xf1   : > { %s8061_s10 = scalar_lea.vmem %s1110_s28, 32  ;;  %p8069_p10 = scmp.lt.s32.totalorder %s1110_s28, %s1110_s28 }
  0xf2   : > { %p8062_p5 = scmp.ne.s32.totalorder %s1110_s28, %s8061_s10  ;;  %p8070_p7 = scmp.lt.s32.totalorder %s8061_s10, %s8061_s10 }
  0xf4   : > { %p8064_p6 = pnand %p8062_p5, %p9110_p0  ;;  %p8071_p8 = por %p8070_p7, %p8069_p10 }
  0xf6   : > { %p8065_p9 = pneg %p8064_p6 }
  0xf8   : > { %p8072_p11 = pnand %p8071_p8, %p8065_p9 }
  0xfa   : > { %8075 = shalt.err (!%p8072_p11)
}
  0xfb   : > { %s10381_s8 = smov 16   ;;  %s10383_s29 = smov 1  }
  0xfc   : > { %7282 = dma.hbm_to_vmem [thread:$0]  (!%p9098_p12), %s8939_s21, 32, %s1110_s28, [#allocation22], %s10381_s8, %s10381_s8, %s10383_s29  }
  0xfd   : > { %s8802_s1 = smov [#allocation24]   ;;  %s8803_s26 = smov [#allocation27]  }
  0xfe   : > { %s1135_s2 = sshll.u32 %s8802_s1, 4  ;;  %s1167_s15 = sshll.u32 %s8803_s26, 4  ;;  %s1136_s2 = int_to_ptr.vmem [resolvable:$true] %s1135_s2  ;;  %s9187_s15 = int_to_ptr.vmem [resolvable:$true] %s1167_s15 }
  0xff   : > { %s8076_s10 = scalar_lea.hbm %s10440_s5, 32 }
 0x100   : > { %p8077_p13 = scmp.ne.s32.totalorder %s10440_s5, %s8076_s10  ;;  %p8083_p3 = scmp.lt.u32.totalorder %s8076_s10, %s10440_s5 }
 0x102   : > { %p8079_p1 = pnand %p8077_p13, %p9110_p0 }
 0x104   : > { %p8080_p2 = pneg %p8079_p1 }
 0x106   : > { %p8085_p4 = pnand %p8083_p3, %p8080_p2 }
 0x108   : > { %8088 = shalt.err (!%p8085_p4)
}
 0x109   : > { %s8089_s12 = scalar_lea.vmem %s1136_s2, 32  ;;  %p8097_p10 = scmp.lt.s32.totalorder %s1136_s2, %s1136_s2 }
 0x10a   : > { %p8090_p5 = scmp.ne.s32.totalorder %s1136_s2, %s8089_s12  ;;  %p8098_p7 = scmp.lt.s32.totalorder %s8089_s12, %s8089_s12 }
 0x10c   : > { %p8092_p6 = pnand %p8090_p5, %p9110_p0  ;;  %p8099_p8 = por %p8098_p7, %p8097_p10 }
 0x10e   : > { %p8093_p9 = pneg %p8092_p6 }
 0x110   : > { %p8100_p11 = pnand %p8099_p8, %p8093_p9 }
 0x112   : > { %8103 = shalt.err (!%p8100_p11)
}
 0x113   : > { %7288 = dma.hbm_to_vmem [thread:$0]  (!%p9098_p12), %s10440_s5, 32, %s1136_s2, [#allocation25], %s10381_s8, %s10381_s8, %s10383_s29  }
 0x114   : > { %s8104_s28 = scalar_lea.hbm %s10438_s9, 32 }
 0x115   : > { %p8105_p13 = scmp.ne.s32.totalorder %s10438_s9, %s8104_s28  ;;  %p8111_p3 = scmp.lt.u32.totalorder %s8104_s28, %s10438_s9 }
 0x117   : > { %p8107_p1 = pnand %p8105_p13, %p9110_p0 }
 0x119   : > { %p8108_p2 = pneg %p8107_p1 }
 0x11b   : > { %p8113_p4 = pnand %p8111_p3, %p8108_p2 }
 0x11d   : > { %8116 = shalt.err (!%p8113_p4)
}
 0x11e   : > { %s8117_s12 = scalar_lea.vmem %s9187_s15, 32  ;;  %p8125_p10 = scmp.lt.s32.totalorder %s9187_s15, %s9187_s15 }
 0x11f   : > { %p8118_p5 = scmp.ne.s32.totalorder %s9187_s15, %s8117_s12  ;;  %p8126_p7 = scmp.lt.s32.totalorder %s8117_s12, %s8117_s12 }
 0x121   : > { %p8120_p6 = pnand %p8118_p5, %p9110_p0  ;;  %p8127_p8 = por %p8126_p7, %p8125_p10 }
 0x123   : > { %p8121_p9 = pneg %p8120_p6 }
 0x125   : > { %p8128_p11 = pnand %p8127_p8, %p8121_p9 }
 0x127   : > { %8131 = shalt.err (!%p8128_p11)
}
 0x128   : > { %7294 = dma.hbm_to_vmem [thread:$0]  (!%p9098_p12), %s10438_s9, 32, %s9187_s15, [#allocation28], %s10381_s8, %s10381_s8, %s10383_s29  }
 0x129   : > { %s8804_s1 = smov [#allocation30]   ;;  %s8805_s26 = smov [#allocation33]  }
 0x12a   : > { %s1193_s2 = sshll.u32 %s8804_s1, 4  ;;  %s1224_s10 = sshll.u32 %s8805_s26, 4  ;;  %s1194_s2 = int_to_ptr.vmem [resolvable:$true] %s1193_s2  ;;  %s9220_s10 = int_to_ptr.vmem [resolvable:$true] %s1224_s10 }
 0x12b   : > { %s8132_s28 = scalar_lea.hbm %s10437_s17, 32 }
 0x12c   : > { %p8133_p13 = scmp.ne.s32.totalorder %s10437_s17, %s8132_s28  ;;  %p8139_p3 = scmp.lt.u32.totalorder %s8132_s28, %s10437_s17 }
 0x12e   : > { %p8135_p1 = pnand %p8133_p13, %p9110_p0 }
 0x130   : > { %p8136_p2 = pneg %p8135_p1 }
 0x132   : > { %p8141_p4 = pnand %p8139_p3, %p8136_p2 }
 0x134   : > { %8144 = shalt.err (!%p8141_p4)
}
 0x135   : > { %s8145_s12 = scalar_lea.vmem %s1194_s2, 32  ;;  %p8153_p10 = scmp.lt.s32.totalorder %s1194_s2, %s1194_s2 }
 0x136   : > { %p8146_p5 = scmp.ne.s32.totalorder %s1194_s2, %s8145_s12  ;;  %p8154_p7 = scmp.lt.s32.totalorder %s8145_s12, %s8145_s12 }
 0x138   : > { %p8148_p6 = pnand %p8146_p5, %p9110_p0  ;;  %p8155_p8 = por %p8154_p7, %p8153_p10 }
 0x13a   : > { %p8149_p9 = pneg %p8148_p6 }
 0x13c   : > { %p8156_p11 = pnand %p8155_p8, %p8149_p9 }
 0x13e   : > { %8159 = shalt.err (!%p8156_p11)
}
 0x13f   : > { %7300 = dma.hbm_to_vmem [thread:$0]  (!%p9098_p12), %s10437_s17, 32, %s1194_s2, [#allocation31], %s10381_s8, %s10381_s8, %s10383_s29  }
 0x140   : > { %s8160_s15 = scalar_lea.hbm %s8999_s27, 16 }
 0x141   : > { %p8161_p13 = scmp.ne.s32.totalorder %s8999_s27, %s8160_s15  ;;  %p8167_p3 = scmp.lt.u32.totalorder %s8160_s15, %s8999_s27 }
 0x143   : > { %p8163_p1 = pnand %p8161_p13, %p9110_p0 }
 0x145   : > { %p8164_p2 = pneg %p8163_p1 }
 0x147   : > { %p8169_p4 = pnand %p8167_p3, %p8164_p2 }
 0x149   : > { %8172 = shalt.err (!%p8169_p4)
}
 0x14a   : > { %s8173_s1 = scalar_lea.vmem %s9220_s10, 16  ;;  %s8180_s26 = scalar_lea.vmem %s9220_s10, 32 }
 0x14b   : > { %p8174_p5 = scmp.ne.s32.totalorder %s9220_s10, %s8173_s1  ;;  %p8181_p10 = scmp.lt.s32.totalorder %s9220_s10, %s9220_s10 }
 0x14c   : > { %p8182_p7 = scmp.lt.s32.totalorder %s8180_s26, %s8173_s1 }
 0x14d   : > { %p8176_p6 = pnand %p8174_p5, %p9110_p0 }
 0x14e   : > { %p8183_p8 = por %p8182_p7, %p8181_p10 }
 0x14f   : > { %p8177_p9 = pneg %p8176_p6 }
 0x151   : > { %p8184_p11 = pnand %p8183_p8, %p8177_p9 }
 0x153   : > { %8187 = shalt.err (!%p8184_p11)
}
 0x154   : > { %7306 = dma.hbm_to_vmem [thread:$0]  (!%p9098_p12), %s8999_s27, 16, %s9220_s10, [#allocation34]  }
 0x155   : > { %s8806_s2 = smov [#allocation36]   ;;  %s8807_s12 = smov [#allocation39]  }
 0x156   : > { %s1248_s28 = sshll.u32 %s8806_s2, 4  ;;  %s1270_s15 = sshll.u32 %s8807_s12, 4  ;;  %s1249_s28 = int_to_ptr.vmem [resolvable:$true] %s1248_s28  ;;  %s9251_s15 = int_to_ptr.vmem [resolvable:$true] %s1270_s15 }
 0x157   : > { %s8188_s1 = scalar_lea.hbm %s10435_s20, 16 }
 0x158   : > { %p8189_p13 = scmp.ne.s32.totalorder %s10435_s20, %s8188_s1  ;;  %p8195_p3 = scmp.lt.u32.totalorder %s8188_s1, %s10435_s20 }
 0x15a   : > { %p8191_p1 = pnand %p8189_p13, %p9110_p0 }
 0x15c   : > { %p8192_p2 = pneg %p8191_p1 }
 0x15e   : > { %p8197_p4 = pnand %p8195_p3, %p8192_p2 }
 0x160   : > { %8200 = shalt.err (!%p8197_p4)
}
 0x161   : > { %s8201_s26 = scalar_lea.vmem %s1249_s28, 16  ;;  %s8208_s10 = scalar_lea.vmem %s1249_s28, 32 }
 0x162   : > { %p8202_p5 = scmp.ne.s32.totalorder %s1249_s28, %s8201_s26  ;;  %p8209_p10 = scmp.lt.s32.totalorder %s1249_s28, %s1249_s28 }
 0x163   : > { %p8210_p7 = scmp.lt.s32.totalorder %s8208_s10, %s8201_s26 }
 0x164   : > { %p8204_p6 = pnand %p8202_p5, %p9110_p0 }
 0x165   : > { %p8211_p8 = por %p8210_p7, %p8209_p10 }
 0x166   : > { %p8205_p9 = pneg %p8204_p6 }
 0x168   : > { %p8212_p11 = pnand %p8211_p8, %p8205_p9 }
 0x16a   : > { %8215 = shalt.err (!%p8212_p11)
}
 0x16b   : > { %7312 = dma.hbm_to_vmem [thread:$0]  (!%p9098_p12), %s10435_s20, 16, %s1249_s28, [#allocation37]  }
 0x16c   : > { %s8216_s2 = scalar_lea.hbm %s10439_s6, 16 }
 0x16d   : > { %p8217_p13 = scmp.ne.s32.totalorder %s10439_s6, %s8216_s2  ;;  %p8223_p3 = scmp.lt.u32.totalorder %s8216_s2, %s10439_s6 }
 0x16f   : > { %p8219_p1 = pnand %p8217_p13, %p9110_p0 }
 0x171   : > { %p8220_p2 = pneg %p8219_p1 }
 0x173   : > { %p8225_p4 = pnand %p8223_p3, %p8220_p2 }
 0x175   : > { %8228 = shalt.err (!%p8225_p4)
}
 0x176   : > { %s8229_s12 = scalar_lea.vmem %s9251_s15, 16  ;;  %s8236_s1 = scalar_lea.vmem %s9251_s15, 32 }
 0x177   : > { %p8230_p5 = scmp.ne.s32.totalorder %s9251_s15, %s8229_s12  ;;  %p8237_p10 = scmp.lt.s32.totalorder %s9251_s15, %s9251_s15 }
 0x178   : > { %p8238_p7 = scmp.lt.s32.totalorder %s8236_s1, %s8229_s12 }
 0x179   : > { %p8232_p6 = pnand %p8230_p5, %p9110_p0 }
 0x17a   : > { %p8239_p8 = por %p8238_p7, %p8237_p10 }
 0x17b   : > { %p8233_p9 = pneg %p8232_p6 }
 0x17d   : > { %p8240_p11 = pnand %p8239_p8, %p8233_p9 }
 0x17f   : > { %8243 = shalt.err (!%p8240_p11)
}
 0x180   : > { %7318 = dma.hbm_to_vmem [thread:$0]  (!%p9098_p12), %s10439_s6, 16, %s9251_s15, [#allocation40]  }
 0x181   : > { %s8808_s28 = smov [#allocation3]   ;;  %s8809_s10 = smov [#allocation8]  }
 0x182   : > { %s979_s26 = sshll.u32 %s8808_s28, 4  ;;  %s1001_s2 = sshll.u32 %s8809_s10, 4  ;;  %s980_s26 = int_to_ptr.vmem [resolvable:$true] %s979_s26  ;;  %s9279_s2 = int_to_ptr.vmem [resolvable:$true] %s1001_s2 }
 0x183   : > { %s8244_s12 = scalar_lea.hbm %s8874_s25, 128 }
 0x184   : > { %p8245_p13 = scmp.ne.s32.totalorder %s8874_s25, %s8244_s12  ;;  %p8251_p3 = scmp.lt.u32.totalorder %s8244_s12, %s8874_s25 }
 0x186   : > { %p8247_p1 = pnand %p8245_p13, %p9110_p0 }
 0x188   : > { %p8248_p2 = pneg %p8247_p1 }
 0x18a   : > { %p8253_p4 = pnand %p8251_p3, %p8248_p2 }
 0x18c   : > { %8256 = shalt.err (!%p8253_p4)
}
 0x18d   : > { %s8257_s1 = scalar_lea.vmem %s980_s26, 128  ;;  %p8265_p10 = scmp.lt.s32.totalorder %s980_s26, %s980_s26 }
 0x18e   : > { %p8258_p5 = scmp.ne.s32.totalorder %s980_s26, %s8257_s1  ;;  %p8266_p7 = scmp.lt.s32.totalorder %s8257_s1, %s8257_s1 }
 0x190   : > { %p8260_p6 = pnand %p8258_p5, %p9110_p0  ;;  %p8267_p8 = por %p8266_p7, %p8265_p10 }
 0x192   : > { %p8261_p9 = pneg %p8260_p6 }
 0x194   : > { %p8268_p11 = pnand %p8267_p8, %p8261_p9 }
 0x196   : > { %8271 = shalt.err (!%p8268_p11)
}
 0x197   : > { %7249 = dma.hbm_to_vmem [thread:$0]  (!%p9098_p12), %s8874_s25, 128, %s980_s26, [#allocation4]  }
 0x198   : > { %s8272_s15 = scalar_lea.hbm %s10441_s3, 16 }
 0x199   : > { %p8273_p13 = scmp.ne.s32.totalorder %s10441_s3, %s8272_s15  ;;  %p8279_p3 = scmp.lt.u32.totalorder %s8272_s15, %s10441_s3 }
 0x19b   : > { %p8275_p1 = pnand %p8273_p13, %p9110_p0 }
 0x19d   : > { %p8276_p2 = pneg %p8275_p1 }
 0x19f   : > { %p8281_p4 = pnand %p8279_p3, %p8276_p2 }
 0x1a1   : > { %8284 = shalt.err (!%p8281_p4)
}
 0x1a2   : > { %s8285_s28 = scalar_lea.vmem %s9279_s2, 16  ;;  %s8292_s10 = scalar_lea.vmem %s9279_s2, 32 }
 0x1a3   : > { %p8286_p5 = scmp.ne.s32.totalorder %s9279_s2, %s8285_s28  ;;  %p8293_p10 = scmp.lt.s32.totalorder %s9279_s2, %s9279_s2 }
 0x1a4   : > { %p8294_p7 = scmp.lt.s32.totalorder %s8292_s10, %s8285_s28 }
 0x1a5   : > { %p8288_p6 = pnand %p8286_p5, %p9110_p0 }
 0x1a6   : > { %p8295_p8 = por %p8294_p7, %p8293_p10 }
 0x1a7   : > { %p8289_p9 = pneg %p8288_p6 }
 0x1a9   : > { %p8296_p11 = pnand %p8295_p8, %p8289_p9 }
 0x1ab   : > { %8299 = shalt.err (!%p8296_p11)
}
 0x1ac   : > { %s10455_s26 = sld [smem:[#allocation68_spill]]  ;;  %s8810_s12 = smov [#allocation11]  }
 0x1ad   : > { %7255 = dma.hbm_to_vmem [thread:$0]  (!%p9098_p12), %s10441_s3, 16, %s9279_s2, [#allocation7]  }
 0x1ae   : > { %s1022_s1 = sshll.u32 %s8810_s12, 4  ;;  %s1023_s1 = int_to_ptr.vmem [resolvable:$true] %s1022_s1 }
 0x1b2   : > { %s8300_s15 = scalar_lea.hbm %s10455_s26, 512 }
 0x1b3   : > { %p8301_p13 = scmp.ne.s32.totalorder %s10455_s26, %s8300_s15  ;;  %p8307_p3 = scmp.lt.u32.totalorder %s8300_s15, %s10455_s26 }
 0x1b5   : > { %p8303_p1 = pnand %p8301_p13, %p9110_p0 }
 0x1b7   : > { %p8304_p2 = pneg %p8303_p1 }
 0x1b9   : > { %p8309_p4 = pnand %p8307_p3, %p8304_p2 }
 0x1bb   : > { %8312 = shalt.err (!%p8309_p4)
}
 0x1bc   : > { %s8313_s28 = scalar_lea.vmem %s1023_s1, 512  ;;  %p8321_p10 = scmp.lt.s32.totalorder %s1023_s1, %s1023_s1 }
 0x1bd   : > { %p8314_p5 = scmp.ne.s32.totalorder %s1023_s1, %s8313_s28  ;;  %p8322_p7 = scmp.lt.s32.totalorder %s8313_s28, %s8313_s28 }
 0x1bf   : > { %p8316_p6 = pnand %p8314_p5, %p9110_p0  ;;  %p8323_p8 = por %p8322_p7, %p8321_p10 }
 0x1c1   : > { %p8317_p9 = pneg %p8316_p6 }
 0x1c3   : > { %p8324_p11 = pnand %p8323_p8, %p8317_p9 }
 0x1c5   : > { %8327 = shalt.err (!%p8324_p11)
}
 0x1c6   : > { %s10387_s2 = smov 64   ;;  %s10456_s10 = sld [smem:[#allocation70_spill]] }
 0x1c7   : > { %s10388_s12 = smov 4   ;;  %s8813_s15 = smov [#allocation14]  }
 0x1c8   : > { %7261 = dma.hbm_to_vmem [thread:$0]  (!%p9098_p12), %s10455_s26, 512, %s1023_s1, [#allocation10], %s10387_s2, %s10387_s2, %s10388_s12  }
 0x1c9   : > { %s1047_s8 = sshll.u32 %s8813_s15, 4  ;;  %s8814_s28 = smov [#allocation17]   ;;  %s1048_s8 = int_to_ptr.vmem [resolvable:$true] %s1047_s8 }
 0x1ca   : > { %s1069_s29 = sshll.u32 %s8814_s28, 4  ;;  %s1070_s29 = int_to_ptr.vmem [resolvable:$true] %s1069_s29 }
 0x1cc   : > { %s8328_s3 = scalar_lea.hbm %s10456_s10, 128 }
 0x1cd   : > { %p8329_p13 = scmp.ne.s32.totalorder %s10456_s10, %s8328_s3  ;;  %p8335_p3 = scmp.lt.u32.totalorder %s8328_s3, %s10456_s10 }
 0x1cf   : > { %p8331_p1 = pnand %p8329_p13, %p9110_p0 }
 0x1d1   : > { %p8332_p2 = pneg %p8331_p1 }
 0x1d3   : > { %p8337_p4 = pnand %p8335_p3, %p8332_p2 }
 0x1d5   : > { %8340 = shalt.err (!%p8337_p4)
}
 0x1d6   : > { %s8341_s5 = scalar_lea.vmem %s1048_s8, 128  ;;  %p8349_p10 = scmp.lt.s32.totalorder %s1048_s8, %s1048_s8 }
 0x1d7   : > { %p8342_p5 = scmp.ne.s32.totalorder %s1048_s8, %s8341_s5  ;;  %p8350_p7 = scmp.lt.s32.totalorder %s8341_s5, %s8341_s5 }
 0x1d9   : > { %p8344_p6 = pnand %p8342_p5, %p9110_p0  ;;  %p8351_p8 = por %p8350_p7, %p8349_p10 }
 0x1db   : > { %p8345_p9 = pneg %p8344_p6 }
 0x1dd   : > { %p8352_p11 = pnand %p8351_p8, %p8345_p9 }
 0x1df   : > { %8355 = shalt.err (!%p8352_p11)
}
 0x1e0   : > { %s10457_s1 = sld [smem:[#allocation71_spill]] }
 0x1e1   : > { %7267 = dma.hbm_to_vmem [thread:$0]  (!%p9098_p12), %s10456_s10, 128, %s1048_s8, [#allocation13]  }
 0x1e6   : > { %s8356_s3 = scalar_lea.hbm %s10457_s1, 16 }
 0x1e7   : > { %p8357_p13 = scmp.ne.s32.totalorder %s10457_s1, %s8356_s3  ;;  %p8363_p3 = scmp.lt.u32.totalorder %s8356_s3, %s10457_s1 }
 0x1e9   : > { %p8359_p1 = pnand %p8357_p13, %p9110_p0 }
 0x1eb   : > { %p8360_p2 = pneg %p8359_p1 }
 0x1ed   : > { %p8365_p4 = pnand %p8363_p3, %p8360_p2 }
 0x1ef   : > { %8368 = shalt.err (!%p8365_p4)
}
 0x1f0   : > { %s8369_s5 = scalar_lea.vmem %s1070_s29, 16  ;;  %s8376_s15 = scalar_lea.vmem %s1070_s29, 32 }
 0x1f1   : > { %p8370_p5 = scmp.ne.s32.totalorder %s1070_s29, %s8369_s5  ;;  %p8377_p10 = scmp.lt.s32.totalorder %s1070_s29, %s1070_s29 }
 0x1f2   : > { %p8378_p7 = scmp.lt.s32.totalorder %s8376_s15, %s8369_s5 }
 0x1f3   : > { %p8372_p6 = pnand %p8370_p5, %p9110_p0 }
 0x1f4   : > { %p8379_p8 = por %p8378_p7, %p8377_p10 }
 0x1f5   : > { %p8373_p9 = pneg %p8372_p6 }
 0x1f7   : > { %p8380_p11 = pnand %p8379_p8, %p8373_p9 }
 0x1f9   : > { %8383 = shalt.err (!%p8380_p11)
}
 0x1fa   : > { %s10458_s8 = sld [smem:[#allocation74_spill]]  ;;  %s8815_s28 = smov [#allocation20]  }
 0x1fb   : > { %7273 = dma.hbm_to_vmem [thread:$0]  (!%p9098_p12), %s10457_s1, 16, %s1070_s29, [#allocation16]  }
 0x1fc   : > { %s1093_s3 = sshll.u32 %s8815_s28, 4  ;;  %s1094_s3 = int_to_ptr.vmem [resolvable:$true] %s1093_s3 }
 0x200   : > { %s8384_s2 = scalar_lea.hbm %s10458_s8, 96 }
 0x201   : > { %p8385_p13 = scmp.ne.s32.totalorder %s10458_s8, %s8384_s2  ;;  %p8391_p3 = scmp.lt.u32.totalorder %s8384_s2, %s10458_s8 }
 0x203   : > { %p8387_p1 = pnand %p8385_p13, %p9110_p0 }
 0x205   : > { %p8388_p2 = pneg %p8387_p1 }
 0x207   : > { %p8393_p4 = pnand %p8391_p3, %p8388_p2 }
 0x209   : > { %8396 = shalt.err (!%p8393_p4)
}
 0x20a   : > { %s8397_s5 = scalar_lea.vmem %s1094_s3, 96  ;;  %p8405_p10 = scmp.lt.s32.totalorder %s1094_s3, %s1094_s3 }
 0x20b   : > { %p8398_p5 = scmp.ne.s32.totalorder %s1094_s3, %s8397_s5  ;;  %p8406_p7 = scmp.lt.s32.totalorder %s8397_s5, %s8397_s5 }
 0x20d   : > { %p8400_p6 = pnand %p8398_p5, %p9110_p0  ;;  %p8407_p8 = por %p8406_p7, %p8405_p10 }
 0x20f   : > { %p8401_p9 = pneg %p8400_p6 }
 0x211   : > { %p8408_p11 = pnand %p8407_p8, %p8401_p9 }
 0x213   : > { %8411 = shalt.err (!%p8408_p11)
}
 0x214   : > { %s8816_s29 = smov 48   ;;  %s10459_s15 = sld [smem:[#allocation76_spill]] }
 0x215   : > { %s8817_s2 = smov 3   ;;  %s8818_s12 = smov [#allocation23]  }
 0x216   : > { %7279 = dma.hbm_to_vmem [thread:$0]  (!%p9098_p12), %s10458_s8, 96, %s1094_s3, [#allocation19], %s8816_s29, %s8816_s29, %s8817_s2  }
 0x217   : > { %s1122_s1 = sshll.u32 %s8818_s12, 4  ;;  %s8819_s6 = smov [#allocation26]   ;;  %s1123_s1 = int_to_ptr.vmem [resolvable:$true] %s1122_s1 }
 0x218   : > { %s1151_s9 = sshll.u32 %s8819_s6, 4  ;;  %s9350_s9 = int_to_ptr.vmem [resolvable:$true] %s1151_s9 }
 0x21a   : > { %s10460_s28 = smov %s10459_s15  ;;  %s8412_s5 = scalar_lea.hbm %s10459_s15, 32 }
 0x21b   : > { %p8413_p13 = scmp.ne.s32.totalorder %s10460_s28, %s8412_s5  ;;  %p8419_p3 = scmp.lt.u32.totalorder %s8412_s5, %s10460_s28 }
 0x21d   : > { %p8415_p1 = pnand %p8413_p13, %p9110_p0 }
 0x21f   : > { %p8416_p2 = pneg %p8415_p1 }
 0x221   : > { %p8421_p4 = pnand %p8419_p3, %p8416_p2 }
 0x223   : > { %8424 = shalt.err (!%p8421_p4)
}
 0x224   : > { %s8425_s10 = scalar_lea.vmem %s1123_s1, 32  ;;  %p8433_p10 = scmp.lt.s32.totalorder %s1123_s1, %s1123_s1 }
 0x225   : > { %p8426_p5 = scmp.ne.s32.totalorder %s1123_s1, %s8425_s10  ;;  %p8434_p7 = scmp.lt.s32.totalorder %s8425_s10, %s8425_s10 }
 0x227   : > { %p8428_p6 = pnand %p8426_p5, %p9110_p0  ;;  %p8435_p8 = por %p8434_p7, %p8433_p10 }
 0x229   : > { %p8429_p9 = pneg %p8428_p6 }
 0x22b   : > { %p8436_p11 = pnand %p8435_p8, %p8429_p9 }
 0x22d   : > { %8439 = shalt.err (!%p8436_p11)
}
 0x22e   : > { %s10461_s6 = smov 1   ;;  %s10462_s12 = smov 16  }
 0x22f   : > { %s10463_s3 = sld [smem:[#allocation79_spill]] }
 0x230   : > { %7285 = dma.hbm_to_vmem [thread:$0]  (!%p9098_p12), %s10460_s28, 32, %s1123_s1, [#allocation22], %s10462_s12, %s10462_s12, %s10461_s6  }
 0x235   : > { %s8440_s29 = scalar_lea.hbm %s10463_s3, 64 }
 0x236   : > { %p8441_p13 = scmp.ne.s32.totalorder %s10463_s3, %s8440_s29  ;;  %p8447_p3 = scmp.lt.u32.totalorder %s8440_s29, %s10463_s3 }
 0x238   : > { %p8443_p1 = pnand %p8441_p13, %p9110_p0 }
 0x23a   : > { %p8444_p2 = pneg %p8443_p1 }
 0x23c   : > { %p8449_p4 = pnand %p8447_p3, %p8444_p2 }
 0x23e   : > { %8452 = shalt.err (!%p8449_p4)
}
 0x23f   : > { %s8453_s10 = scalar_lea.vmem %s9350_s9, 64  ;;  %p8461_p10 = scmp.lt.s32.totalorder %s9350_s9, %s9350_s9 }
 0x240   : > { %p8454_p5 = scmp.ne.s32.totalorder %s9350_s9, %s8453_s10  ;;  %p8462_p7 = scmp.lt.s32.totalorder %s8453_s10, %s8453_s10 }
 0x242   : > { %p8456_p6 = pnand %p8454_p5, %p9110_p0  ;;  %p8463_p8 = por %p8462_p7, %p8461_p10 }
 0x244   : > { %p8457_p9 = pneg %p8456_p6 }
 0x246   : > { %p8464_p11 = pnand %p8463_p8, %p8457_p9 }
 0x248   : > { %8467 = shalt.err (!%p8464_p11)
}
 0x249   : > { %s8820_s1 = smov 32   ;;  %s10464_s15 = sld [smem:[#allocation82_spill]] }
 0x24a   : > { %s8821_s5 = smov 2   ;;  %s8822_s29 = smov [#allocation29]  }
 0x24b   : > { %7291 = dma.hbm_to_vmem [thread:$0]  (!%p9098_p12), %s10463_s3, 64, %s9350_s9, [#allocation25], %s8820_s1, %s8820_s1, %s8821_s5  }
 0x24c   : > { %s1180_s8 = sshll.u32 %s8822_s29, 4  ;;  %s8823_s17 = smov [#allocation32]   ;;  %s1181_s8 = int_to_ptr.vmem [resolvable:$true] %s1180_s8 }
 0x24d   : > { %s1210_s19 = sshll.u32 %s8823_s17, 4  ;;  %s9380_s19 = int_to_ptr.vmem [resolvable:$true] %s1210_s19 }
 0x24f   : > { %s10465_s2 = smov %s10464_s15  ;;  %s8468_s10 = scalar_lea.hbm %s10464_s15, 32 }
 0x250   : > { %p8469_p13 = scmp.ne.s32.totalorder %s10465_s2, %s8468_s10  ;;  %p8475_p3 = scmp.lt.u32.totalorder %s8468_s10, %s10465_s2 }
 0x252   : > { %p8471_p1 = pnand %p8469_p13, %p9110_p0 }
 0x254   : > { %p8472_p2 = pneg %p8471_p1 }
 0x256   : > { %p8477_p4 = pnand %p8475_p3, %p8472_p2 }
 0x258   : > { %8480 = shalt.err (!%p8477_p4)
}
 0x259   : > { %s8481_s20 = scalar_lea.vmem %s1181_s8, 32  ;;  %p8489_p10 = scmp.lt.s32.totalorder %s1181_s8, %s1181_s8 }
 0x25a   : > { %p8482_p5 = scmp.ne.s32.totalorder %s1181_s8, %s8481_s20  ;;  %p8490_p7 = scmp.lt.s32.totalorder %s8481_s20, %s8481_s20 }
 0x25c   : > { %p8484_p6 = pnand %p8482_p5, %p9110_p0  ;;  %p8491_p8 = por %p8490_p7, %p8489_p10 }
 0x25e   : > { %p8485_p9 = pneg %p8484_p6 }
 0x260   : > { %p8492_p11 = pnand %p8491_p8, %p8485_p9 }
 0x262   : > { %8495 = shalt.err (!%p8492_p11)
}
 0x263   : > { %s10466_s9 = sld [smem:[#allocation85_spill]] }
 0x264   : > { %7297 = dma.hbm_to_vmem [thread:$0]  (!%p9098_p12), %s10465_s2, 32, %s1181_s8, [#allocation28], %s10462_s12, %s10462_s12, %s10461_s6  }
 0x269   : > { %s8496_s17 = scalar_lea.hbm %s10466_s9, 16 }
 0x26a   : > { %p8497_p13 = scmp.ne.s32.totalorder %s10466_s9, %s8496_s17  ;;  %p8503_p3 = scmp.lt.u32.totalorder %s8496_s17, %s10466_s9 }
 0x26c   : > { %p8499_p1 = pnand %p8497_p13, %p9110_p0 }
 0x26e   : > { %p8500_p2 = pneg %p8499_p1 }
 0x270   : > { %p8505_p4 = pnand %p8503_p3, %p8500_p2 }
 0x272   : > { %8508 = shalt.err (!%p8505_p4)
}
 0x273   : > { %s8509_s20 = scalar_lea.vmem %s9380_s19, 16  ;;  %s8516_s1 = scalar_lea.vmem %s9380_s19, 32 }
 0x274   : > { %p8510_p5 = scmp.ne.s32.totalorder %s9380_s19, %s8509_s20  ;;  %p8517_p10 = scmp.lt.s32.totalorder %s9380_s19, %s9380_s19 }
 0x275   : > { %p8518_p7 = scmp.lt.s32.totalorder %s8516_s1, %s8509_s20 }
 0x276   : > { %p8512_p6 = pnand %p8510_p5, %p9110_p0 }
 0x277   : > { %p8519_p8 = por %p8518_p7, %p8517_p10 }
 0x278   : > { %p8513_p9 = pneg %p8512_p6 }
 0x27a   : > { %p8520_p11 = pnand %p8519_p8, %p8513_p9 }
 0x27c   : > { %8523 = shalt.err (!%p8520_p11)
}
 0x27d   : > { %s10467_s8 = sld [smem:[#allocation87_spill]]  ;;  %s8824_s6 = smov [#allocation35]  }
 0x27e   : > { %7303 = dma.hbm_to_vmem [thread:$0]  (!%p9098_p12), %s10466_s9, 16, %s9380_s19, [#allocation31]  }
 0x27f   : > { %s1234_s12 = sshll.u32 %s8824_s6, 4  ;;  %s8825_s15 = smov [#allocation38]   ;;  %s1235_s12 = int_to_ptr.vmem [resolvable:$true] %s1234_s12 }
 0x280   : > { %s1259_s5 = sshll.u32 %s8825_s15, 4  ;;  %s9411_s5 = int_to_ptr.vmem [resolvable:$true] %s1259_s5 }
 0x283   : > { %s8524_s29 = scalar_lea.hbm %s10467_s8, 1024 }
 0x284   : > { %p8525_p13 = scmp.ne.s32.totalorder %s10467_s8, %s8524_s29  ;;  %p8531_p3 = scmp.lt.u32.totalorder %s8524_s29, %s10467_s8 }
 0x286   : > { %p8527_p1 = pnand %p8525_p13, %p9110_p0 }
 0x288   : > { %p8528_p2 = pneg %p8527_p1 }
 0x28a   : > { %p8533_p4 = pnand %p8531_p3, %p8528_p2 }
 0x28c   : > { %8536 = shalt.err (!%p8533_p4)
}
 0x28d   : > { %s8537_s10 = scalar_lea.vmem %s1235_s12, 1024  ;;  %p8545_p10 = scmp.lt.s32.totalorder %s1235_s12, %s1235_s12 }
 0x28e   : > { %p8538_p5 = scmp.ne.s32.totalorder %s1235_s12, %s8537_s10  ;;  %p8546_p7 = scmp.lt.s32.totalorder %s8537_s10, %s8537_s10 }
 0x290   : > { %p8540_p6 = pnand %p8538_p5, %p9110_p0  ;;  %p8547_p8 = por %p8546_p7, %p8545_p10 }
 0x292   : > { %p8541_p9 = pneg %p8540_p6 }
 0x294   : > { %p8548_p11 = pnand %p8547_p8, %p8541_p9 }
 0x296   : > { %8551 = shalt.err (!%p8548_p11)
}
 0x297   : > { %s10468_s19 = smov 4   ;;  %s10469_s17 = smov 64  }
 0x298   : > { %s10470_s20 = sld [smem:[#allocation89_spill]] }
 0x299   : > { %7309 = dma.hbm_to_vmem [thread:$0]  (!%p9098_p12), %s10467_s8, 1024, %s1235_s12, [#allocation34], %s10469_s17, %s10469_s17, %s10468_s19  }
 0x29e   : > { %s8552_s1 = scalar_lea.hbm %s10470_s20, 16 }
 0x29f   : > { %p8553_p13 = scmp.ne.s32.totalorder %s10470_s20, %s8552_s1  ;;  %p8559_p3 = scmp.lt.u32.totalorder %s8552_s1, %s10470_s20 }
 0x2a1   : > { %p8555_p1 = pnand %p8553_p13, %p9110_p0 }
 0x2a3   : > { %p8556_p2 = pneg %p8555_p1 }
 0x2a5   : > { %p8561_p4 = pnand %p8559_p3, %p8556_p2 }
 0x2a7   : > { %8564 = shalt.err (!%p8561_p4)
}
 0x2a8   : > { %s8565_s6 = scalar_lea.vmem %s9411_s5, 16  ;;  %s8572_s15 = scalar_lea.vmem %s9411_s5, 32 }
 0x2a9   : > { %p8566_p5 = scmp.ne.s32.totalorder %s9411_s5, %s8565_s6  ;;  %p8573_p10 = scmp.lt.s32.totalorder %s9411_s5, %s9411_s5 }
 0x2aa   : > { %p8574_p7 = scmp.lt.s32.totalorder %s8572_s15, %s8565_s6 }
 0x2ab   : > { %p8568_p6 = pnand %p8566_p5, %p9110_p0 }
 0x2ac   : > { %p8575_p8 = por %p8574_p7, %p8573_p10 }
 0x2ad   : > { %p8569_p9 = pneg %p8568_p6 }
 0x2af   : > { %p8576_p11 = pnand %p8575_p8, %p8569_p9 }
 0x2b1   : > { %8579 = shalt.err (!%p8576_p11)
}
 0x2b2   : > { %7315 = dma.hbm_to_vmem [thread:$0]  (!%p9098_p12), %s10470_s20, 16, %s9411_s5, [#allocation37]  }
 0x2b3   : > { %s8826_s12 = smov [#allocation41]   ;;  %s8580_s10 = scalar_lea.hbm %s9029_s24, 16 }
 0x2b4   : > { %s1284_s29 = sshll.u32 %s8826_s12, 4  ;;  %p8581_p13 = scmp.ne.s32.totalorder %s9029_s24, %s8580_s10  ;;  %s1285_s29 = int_to_ptr.vmem [resolvable:$true] %s1284_s29 }
 0x2b5   : > { %p8587_p3 = scmp.lt.u32.totalorder %s8580_s10, %s9029_s24 }
 0x2b6   : > { %p8583_p1 = pnand %p8581_p13, %p9110_p0 }
 0x2b8   : > { %p8584_p2 = pneg %p8583_p1 }
 0x2ba   : > { %p8589_p4 = pnand %p8587_p3, %p8584_p2 }
 0x2bc   : > { %8592 = shalt.err (!%p8589_p4)
}
 0x2bd   : > { %s8593_s19 = scalar_lea.vmem %s1285_s29, 16  ;;  %s8600_s17 = scalar_lea.vmem %s1285_s29, 32 }
 0x2be   : > { %p8594_p5 = scmp.ne.s32.totalorder %s1285_s29, %s8593_s19  ;;  %p8601_p10 = scmp.lt.s32.totalorder %s1285_s29, %s1285_s29 }
 0x2bf   : > { %p8602_p7 = scmp.lt.s32.totalorder %s8600_s17, %s8593_s19 }
 0x2c0   : > { %p8596_p6 = pnand %p8594_p5, %p9110_p0 }
 0x2c1   : > { %p8603_p8 = por %p8602_p7, %p8601_p10 }
 0x2c2   : > { %p8597_p9 = pneg %p8596_p6 }
 0x2c4   : > { %p8604_p11 = pnand %p8603_p8, %p8597_p9 }
 0x2c6   : > { %8607 = shalt.err (!%p8604_p11)
}
 0x2c7   : > { %7321 = dma.hbm_to_vmem [thread:$0]  (!%p9098_p12), %s9029_s24, 16, %s1285_s29, [#allocation40]  }
 0x2c8   : > { %p10471_p13 = scmp.ne.s32.totalorder %s10452_s11, 0 }
 0x2c9   : > { %p10472_p1 = scmp.eq.s32.totalorder (!%p10471_p13), %s9062_s22, 0 }
 0x2ca   : > { %1333 = sbr.rel (%p10471_p13) target bundleno = 9892 (0x26a4), region = 168 }
 0x2d1   : > { %8681 = dma.done.wait (%p10472_p1), [#allocation4], 128   ;;  %p10473_p2 = pmov %p10472_p1 }
 0x2d2   : > { %p10474_p0 = pmov %p10472_p1 }
 0x2d3   : > { %8683 = vsyncadd (%p10473_p2), [#allocation4], 4294967168 }
 0x2d4   : > { %8685 = dma.done.wait (%p10474_p0), [#allocation7], 32   ;;  %p10475_p3 = pmov %p10474_p0 }
 0x2d5   : > { %p10476_p4 = pmov %p10474_p0 }
 0x2d6   : > { %8687 = vsyncadd (%p10475_p3), [#allocation7], 4294967264 }
 0x2d7   : > { %8689 = dma.done.wait (%p10476_p4), [#allocation10], 528   ;;  %p10477_p12 = pmov %p10474_p0 }
 0x2d8   : > { %p10478_p5 = pmov %p10474_p0 }
 0x2d9   : > { %8691 = vsyncadd (%p10477_p12), [#allocation10], 4294966768 }
 0x2da   : > { %8693 = dma.done.wait (%p10478_p5), [#allocation13], 144   ;;  %p10479_p6 = pmov %p10474_p0 }
 0x2db   : > { %p10480_p9 = pmov %p10474_p0 }
 0x2dc   : > { %8695 = vsyncadd (%p10479_p6), [#allocation13], 4294967152 }
 0x2dd   : > { %8697 = dma.done.wait (%p10480_p9), [#allocation16], 32   ;;  %p10481_p10 = pmov %p10474_p0 }
 0x2de   : > { %p10482_p7 = pmov %p10474_p0 }
 0x2df   : > { %8699 = vsyncadd (%p10481_p10), [#allocation16], 4294967264 }
 0x2e0   : > { %8701 = dma.done.wait (%p10482_p7), [#allocation19], 112   ;;  %p10483_p8 = pmov %p10474_p0 }
 0x2e1   : > { %p10484_p11 = pmov %p10474_p0 }
 0x2e2   : > { %8703 = vsyncadd (%p10483_p8), [#allocation19], 4294967184 }
 0x2e3   : > { %8705 = dma.done.wait (%p10484_p11), [#allocation22], 64   ;;  %p10485_p13 = pmov %p10474_p0 }
 0x2e4   : > { %p10486_p1 = pmov %p10474_p0 }
 0x2e5   : > { %8707 = vsyncadd (%p10485_p13), [#allocation22], 4294967232 }
 0x2e6   : > { %8709 = dma.done.wait (%p10486_p1), [#allocation25], 96   ;;  %p10487_p2 = pmov %p10474_p0 }
 0x2e8   : > { %8711 = vsyncadd (%p10487_p2), [#allocation25], 4294967200 }
 0x2e9   : > { %8713 = dma.done.wait (%p10474_p0), [#allocation28], 64   ;;  %p10488_p3 = pmov %p10474_p0 }
 0x2ea   : > { %p10489_p4 = pmov %p10474_p0 }
 0x2eb   : > { %8715 = vsyncadd (%p10488_p3), [#allocation28], 4294967232 }
 0x2ec   : > { %8717 = dma.done.wait (%p10489_p4), [#allocation31], 48   ;;  %p10490_p12 = pmov %p10474_p0 }
 0x2ed   : > { %p10491_p5 = pmov %p10474_p0 }
 0x2ee   : > { %8719 = vsyncadd (%p10490_p12), [#allocation31], 4294967248 }
 0x2ef   : > { %8721 = dma.done.wait (%p10491_p5), [#allocation34], 1040   ;;  %p10492_p6 = pmov %p10474_p0 }
 0x2f0   : > { %p10493_p9 = pmov %p10474_p0 }
 0x2f1   : > { %8723 = vsyncadd (%p10492_p6), [#allocation34], 4294966256 }
 0x2f2   : > { %8725 = dma.done.wait (%p10493_p9), [#allocation37], 32   ;;  %p10494_p10 = pmov %p10474_p0 }
 0x2f3   : > { %p10495_p7 = pmov %p10474_p0 }
 0x2f4   : > { %8727 = vsyncadd (%p10494_p10), [#allocation37], 4294967264 }
 0x2f5   : > { %8729 = dma.done.wait (%p10495_p7), [#allocation40], 32   ;;  %p10496_p8 = pmov %p10474_p0 }
 0x2f6   : > { %s10497_s16 = sld [smem:[#allocation61_spill]]  ;;  %p1543_p11 = scmp.lt.s32.totalorder %s9062_s22, 1  ;;  %v8827_v0 = vmov 1   ;;  %v8828_v1 = vmov 0.0   ;;  %v8829_v2 = vmov 0   ;;  %vm8830_vm0 = vmmov 0  }
 0x2f7   : > { %8731 = vsyncadd (%p10496_p8), [#allocation40], 4294967264  ;;  %7496 = vset.pattern.permute.xlu1 %v8827_v0  ;;  %6826 = vmatprep.subr.bf16.mxu1 %v8828_v1  ;;  %s10498_s23 = sld [smem:[#allocation62_spill]]  ;;  %v7508_v4 = vld [vmem:[#allocation11] sm:$0xff]   ;;  %v7509_v6 = vld [vmem:[#allocation11 + $0x8] sm:$0xff]   ;;  %v8831_v8 = vmov 2   ;;  %v1589_v15 = vlaneseq }
 0x2f8   : > { %s9509_s11 = scalar_select %p1543_p11, %s9062_s22, 1  ;;  %7495 = vset.pattern.permute.xlu0 %v8829_v2  ;;  %6834 = vmatprep.mubr.msk.bf16.mxu1 %vm8830_vm0, %v8828_v1  ;;  %v7510_v7 = vld [vmem:[#allocation11 + $0x10] sm:$0xff]   ;;  %v7511_v9 = vld [vmem:[#allocation11 + $0x18] sm:$0xff]   ;;  %vm1743_vm1 = vcmask 523264   ;;  %v8832_v11 = vmov 3   ;;  %v8833_v14 = vmov 4  }
 0x2f9   : > { %6827 = vmatpush3.bf16.msra.mxu1 %v7508_v4  ;;  %s10499_s12 = sld [smem:[#allocation63_spill]]  ;;  %s10500_s10 = sld [smem:[#allocation60_spill]]  ;;  %v9526_v16 = vshrl.u32 %v1589_v15, 7  ;;  %v1578_v18 = vld [vmem:[#allocation3] sm:$0x1f]  ;;  %vm2173_vm2 = vcmask 261120  }
 0x2fa   : > { %s6622_s5 = sshll.u32 %s9509_s11, 4  ;;  %6828 = vmatprep.subr.bf16.mxu1 %v8828_v1  ;;  %s6298_s6 = sshll.u32 %s9509_s11, 3  ;;  %v6300_v22 = vld [vmem:[#allocation6] ss:$0 sm:$0xff]  ;;  %v6303_v4 = vld [vmem:[#allocation12] ss:$0 sm:$0xff] }
 0x2fb   : > { %v9529_v17 = vsub.s32 0, %v9526_v16  ;;  %v9535_v19 = vsub.s32 1, %v9526_v16  ;;  %v9539_v25 = vsub.s32 2, %v9526_v16  ;;  %v1639_v37 = vsub.s32 3, %v9526_v16  ;;  %s10501_s17 = sld [smem:[#allocation73_spill]]  ;;  %p10509_p1 = scmp.ne.s32.totalorder %s10449_s7, 0 }
 0x2fc   : > { %s1552_s1 = scalar_lea.vmem %s10497_s16, %s6622_s5  ;;  %v1655_v45 = vsub.s32 4, %v9526_v16  ;;  %s8834_s16 = smov 96   ;;  %vm2534_vm3 = vcmask 523520   ;;  %vm2723_vm4 = vcmask 785920   ;;  %vm2912_vm5 = vcmask 1048320  }
 0x2fd   : > { %v1576_v3 = vld [vmem:[%s1552_s1] sm:$0xff]  ;;  %v1577_v5 = vld [vmem:[%s1552_s1 + $0x8] sm:$0xff]  ;;  %6829 = vmatpush3.bf16.msra.mxu1 %v7509_v6  ;;  %s1556_s15 = scalar_lea.vmem %s10498_s23, %s6298_s6  ;;  %v1592_v20 = vrot.slane %v1578_v18, %v9529_v17  ;;  %v1608_v26 = vrot.slane %v1578_v18, %v9535_v19  ;;  %v1624_v32 = vrot.slane %v1578_v18, %v9539_v25  ;;  %v1640_v44 = vrot.slane %v1578_v18, %v1639_v37  ;;  %s10502_s23 = sld [smem:[#allocation64_spill]] }
 0x2fe   : > { %1598 = vperm.xlu1 %7496, %v1576_v3   ;;  %1581 = vperm.xlu0 %7495, %v1576_v3   ;;  %v1702_v10 = vld [vmem:[%s1556_s15] sm:$0xff]  ;;  %v1656_v52 = vrot.slane %v1578_v18, %v1655_v45  ;;  %s8836_s1 = smov 32   ;;  %s10504_s15 = sld [smem:[#allocation78_spill]]  ;;  %vm5507_vm6 = vcmask 8192  }
 0x2ff   : > { %6830 = vmatprep.subr.bf16.mxu1 %v8828_v1  ;;  %v1703_v12 = vpack.c.bf16 %v1702_v10, %v1702_v10  ;;  %s1560_s29 = scalar_lea.vmem %s10499_s12, %s6298_s6  ;;  %s1547_s19 = scalar_lea.vmem %s10500_s10, %s6622_s5 }
 0x300   : > { %v1795_v13 = vld [vmem:[%s1560_s29] sm:$0xff]  ;;  %v1566_v29 = vld [vmem:[%s1547_s19 + $0x8] sm:$0xff]  ;;  %s10503_s6 = sld [smem:[#allocation75_spill]]  ;;  %s10506_s29 = sld [smem:[#allocation80_spill]] }
 0x301   : > { %6831 = vmatpush3.bf16.msra.mxu1 %v7510_v7  ;;  %v1565_v21 = vld [vmem:[%s1547_s19] sm:$0xff]  ;;  %v1575_v35 = vadd.f32 %v6300_v22, %v1566_v29  ;;  %v6309_v7 = vld [vmem:[#allocation15] ss:$0 sm:$0xff]  ;;  %s10507_s10 = sld [smem:[#allocation84_spill]]  ;;  %s10508_s19 = sld [smem:[#allocation86_spill]] }
 0x302   : > { %1602 = vperm.xlu1 %7496, %v1577_v5   ;;  %1586 = vperm.xlu0 %7495, %v1577_v5   ;;  %v1574_v27 = vadd.f32 %v6300_v22, %v1565_v21  ;;  %s8837_s3 = smov [#allocation42]  }
 0x303   : > { %6832 = vmatprep.subr.bf16.mxu1 %v8828_v1  ;;  %s1563_s5 = scalar_lea.vmem %s10502_s23, %s9509_s11  ;;  %s8835_s11 = smov 64  }
 0x304   : > { %s10505_s12 = smov %s10504_s15 }
 0x305   : > { %6833 = vmatpush3.bf16.msra.mxu1 %v7511_v9 }
 0x306   : > { %7498 = vset.pattern.permute.xlu1 %v8831_v8  ;;  %7497 = vset.pattern.permute.xlu0 %v8831_v8 }
 0x307   : > { %1618 = vperm.xlu1 %7498, %v1577_v5   ;;  %1614 = vperm.xlu0 %7497, %v1576_v3  }
 0x308   : > { %6835 = vmatmul.mubr.msk.bf16.vlgmr.msra.gmra.mrb[0].mxu1 %vm1743_vm1, %v1703_v12 }
 0x309   : > { %2089 = vmatprep.mubr.bf16.mxu1 %v8829_v2 }
 0x30b   : > { %7499 = vset.pattern.permute.xlu1 %v8832_v11  ;;  %7500 = vset.pattern.permute.xlu0 %v8832_v11 }
 0x30c   : > { %1630 = vperm.xlu1 %7499, %v1576_v3   ;;  %1634 = vperm.xlu0 %7500, %v1577_v5  }
 0x310   : > { %7501 = vset.pattern.permute.xlu1 %v8833_v14  ;;  %7502 = vset.pattern.permute.xlu0 %v8829_v2 }
 0x311   : > { %1646 = vperm.xlu1 %7501, %v1576_v3   ;;  %1799 = vperm.xlu0 %7502, %v1795_v13  }
 0x315   : > { %1650 = vperm.xlu1 %7501, %v1577_v5   ;;  %7505 = vset.pattern.permute.xlu0 %v8832_v11 }
 0x316   : > { %1829 = vperm.xlu0 %7505, %v1795_v13  }
 0x319   : > { %7503 = vset.pattern.permute.xlu1 %v8827_v0  ;;  %v1796_v0 = vld [vmem:[#allocation14] sm:$0x1f] }
 0x31a   : > { %1809 = vperm.xlu1 %7503, %v1795_v13   ;;  %7507 = vset.pattern.permute.xlu0 %v8833_v14  ;;  %v1805_v3 = vrot.slane %v1796_v0, %v9529_v17  ;;  %v1815_v10 = vrot.slane %v1796_v0, %v9535_v19  ;;  %v1835_v18 = vrot.slane %v1796_v0, %v1639_v37 }
 0x31e   : > { %7504 = vset.pattern.permute.xlu1 %v8831_v8 }
 0x31f   : > { %1819 = vperm.xlu1 %7504, %v1795_v13  }
 0x323   : > { %7506 = vset.pattern.permute.xlu1 %v8833_v14 }
 0x324   : > { %1839 = vperm.xlu1 %7506, %v1795_v13   ;;  %v1825_v13 = vrot.slane %v1796_v0, %v9539_v25 }
 0x37d   : > { %v1599_v23 = vpop.permute.xlu1 %1598  ;;  %v1582_v24 = vpop.permute.xlu0 %1581 }
 0x37e   : > { %v1593_v28 = vmul.f32 %v1592_v20, %v1582_v24  ;;  %v1609_v33 = vmul.f32 %v1608_v26, %v1599_v23  ;;  %v1845_v24 = vrot.slane %v1796_v0, %v1655_v45  ;;  %v7520_v45 = vld [vmem:[%s10501_s17 + $0x34] ss:$12 sps:$4 sm:$0xff]   ;;  %v7539_v0 = vld [vmem:[%s10501_s17 + $0x50] ss:$12 sps:$4 sm:$0xff]  }
 0x380   : > { %v1595_v34 = vadd.f32 %v1593_v28, %v1574_v27 }
 0x381   : > { %v1603_v30 = vpop.permute.xlu1 %1602  ;;  %v1587_v31 = vpop.permute.xlu0 %1586 }
 0x382   : > { %v1594_v36 = vmul.f32 %v1592_v20, %v1587_v31  ;;  %v1610_v40 = vmul.f32 %v1608_v26, %v1603_v30  ;;  %v1611_v42 = vadd.f32 %v1609_v33, %v1595_v34  ;;  %v7512_v33 = vld [vmem:[%s10501_s17] ss:$12 sps:$4 sm:$0xff]   ;;  %v7514_v34 = vld [vmem:[%s10501_s17 + $0x4] ss:$12 sps:$4 sm:$0xff]  }
 0x383   : > { %2057 = vmatprep.subr.bf16.mxu1 %v7514_v34 }
 0x384   : > { %v1596_v41 = vadd.f32 %v1594_v36, %v1575_v35  ;;  %v7517_v35 = vld [vmem:[%s10501_s17 + $0x1c] ss:$12 sps:$4 sm:$0xff]   ;;  %2058 = vmatpush1.bf16.msra.mxu1 %v7512_v33  ;;  %v7515_v36 = vld [vmem:[%s10501_s17 + $0x18] ss:$12 sps:$4 sm:$0xff]   ;;  %v6311_v33 = vld [vmem:[#allocation18] ss:$0 sm:$0xff] }
 0x385   : > { %2059 = vmatprep.subr.bf16.mxu1 %v7517_v35 }
 0x386   : > { %v1619_v38 = vpop.permute.xlu1 %1618  ;;  %v1615_v39 = vpop.permute.xlu0 %1614  ;;  %v1612_v47 = vadd.f32 %v1610_v40, %v1596_v41 }
 0x387   : > { %v1625_v43 = vmul.f32 %v1624_v32, %v1615_v39  ;;  %v1626_v46 = vmul.f32 %v1624_v32, %v1619_v38 }
 0x388   : > { %2060 = vmatpush1.bf16.msra.mxu1 %v7515_v36 }
 0x389   : > { %v1627_v49 = vadd.f32 %v1625_v43, %v1611_v42  ;;  %v1628_v55 = vadd.f32 %v1626_v46, %v1612_v47  ;;  %v7518_v46 = vld [vmem:[%s10501_s17 + $0x30] ss:$12 sps:$4 sm:$0xff]   ;;  %2061 = vmatprep.subr.bf16.mxu1 %v7520_v45  ;;  %v7523_v47 = vld [vmem:[%s10501_s17 + $0x4c] ss:$12 sps:$4 sm:$0xff]  }
 0x38b   : > { %v1631_v48 = vpop.permute.xlu1 %1630  ;;  %v1635_v51 = vpop.permute.xlu0 %1634 }
 0x38c   : > { %v1641_v50 = vmul.f32 %v1640_v44, %v1631_v48  ;;  %v1642_v53 = vmul.f32 %v1640_v44, %v1635_v51  ;;  %2062 = vmatpush1.bf16.msra.mxu1 %v7518_v46  ;;  %v7521_v48 = vld [vmem:[%s10501_s17 + $0x48] ss:$12 sps:$4 sm:$0xff]  }
 0x38d   : > { %2063 = vmatprep.subr.bf16.mxu1 %v7523_v47  ;;  %v7529_v51 = vld [vmem:[%s10501_s17 + $0x7c] ss:$12 sps:$4 sm:$0xff]  }
 0x38e   : > { %v1643_v54 = vadd.f32 %v1641_v50, %v1627_v49  ;;  %v1644_v59 = vadd.f32 %v1642_v53, %v1628_v55  ;;  %v7526_v49 = vld [vmem:[%s10501_s17 + $0x64] ss:$12 sps:$4 sm:$0xff]   ;;  %v7524_v50 = vld [vmem:[%s10501_s17 + $0x60] ss:$12 sps:$4 sm:$0xff]  }
 0x38f   : > { %v7532_v53 = vld [vmem:[%s10501_s17 + $0x94] ss:$12 sps:$4 sm:$0xff]   ;;  %v7535_v55 = vld [vmem:[%s10501_s17 + $0xac] ss:$12 sps:$4 sm:$0xff]  }
 0x390   : > { %v1647_v56 = vpop.permute.xlu1 %1646  ;;  %v1800_v5 = vpop.permute.xlu0 %1799  ;;  %2064 = vmatpush1.bf16.msra.mxu1 %v7521_v48 }
 0x391   : > { %v1657_v57 = vmul.f32 %v1656_v52, %v1647_v56  ;;  %v1806_v12 = vmul.f32 %v1805_v3, %v1800_v5  ;;  %2065 = vmatprep.subr.bf16.mxu1 %v7526_v49  ;;  %v7533_v56 = vld [vmem:[%s10501_s17 + $0xa8] ss:$12 sps:$4 sm:$0xff]   ;;  %v7542_v5 = vld [vmem:[%s10501_s17 + $0x98] ss:$12 sps:$4 sm:$0xff]  }
 0x392   : > { %v7540_v3 = vld [vmem:[%s10501_s17 + $0x68] ss:$12 sps:$4 sm:$0xff]  }
 0x393   : > { %v1659_v58 = vadd.f32 %v1657_v57, %v1643_v54  ;;  %v7530_v54 = vld [vmem:[%s10501_s17 + $0x90] ss:$12 sps:$4 sm:$0xff]   ;;  %v7536_v57 = vld [vmem:[%s10501_s17 + $0x8] ss:$12 sps:$4 sm:$0xff]  }
 0x394   : > { %v1651_v60 = vpop.permute.xlu1 %1650  ;;  %2066 = vmatpush1.bf16.msra.mxu1 %v7524_v50  ;;  %6838 = vmatprep.subr.bf16.mxu0 %v7536_v57 }
 0x395   : > { %v1658_v61 = vmul.f32 %v1656_v52, %v1651_v60  ;;  %1663 = vadd.xlane.f32.xlu1 %v1659_v58  ;;  %v1830_v20 = vpop.permute.xlu0 %1829  ;;  %v7527_v52 = vld [vmem:[%s10501_s17 + $0x78] ss:$12 sps:$4 sm:$0xff]   ;;  %2067 = vmatprep.subr.bf16.mxu1 %v7529_v51 }
 0x396   : > { %v1836_v28 = vmul.f32 %v1835_v18, %v1830_v20  ;;  %6839 = vmatpush3.bf16.msra.mxu0 %v7536_v57 }
 0x397   : > { %v1660_v62 = vadd.f32 %v1658_v61, %v1644_v59  ;;  %v7538_v59 = vld [vmem:[%s10501_s17 + $0x38] ss:$12 sps:$4 sm:$0xff]  }
 0x398   : > { %2068 = vmatpush1.bf16.msra.mxu1 %v7527_v52 }
 0x399   : > { %1665 = vadd.xlane.f32.xlu0 %v1660_v62  ;;  %v1810_v63 = vpop.permute.xlu1 %1809  ;;  %2069 = vmatprep.subr.bf16.mxu1 %v7532_v53 }
 0x39a   : > { %v1816_v21 = vmul.f32 %v1815_v10, %v1810_v63 }
 0x39c   : > { %2070 = vmatpush1.bf16.msra.mxu1 %v7530_v54 }
 0x39d   : > { %2071 = vmatprep.subr.bf16.mxu1 %v7535_v55 }
 0x39e   : > { %v1820_v8 = vpop.permute.xlu1 %1819 }
 0x39f   : > { %v1826_v23 = vmul.f32 %v1825_v13, %v1820_v8 }
 0x3a0   : > { %2072 = vmatpush1.bf16.msra.mxu1 %v7533_v56 }
 0x3a3   : > { %v1840_v26 = vpop.permute.xlu1 %1839 }
 0x3a4   : > { %v1846_v30 = vmul.f32 %v1845_v24, %v1840_v26 }
 0x3db   : > { %v1781_v6 = vpop.f32.mrb[0].mxu1 }
 0x3dc   : > { %v1782_v9 = vadd.f32 %v6303_v4, %v1781_v6  ;;  %v6836_v11 = vpop.f32.mrb[1].mxu1  ;;  %v7541_v4 = vld [vmem:[%s10501_s17 + $0x80] ss:$12 sps:$4 sm:$0xff]   ;;  %v7543_v6 = vld [vmem:[%s10501_s17 + $0xb0] ss:$12 sps:$4 sm:$0xff]  }
 0x3dd   : > { %v1784_v14 = vpop.f32.mrb[2].mxu1 }
 0x3de   : > { %v1794_v15 = vadd.f32 %v6309_v7, %v1782_v9  ;;  %v6837_v16 = vpop.f32.mrb[3].mxu1 }
 0x3e0   : > { %v1807_v22 = vadd.f32 %v1806_v12, %v1794_v15  ;;  %v6301_v15 = vld [vmem:[#allocation8] ss:$0 sm:$0xff] }
 0x3e2   : > { %v1817_v27 = vadd.f32 %v1816_v21, %v1807_v22  ;;  %v6302_v21 = vld [vmem:[#allocation9] ss:$0 sm:$0xff] }
 0x3e4   : > { %v1827_v29 = vadd.f32 %v1826_v23, %v1817_v27 }
 0x3e6   : > { %v1837_v31 = vadd.f32 %v1836_v28, %v1827_v29 }
 0x3e8   : > { %v1847_v32 = vadd.f32 %v1846_v30, %v1837_v31  ;;  %v6310_v31 = vld [vmem:[#allocation17] ss:$0 sm:$0xff] }
 0x3ea   : > { %1850 = vadd.xlane.f32.xlu0 %v1847_v32 }
 0x422   : > { %v1664_v37 = vpop.xlane.xlu1 %1663 }
 0x423   : > { %v1668_v38 = vmul.f32 0.0078125, %v1664_v37  ;;  %v1912_v37 = vld [vmem:[#allocation20] sm:$0x7] }
 0x424   : > { %v1925_v53 = vrot.slane %v1912_v37, %v9539_v25 }
 0x425   : > { %v9552_v39 = vsub.f32 %v1659_v58, %v1668_v38  ;;  %v7537_v58 = vld [vmem:[%s10501_s17 + $0x20] ss:$12 sps:$4 sm:$0xff]   ;;  %v1917_v38 = vrot.slane %v1912_v37, %v9529_v17 }
 0x426   : > { %v1666_v40 = vpop.xlane.xlu0 %1665  ;;  %6840 = vmatprep.subr.bf16.mxu0 %v7537_v58 }
 0x427   : > { %v1669_v41 = vmul.f32 0.0078125, %v1666_v40  ;;  %v1672_v42 = vmul.f32 %v9552_v39, %v9552_v39  ;;  %6841 = vmatpush3.bf16.msra.mxu0 %v7537_v58  ;;  %v1921_v40 = vrot.slane %v1912_v37, %v9535_v19 }
 0x428   : > { %6842 = vmatprep.subr.bf16.mxu0 %v7538_v59 }
 0x429   : > { %1674 = vadd.xlane.f32.xlu1 %v1672_v42  ;;  %v9556_v43 = vsub.f32 %v1660_v62, %v1669_v41 }
 0x42b   : > { %v1673_v44 = vmul.f32 %v9556_v43, %v9556_v43  ;;  %6843 = vmatpush3.bf16.msra.mxu0 %v7538_v59 }
 0x42c   : > { %6844 = vmatprep.subr.bf16.mxu0 %v7539_v0 }
 0x42d   : > { %1676 = vadd.xlane.f32.xlu0 %v1673_v44 }
 0x42f   : > { %6845 = vmatpush3.bf16.msra.mxu0 %v7539_v0 }
 0x430   : > { %6846 = vmatprep.subr.bf16.mxu0 %v7540_v3 }
 0x433   : > { %6847 = vmatpush3.bf16.msra.mxu0 %v7540_v3 }
 0x434   : > { %6848 = vmatprep.subr.bf16.mxu0 %v7541_v4 }
 0x437   : > { %6849 = vmatpush3.bf16.msra.mxu0 %v7541_v4 }
 0x438   : > { %6850 = vmatprep.subr.bf16.mxu0 %v7542_v5 }
 0x43b   : > { %6851 = vmatpush3.bf16.msra.mxu0 %v7542_v5 }
 0x43c   : > { %6852 = vmatprep.subr.bf16.mxu0 %v7543_v6 }
 0x43f   : > { %6853 = vmatpush3.bf16.msra.mxu0 %v7543_v6 }
 0x477   : > { %v1851_v60 = vpop.xlane.xlu0 %1850 }
 0x478   : > { %v1852_v61 = vmul.f32 0.0078125, %v1851_v60 }
 0x47a   : > { %v1853_v62 = vsub.f32 %v1847_v32, %v1852_v61 }
 0x47c   : > { %v1854_v63 = vmul.f32 %v1853_v62, %v1853_v62 }
 0x47e   : > { %1855 = vadd.xlane.f32.xlu1 %v1854_v63 }
 0x4b6   : > { %v1675_v7 = vpop.xlane.xlu1 %1674 }
 0x4b7   : > { %v1678_v8 = vmul.f32 0.0078125, %v1675_v7 }
 0x4b9   : > { %v1680_v9 = vadd.f32 1e-12, %v1678_v8 }
 0x4ba   : > { %v1677_v10 = vpop.xlane.xlu0 %1676 }
 0x4bb   : > { %7704 = vrsqrt.f32 %v1680_v9  ;;  %v1679_v11 = vmul.f32 0.0078125, %v1677_v10 }
 0x4bd   : > { %v1681_v12 = vadd.f32 1e-12, %v1679_v11 }
 0x4bf   : > { %7706 = vrsqrt.f32 %v1681_v12 }
 0x4c5   : > { %v7705_v13 = vpop.eup %7704 }
 0x4c6   : > { %v1684_v14 = vmul.f32 %v7705_v13, %v9552_v39 }
 0x4c8   : > { %v1692_v20 = vmul.f32 %v6301_v15, %v1684_v14 }
 0x4c9   : > { %v7707_v16 = vpop.eup %7706 }
 0x4ca   : > { %v1685_v18 = vmul.f32 %v7707_v16, %v9556_v43  ;;  %v9582_v23 = vadd.f32 %v6302_v21, %v1692_v20 }
 0x4cc   : > { %v1693_v22 = vmul.f32 %v6301_v15, %v1685_v18 }
 0x4ce   : > { %v9584_v24 = vadd.f32 %v6302_v21, %v1693_v22 }
 0x4d0   : > { %v1878_v26 = vpack.c.bf16 %v9584_v24, %v9582_v23 }
 0x4d2   : > { %2090 = vmatmul.mubr.bf16.vlgmr.msra.gmra.mrb[4].mxu1 %v1878_v26  ;;  %6854 = vmatprep.mubr.bf16.mxu0 %v1878_v26  ;;  %v1875_v26 = vld [vmem:[%s1563_s5] sm:$0x1]  ;;  %s6617_s5 = sshll.u32 %s9062_s22, 4 }
 0x4d3   : > { %2099 = vmatprep.mubr.bf16.mxu1 %v8829_v2 }
 0x50b   : > { %v1856_v27 = vpop.xlane.xlu1 %1855 }
 0x50c   : > { %v1857_v28 = vmul.f32 0.0078125, %v1856_v27  ;;  %v1876_v27 = vsub.f32 1.0, %v1875_v26 }
 0x50e   : > { %v1858_v29 = vadd.f32 1e-12, %v1857_v28  ;;  %v1877_v28 = vmul.f32 -10000.0, %v1876_v27 }
 0x510   : > { %7708 = vrsqrt.f32 %v1858_v29  ;;  %v9641_v29 = vrot.slane %v1877_v28, %v9529_v17 }
 0x51a   : > { %v7709_v30 = vpop.eup %7708 }
 0x51b   : > { %v1860_v32 = vmul.f32 %v7709_v30, %v1853_v62 }
 0x51d   : > { %v1867_v34 = vmul.f32 %v6310_v31, %v1860_v32 }
 0x51f   : > { %v9589_v35 = vadd.f32 %v6311_v33, %v1867_v34 }
 0x521   : > { %v1879_v36 = vpack.c.bf16 %v8828_v1, %v9589_v35 }
 0x523   : > { %2100 = vmatmul.mubr.bf16.gmra.mrb[8].mxu1 %v1879_v36  ;;  %6855 = vmatmul.mubr.bf16.vlgmr.msra.gmra.mrb[0].mxu0 %v1879_v36 }
 0x5a5   : > { %v2091_v39 = vpop.f32.mrb[4].mxu1 }
 0x5a6   : > { %v2092_v41 = vadd.f32 %v2091_v39, %v1917_v38  ;;  %v2093_v42 = vpop.f32.mrb[5].mxu1 }
 0x5a7   : > { %v2095_v43 = vpop.f32.mrb[6].mxu1  ;;  %v2094_v46 = vadd.f32 %v2093_v42, %v1921_v40 }
 0x5a8   : > { %v2096_v44 = vadd.f32 %v2095_v43, %v1917_v38  ;;  %v2097_v45 = vpop.f32.mrb[7].mxu1  ;;  %v2159_v48 = vmul.f32 0.17677669, %v2092_v41 }
 0x5a9   : > { %v2098_v47 = vadd.f32 %v2097_v45, %v1921_v40 }
 0x5aa   : > { %v2160_v49 = vmul.f32 0.17677669, %v2096_v44 }
 0x5ab   : > { %v9595_v50 = vpack.c.bf16 %v2098_v47, %v2094_v46 }
 0x5ac   : > { %v9597_v51 = vpack.c.bf16 %v2160_v49, %v2159_v48 }
 0x5ad   : > { %2350 = vrot.lane.b32.xlu0 %v9595_v50, %s8834_s16  ;;  %7126 = vmatprep.subr.msk.bf16.mxu1 %vm2173_vm2, %v9595_v50  ;;  %v2181_v52 = vsel %vm2173_vm2, %v9595_v50, 0 }
 0x5ae   : > { %6859 = vmatpush3.bf16.xpose.msra.mxu1 %v2181_v52  ;;  %6862 = vmatprep.mubr.msk.bf16.mxu1 %vm2173_vm2, %v9597_v51 }
 0x5f6   : > { %v2101_v54 = vpop.f32.mrb[8].mxu1  ;;  %v6856_v55 = vpop.f32.mrb[0].mxu0 }
 0x5f7   : > { %v2102_v56 = vadd.f32 %v2101_v54, %v1917_v38  ;;  %v2103_v57 = vpop.f32.mrb[9].mxu1  ;;  %v2144_v58 = vpop.f32.mrb[1].mxu0  ;;  %v2153_v61 = vadd.f32 %v6856_v55, %v1925_v53 }
 0x5f8   : > { %v2105_v59 = vpop.f32.mrb[10].mxu1  ;;  %v6857_v60 = vpop.f32.mrb[2].mxu0  ;;  %v2104_v4 = vadd.f32 %v2103_v57, %v1921_v40  ;;  %v2145_v5 = vadd.f32 %v2144_v58, %v1925_v53 }
 0x5f9   : > { %v2106_v62 = vadd.f32 %v2105_v59, %v1917_v38  ;;  %v2156_v63 = vadd.f32 %v6857_v60, %v1925_v53  ;;  %v2107_v0 = vpop.f32.mrb[11].mxu1  ;;  %v2147_v3 = vpop.f32.mrb[3].mxu0  ;;  %v2161_v8 = vmul.f32 0.17677669, %v2102_v56 }
 0x5fa   : > { %v2108_v6 = vadd.f32 %v2107_v0, %v1921_v40  ;;  %v2148_v7 = vadd.f32 %v2147_v3, %v1925_v53 }
 0x5fb   : > { %v2162_v9 = vmul.f32 0.17677669, %v2106_v62  ;;  %v9608_v10 = vpack.c.bf16 %v2156_v63, %v2153_v61 }
 0x5fc   : > { %v9610_v11 = vpack.c.bf16 %v2108_v6, %v2104_v4  ;;  %v9612_v12 = vpack.c.bf16 %v2148_v7, %v2145_v5 }
 0x5fd   : > { %v9614_v13 = vpack.c.bf16 %v2162_v9, %v2161_v8 }
 0x5fe   : > { %6866 = vmatprep.subr.bf16.mxu0 %v9612_v12  ;;  %2352 = vrot.lane.b32.xlu1 %v9610_v11, %s8834_s16  ;;  %v2184_v14 = vsel %vm2173_vm2, %v9610_v11, 0 }
 0x5ff   : > { %7127 = vmatprep.subr.msk.bf16.mxu1 %vm2173_vm2, %v9610_v11  ;;  %6867 = vmatpush3.bf16.msra.mxu0 %v9612_v12 }
 0x600   : > { %6861 = vmatpush3.bf16.xpose.msra.mxu1 %v2184_v14  ;;  %2346 = vrot.lane.b32.xlu0 %v9614_v13, %s8834_s16 }
 0x601   : > { %6868 = vmatprep.subr.bf16.mxu0 %v9608_v10 }
 0x602   : > { %2344 = vrot.lane.b32.xlu1 %v9597_v51, %s8834_s16 }
 0x603   : > { %6869 = vmatpush3.bf16.msra.mxu0 %v9608_v10 }
 0x607   : > { %6863 = vmatmul.mubr.msk.bf16.vlgmr.msra.gmra.mrb[12].mxu1 %vm2173_vm2, %v9614_v13 }
 0x61f   : > { %v2351_v15 = vpop.permute.xlu0 %2350 }
 0x620   : > { %7128 = vmatprep.subr.msk.bf16.mxu1 %vm2173_vm2, %v2351_v15  ;;  %v2361_v16 = vsel %vm2173_vm2, %v2351_v15, 0 }
 0x621   : > { %6875 = vmatpush3.bf16.xpose.msra.mxu1 %v2361_v16 }
 0x670   : > { %v2353_v18 = vpop.permute.xlu1 %2352 }
 0x671   : > { %7129 = vmatprep.subr.msk.bf16.mxu1 %vm2173_vm2, %v2353_v18  ;;  %v2364_v20 = vsel %vm2173_vm2, %v2353_v18, 0 }
 0x672   : > { %6877 = vmatpush3.bf16.xpose.msra.mxu1 %v2364_v20  ;;  %v2347_v22 = vpop.permute.xlu0 %2346 }
 0x674   : > { %v2345_v21 = vpop.permute.xlu1 %2344 }
 0x675   : > { %6878 = vmatprep.mubr.msk.bf16.mxu1 %vm2173_vm2, %v2345_v21 }
 0x679   : > { %6879 = vmatmul.mubr.msk.bf16.vlgmr.msra.gmra.mrb[16].mxu1 %vm2173_vm2, %v2347_v22 }
 0x6da   : > { %v6864_v30 = vpop.f32.mrb[12].mxu1 }
 0x6db   : > { %v2220_v31 = vpop.f32.mrb[13].mxu1  ;;  %v2229_v39 = vadd.f32 %v6864_v30, %v9641_v29 }
 0x6dc   : > { %v2221_v32 = vadd.f32 %v2220_v31, %v9641_v29  ;;  %v6865_v33 = vpop.f32.mrb[14].mxu1 }
 0x6dd   : > { %v2223_v34 = vpop.f32.mrb[15].mxu1  ;;  %v2232_v36 = vadd.f32 %v6865_v33, %v9641_v29  ;;  %v2241_v42 = vsel %vm2173_vm2, %v2229_v39, -inf }
 0x6de   : > { %v2224_v37 = vadd.f32 %v2223_v34, %v9641_v29  ;;  %v2235_v38 = vsel %vm2173_vm2, %v2221_v32, -inf }
 0x6df   : > { %2236 = vmax.xlane.f32.xlu1 %v2235_v38  ;;  %v2244_v41 = vsel %vm2173_vm2, %v2232_v36, -inf }
 0x6e0   : > { %v2238_v40 = vsel %vm2173_vm2, %v2224_v37, -inf }
 0x6e1   : > { %2239 = vmax.xlane.f32.xlu0 %v2238_v40 }
 0x6e3   : > { %2245 = vmax.xlane.f32.xlu1 %v2244_v41 }
 0x6e5   : > { %2242 = vmax.xlane.f32.xlu0 %v2241_v42 }
 0x74c   : > { %v6880_v43 = vpop.f32.mrb[16].mxu1 }
 0x74d   : > { %v2400_v44 = vpop.f32.mrb[17].mxu1  ;;  %v2409_v48 = vadd.f32 %v6880_v43, %v9641_v29 }
 0x74e   : > { %v2401_v45 = vadd.f32 %v2400_v44, %v9641_v29  ;;  %v6881_v46 = vpop.f32.mrb[18].mxu1 }
 0x74f   : > { %v2403_v47 = vpop.f32.mrb[19].mxu1  ;;  %v2412_v53 = vadd.f32 %v6881_v46, %v9641_v29  ;;  %v2421_v55 = vsel %vm2173_vm2, %v2409_v48, -inf }
 0x750   : > { %v2404_v49 = vadd.f32 %v2403_v47, %v9641_v29  ;;  %v2415_v52 = vsel %vm2173_vm2, %v2401_v45, -inf }
 0x751   : > { %2416 = vmax.xlane.f32.xlu0 %v2415_v52  ;;  %v2424_v56 = vsel %vm2173_vm2, %v2412_v53, -inf }
 0x752   : > { %v2418_v54 = vsel %vm2173_vm2, %v2404_v49, -inf }
 0x753   : > { %2419 = vmax.xlane.f32.xlu1 %v2418_v54 }
 0x755   : > { %2422 = vmax.xlane.f32.xlu0 %v2421_v55 }
 0x757   : > { %2425 = vmax.xlane.f32.xlu1 %v2424_v56 }
 0x76c   : > { %v2237_v57 = vpop.xlane.xlu1 %2236 }
 0x76d   : > { %v2247_v61 = vsub.f32 %v2221_v32, %v2237_v57 }
 0x76e   : > { %v2240_v58 = vpop.xlane.xlu0 %2239 }
 0x76f   : > { %v2248_v59 = vsub.f32 %v2224_v37, %v2240_v58  ;;  %v2251_v5 = vmul.f32 1.442695, %v2247_v61 }
 0x770   : > { %v2246_v60 = vpop.xlane.xlu1 %2245 }
 0x771   : > { %v2250_v62 = vsub.f32 %v2232_v36, %v2246_v60  ;;  %v2253_v63 = vmul.f32 1.442695, %v2248_v59 }
 0x772   : > { %v2243_v0 = vpop.xlane.xlu0 %2242 }
 0x773   : > { %v2257_v3 = vmul.f32 1.442695, %v2250_v62  ;;  %v2249_v4 = vsub.f32 %v2229_v39, %v2243_v0 }
 0x775   : > { %7710 = vpow2.f32 %v2257_v3  ;;  %v2255_v6 = vmul.f32 1.442695, %v2249_v4 }
 0x776   : > { %7712 = vpow2.f32 %v2253_v63 }
 0x777   : > { %7714 = vpow2.f32 %v2255_v6 }
 0x778   : > { %7716 = vpow2.f32 %v2251_v5 }
 0x77f   : > { %v7711_v7 = vpop.eup %7710 }
 0x780   : > { %v7713_v8 = vpop.eup %7712  ;;  %v2268_v9 = vsel %vm2173_vm2, %v7711_v7, 0.0 }
 0x781   : > { %v7715_v14 = vpop.eup %7714  ;;  %2269 = vadd.xlane.f32.xlu1 %v2268_v9  ;;  %v2262_v18 = vsel %vm2173_vm2, %v7713_v8, 0.0 }
 0x782   : > { %v2265_v15 = vsel %vm2173_vm2, %v7715_v14, 0.0  ;;  %v7717_v16 = vpop.eup %7716 }
 0x783   : > { %2266 = vadd.xlane.f32.xlu0 %v2265_v15  ;;  %v2259_v20 = vsel %vm2173_vm2, %v7717_v16, 0.0 }
 0x785   : > { %2263 = vadd.xlane.f32.xlu1 %v2262_v18 }
 0x787   : > { %2260 = vadd.xlane.f32.xlu0 %v2259_v20 }
 0x796   : > { %2465 = vrot.lane.b32.xlu1 %v9608_v10, %s8834_s16 }
 0x7de   : > { %v2417_v21 = vpop.xlane.xlu0 %2416 }
 0x7df   : > { %v2427_v22 = vsub.f32 %v2401_v45, %v2417_v21 }
 0x7e0   : > { %v2420_v26 = vpop.xlane.xlu1 %2419 }
 0x7e1   : > { %v2428_v28 = vsub.f32 %v2404_v49, %v2420_v26  ;;  %v2431_v31 = vmul.f32 1.442695, %v2427_v22 }
 0x7e2   : > { %v2423_v27 = vpop.xlane.xlu0 %2422 }
 0x7e3   : > { %v2429_v30 = vsub.f32 %v2409_v48, %v2423_v27  ;;  %v2433_v36 = vmul.f32 1.442695, %v2428_v28 }
 0x7e4   : > { %v2426_v32 = vpop.xlane.xlu1 %2425 }
 0x7e5   : > { %v2435_v33 = vmul.f32 1.442695, %v2429_v30  ;;  %v2430_v34 = vsub.f32 %v2412_v53, %v2426_v32 }
 0x7e7   : > { %7718 = vpow2.f32 %v2435_v33  ;;  %v2437_v37 = vmul.f32 1.442695, %v2430_v34 }
 0x7e8   : > { %7720 = vpow2.f32 %v2431_v31 }
 0x7e9   : > { %7722 = vpow2.f32 %v2437_v37 }
 0x7ea   : > { %7724 = vpow2.f32 %v2433_v36 }
 0x7f1   : > { %v7719_v38 = vpop.eup %7718 }
 0x7f2   : > { %v7721_v39 = vpop.eup %7720  ;;  %v2445_v40 = vsel %vm2173_vm2, %v7719_v38, 0.0 }
 0x7f3   : > { %v7723_v41 = vpop.eup %7722  ;;  %2446 = vadd.xlane.f32.xlu0 %v2445_v40  ;;  %v2439_v44 = vsel %vm2173_vm2, %v7721_v39, 0.0 }
 0x7f4   : > { %v2448_v42 = vsel %vm2173_vm2, %v7723_v41, 0.0  ;;  %v7725_v43 = vpop.eup %7724 }
 0x7f5   : > { %2449 = vadd.xlane.f32.xlu1 %v2448_v42  ;;  %v2442_v45 = vsel %vm2173_vm2, %v7725_v43, 0.0 }
 0x7f7   : > { %2440 = vadd.xlane.f32.xlu0 %v2439_v44 }
 0x7f9   : > { %2443 = vadd.xlane.f32.xlu1 %v2442_v45 }
 0x80a   : > { %2541 = vrot.lane.b32.xlu1 %v9595_v50, %s8835_s11 }
 0x80d   : > { %2463 = vrot.lane.b32.xlu0 %v9612_v12, %s8834_s16 }
 0x80e   : > { %v2270_v46 = vpop.xlane.xlu1 %2269  ;;  %2537 = vrot.lane.b32.xlu1 %v9597_v51, %s8835_s11 }
 0x810   : > { %v2267_v47 = vpop.xlane.xlu0 %2266 }
 0x811   : > { %2543 = vrot.lane.b32.xlu0 %v9610_v11, %s8835_s11  ;;  %7726 = vrcp.f32 %v2267_v47 }
 0x812   : > { %v2264_v48 = vpop.xlane.xlu1 %2263 }
 0x813   : > { %7728 = vrcp.f32 %v2264_v48 }
 0x814   : > { %7730 = vrcp.f32 %v2270_v46  ;;  %v2261_v49 = vpop.xlane.xlu0 %2260 }
 0x815   : > { %7732 = vrcp.f32 %v2261_v49  ;;  %2539 = vrot.lane.b32.xlu0 %v9614_v13, %s8835_s11 }
 0x816   : > { %v2466_v62 = vpop.permute.xlu1 %2465 }
 0x81b   : > { %v7727_v52 = vpop.eup %7726 }
 0x81c   : > { %v2277_v56 = vmul.f32 %v7727_v52, %v7715_v14 }
 0x81d   : > { %v7729_v53 = vpop.eup %7728 }
 0x81e   : > { %v7731_v54 = vpop.eup %7730  ;;  %v2276_v58 = vmul.f32 %v7729_v53, %v7713_v8 }
 0x81f   : > { %v7733_v55 = vpop.eup %7732  ;;  %v2278_v59 = vmul.f32 %v7731_v54, %v7711_v7 }
 0x820   : > { %v2275_v57 = vmul.f32 %v7733_v55, %v7717_v16 }
 0x821   : > { %v2280_v61 = vpack.c.bf16 %v2278_v59, %v2277_v56 }
 0x822   : > { %v2279_v60 = vpack.c.bf16 %v2276_v58, %v2275_v57 }
 0x824   : > { %6870 = vmatprep.mubr.msk.bf16.mxu0 %vm2173_vm2, %v2279_v60 }
 0x825   : > { %6871 = vmatmul.mubr.msk.bf16.vlgmr.msra.gmra.mrb[4].mxu0 %vm2173_vm2, %v2280_v61 }
 0x880   : > { %v2447_v63 = vpop.xlane.xlu0 %2446 }
 0x882   : > { %v2450_v0 = vpop.xlane.xlu1 %2449 }
 0x883   : > { %7734 = vrcp.f32 %v2450_v0 }
 0x884   : > { %v2441_v3 = vpop.xlane.xlu0 %2440 }
 0x885   : > { %7736 = vrcp.f32 %v2441_v3 }
 0x886   : > { %7738 = vrcp.f32 %v2447_v63  ;;  %v2444_v4 = vpop.xlane.xlu1 %2443 }
 0x887   : > { %7740 = vrcp.f32 %v2444_v4 }
 0x888   : > { %v2464_v5 = vpop.permute.xlu0 %2463 }
 0x889   : > { %6882 = vmatprep.subr.bf16.mxu0 %v2464_v5 }
 0x88a   : > { %6883 = vmatpush3.bf16.msra.mxu0 %v2464_v5  ;;  %v2542_v7 = vpop.permute.xlu1 %2541 }
 0x88b   : > { %6884 = vmatprep.subr.bf16.mxu0 %v2466_v62  ;;  %v2552_v27 = vsel %vm2173_vm2, %v2542_v7, 0 }
 0x88c   : > { %v2544_v28 = vpop.permute.xlu0 %2543 }
 0x88d   : > { %v7735_v6 = vpop.eup %7734  ;;  %v2555_v30 = vsel %vm2173_vm2, %v2544_v28, 0 }
 0x88e   : > { %6885 = vmatpush3.bf16.msra.mxu0 %v2466_v62  ;;  %v2458_v15 = vmul.f32 %v7735_v6, %v7723_v41  ;;  %v2538_v26 = vpop.permute.xlu1 %2537 }
 0x88f   : > { %v7737_v8 = vpop.eup %7736  ;;  %7130 = vmatprep.subr.msk.bf16.mxu0 %vm2173_vm2, %v2542_v7 }
 0x890   : > { %v7739_v9 = vpop.eup %7738  ;;  %v2455_v16 = vmul.f32 %v7737_v8, %v7721_v39  ;;  %v2540_v31 = vpop.permute.xlu0 %2539 }
 0x891   : > { %v7741_v14 = vpop.eup %7740  ;;  %v2457_v20 = vmul.f32 %v7739_v9, %v7719_v38 }
 0x892   : > { %v2456_v18 = vmul.f32 %v7741_v14, %v7725_v43 }
 0x893   : > { %v2460_v22 = vpack.c.bf16 %v2458_v15, %v2457_v20 }
 0x894   : > { %v2459_v21 = vpack.c.bf16 %v2456_v18, %v2455_v16 }
 0x896   : > { %6886 = vmatprep.mubr.msk.bf16.mxu0 %vm2173_vm2, %v2459_v21 }
 0x897   : > { %6887 = vmatmul.mubr.msk.bf16.vlgmr.msra.gmra.mrb[8].mxu0 %vm2173_vm2, %v2460_v22 }
 0x898   : > { %6891 = vmatpush3.bf16.xpose.msra.mxu0 %v2552_v27  ;;  %6894 = vmatprep.mubr.msk.bf16.mxu0 %vm2173_vm2, %v2538_v26 }
 0x899   : > { %7131 = vmatprep.subr.msk.bf16.mxu0 %vm2173_vm2, %v2544_v28 }
 0x8a0   : > { %6893 = vmatpush3.bf16.xpose.msra.mxu0 %v2555_v30 }
 0x8a7   : > { %6895 = vmatmul.mubr.msk.bf16.vlgmr.msra.gmra.mrb[12].mxu0 %vm2173_vm2, %v2540_v31 }
 0x8f8   : > { %v6872_v32 = vpop.f32.mrb[4].mxu0 }
 0x8f9   : > { %v2323_v33 = vpop.f32.mrb[5].mxu0 }
 0x8fa   : > { %v6873_v34 = vpop.f32.mrb[6].mxu0 }
 0x8fb   : > { %v2339_v36 = vpack.c.bf16 %v6873_v34, %v6872_v32  ;;  %v2326_v37 = vpop.f32.mrb[7].mxu0 }
 0x8fc   : > { %v2338_v38 = vpack.c.bf16 %v2326_v37, %v2323_v33 }
 0x8fd   : > { %2341 = vst.msk [vmem:[#allocation2 + $0x8] sm:$0xff] %vm2173_vm2, %v2339_v36 }
 0x8fe   : > { %2340 = vst.msk [vmem:[#allocation2] sm:$0xff] %vm2173_vm2, %v2338_v38 }
 0x96a   : > { %v9691_v39 = vpop.f32.mrb[8].mxu0 }
 0x96b   : > { %v9693_v40 = vpop.f32.mrb[9].mxu0 }
 0x96c   : > { %v9695_v41 = vpop.f32.mrb[10].mxu0 }
 0x96d   : > { %v2525_v42 = vpack.c.bf16 %v9695_v41, %v9691_v39  ;;  %v9699_v43 = vpop.f32.mrb[11].mxu0 }
 0x96e   : > { %v2524_v44 = vpack.c.bf16 %v9699_v43, %v9693_v40 }
 0x97a   : > { %v6896_v45 = vpop.f32.mrb[12].mxu0 }
 0x97b   : > { %v2591_v46 = vpop.f32.mrb[13].mxu0  ;;  %v2600_v55 = vadd.f32 %v6896_v45, %v9641_v29 }
 0x97c   : > { %v2592_v47 = vadd.f32 %v2591_v46, %v9641_v29  ;;  %v6897_v48 = vpop.f32.mrb[14].mxu0 }
 0x97d   : > { %v2594_v49 = vpop.f32.mrb[15].mxu0  ;;  %v2603_v52 = vadd.f32 %v6897_v48, %v9641_v29  ;;  %v2612_v58 = vsel %vm2173_vm2, %v2600_v55, -inf }
 0x97e   : > { %v2595_v53 = vadd.f32 %v2594_v49, %v9641_v29  ;;  %v2606_v54 = vsel %vm2173_vm2, %v2592_v47, -inf }
 0x97f   : > { %2607 = vmax.xlane.f32.xlu1 %v2606_v54  ;;  %v2615_v57 = vsel %vm2173_vm2, %v2603_v52, -inf }
 0x980   : > { %v2609_v56 = vsel %vm2173_vm2, %v2595_v53, -inf }
 0x981   : > { %2610 = vmax.xlane.f32.xlu0 %v2609_v56 }
 0x983   : > { %2616 = vmax.xlane.f32.xlu1 %v2615_v57 }
 0x985   : > { %2613 = vmax.xlane.f32.xlu0 %v2612_v58 }
 0x994   : > { %2654 = vrot.lane.b32.xlu1 %v9608_v10, %s8835_s11 }
 0xa0c   : > { %v2608_v59 = vpop.xlane.xlu1 %2607 }
 0xa0d   : > { %v2618_v63 = vsub.f32 %v2592_v47, %v2608_v59 }
 0xa0e   : > { %v2611_v60 = vpop.xlane.xlu0 %2610 }
 0xa0f   : > { %v2619_v61 = vsub.f32 %v2595_v53, %v2611_v60  ;;  %v2622_v7 = vmul.f32 1.442695, %v2618_v63 }
 0xa10   : > { %v2617_v62 = vpop.xlane.xlu1 %2616 }
 0xa11   : > { %v2621_v0 = vsub.f32 %v2603_v52, %v2617_v62  ;;  %v2624_v3 = vmul.f32 1.442695, %v2619_v61 }
 0xa12   : > { %v2614_v4 = vpop.xlane.xlu0 %2613 }
 0xa13   : > { %v2628_v5 = vmul.f32 1.442695, %v2621_v0  ;;  %v2620_v6 = vsub.f32 %v2600_v55, %v2614_v4 }
 0xa14   : > { %v2655_v26 = vpop.permute.xlu1 %2654 }
 0xa15   : > { %7742 = vpow2.f32 %v2628_v5  ;;  %v2626_v8 = vmul.f32 1.442695, %v2620_v6 }
 0xa16   : > { %7744 = vpow2.f32 %v2624_v3 }
 0xa17   : > { %7746 = vpow2.f32 %v2626_v8 }
 0xa18   : > { %7748 = vpow2.f32 %v2622_v7 }
 0xa1f   : > { %v7743_v9 = vpop.eup %7742 }
 0xa20   : > { %v7745_v14 = vpop.eup %7744  ;;  %v2639_v15 = vsel %vm2173_vm2, %v7743_v9, 0.0 }
 0xa21   : > { %v7747_v16 = vpop.eup %7746  ;;  %2640 = vadd.xlane.f32.xlu1 %v2639_v15  ;;  %v2633_v21 = vsel %vm2173_vm2, %v7745_v14, 0.0 }
 0xa22   : > { %v2636_v18 = vsel %vm2173_vm2, %v7747_v16, 0.0  ;;  %v7749_v20 = vpop.eup %7748 }
 0xa23   : > { %2637 = vadd.xlane.f32.xlu0 %v2636_v18  ;;  %v2630_v22 = vsel %vm2173_vm2, %v7749_v20, 0.0 }
 0xa25   : > { %2634 = vadd.xlane.f32.xlu1 %v2633_v21 }
 0xa27   : > { %2631 = vadd.xlane.f32.xlu0 %v2630_v22 }
 0xa36   : > { %2730 = vrot.lane.b32.xlu1 %v9595_v50, %s8836_s1 }
 0xa3a   : > { %2726 = vrot.lane.b32.xlu1 %v9597_v51, %s8836_s1 }
 0xa3d   : > { %2652 = vrot.lane.b32.xlu0 %v9612_v12, %s8835_s11 }
 0xa41   : > { %2732 = vrot.lane.b32.xlu0 %v9610_v11, %s8836_s1 }
 0xa45   : > { %2728 = vrot.lane.b32.xlu0 %v9614_v13, %s8836_s1 }
 0xaae   : > { %v2641_v27 = vpop.xlane.xlu1 %2640 }
 0xab0   : > { %v2638_v28 = vpop.xlane.xlu0 %2637 }
 0xab1   : > { %7750 = vrcp.f32 %v2638_v28 }
 0xab2   : > { %v2635_v30 = vpop.xlane.xlu1 %2634 }
 0xab3   : > { %7752 = vrcp.f32 %v2635_v30 }
 0xab4   : > { %7754 = vrcp.f32 %v2641_v27  ;;  %v2632_v50 = vpop.xlane.xlu0 %2631 }
 0xab5   : > { %7756 = vrcp.f32 %v2632_v50 }
 0xab6   : > { %v2731_v11 = vpop.permute.xlu1 %2730 }
 0xab7   : > { %v2741_v48 = vsel %vm2173_vm2, %v2731_v11, 0 }
 0xab8   : > { %v2653_v31 = vpop.permute.xlu0 %2652 }
 0xab9   : > { %6898 = vmatprep.subr.bf16.mxu1 %v2653_v31 }
 0xaba   : > { %6899 = vmatpush3.bf16.msra.mxu1 %v2653_v31  ;;  %v2727_v47 = vpop.permute.xlu1 %2726 }
 0xabb   : > { %6900 = vmatprep.subr.bf16.mxu1 %v2655_v26  ;;  %v7751_v51 = vpop.eup %7750 }
 0xabc   : > { %v2648_v13 = vmul.f32 %v7751_v51, %v7747_v16  ;;  %v2733_v49 = vpop.permute.xlu0 %2732 }
 0xabd   : > { %v7753_v32 = vpop.eup %7752  ;;  %v2744_v52 = vsel %vm2173_vm2, %v2733_v49, 0 }
 0xabe   : > { %v7755_v33 = vpop.eup %7754  ;;  %6901 = vmatpush3.bf16.msra.mxu1 %v2655_v26  ;;  %v2647_v37 = vmul.f32 %v7753_v32, %v7745_v14 }
 0xabf   : > { %v7757_v34 = vpop.eup %7756  ;;  %7132 = vmatprep.subr.msk.bf16.mxu1 %vm2173_vm2, %v2731_v11  ;;  %v2649_v38 = vmul.f32 %v7755_v33, %v7743_v9 }
 0xac0   : > { %v2646_v36 = vmul.f32 %v7757_v34, %v7749_v20  ;;  %v2729_v53 = vpop.permute.xlu0 %2728 }
 0xac1   : > { %v2651_v46 = vpack.c.bf16 %v2649_v38, %v2648_v13 }
 0xac2   : > { %v2650_v45 = vpack.c.bf16 %v2647_v37, %v2646_v36 }
 0xac4   : > { %6902 = vmatprep.mubr.msk.bf16.mxu1 %vm2173_vm2, %v2650_v45 }
 0xac5   : > { %6903 = vmatmul.mubr.msk.bf16.vlgmr.msra.gmra.mrb[20].mxu1 %vm2173_vm2, %v2651_v46 }
 0xac6   : > { %6910 = vmatprep.mubr.msk.bf16.mxu1 %vm2173_vm2, %v2727_v47 }
 0xac7   : > { %6907 = vmatpush3.bf16.xpose.msra.mxu1 %v2741_v48 }
 0xac8   : > { %7133 = vmatprep.subr.msk.bf16.mxu1 %vm2173_vm2, %v2733_v49 }
 0xacf   : > { %6909 = vmatpush3.bf16.xpose.msra.mxu1 %v2744_v52 }
 0xad6   : > { %6911 = vmatmul.mubr.msk.bf16.vlgmr.msra.gmra.mrb[24].mxu1 %vm2173_vm2, %v2729_v53 }
 0xad7   : > { %3249 = vmatprep.mubr.bf16.mxu1 %v8829_v2 }
 0xb98   : > { %v6904_v54 = vpop.f32.mrb[20].mxu1 }
 0xb99   : > { %v2698_v55 = vpop.f32.mrb[21].mxu1 }
 0xb9a   : > { %v6905_v56 = vpop.f32.mrb[22].mxu1 }
 0xb9b   : > { %v2714_v57 = vpack.c.bf16 %v6905_v56, %v6904_v54  ;;  %v2701_v58 = vpop.f32.mrb[23].mxu1 }
 0xb9c   : > { %v2713_v59 = vpack.c.bf16 %v2701_v58, %v2698_v55  ;;  %v7545_v58 = vld [vmem:[%s10503_s6 + $0x8] sm:$0xff]  }
 0xba9   : > { %v6912_v60 = vpop.f32.mrb[24].mxu1 }
 0xbaa   : > { %v2780_v61 = vpop.f32.mrb[25].mxu1  ;;  %v2789_v6 = vadd.f32 %v6912_v60, %v9641_v29  ;;  %v7547_v60 = vld [vmem:[%s10503_s6 + $0x18] sm:$0xff]  }
 0xbab   : > { %v2781_v62 = vadd.f32 %v2780_v61, %v9641_v29  ;;  %v6913_v63 = vpop.f32.mrb[26].mxu1  ;;  %v7548_v61 = vld [vmem:[%s10503_s6 + $0x20] sm:$0xff]  }
 0xbac   : > { %v2783_v0 = vpop.f32.mrb[27].mxu1  ;;  %v2792_v3 = vadd.f32 %v6913_v63, %v9641_v29  ;;  %v2801_v9 = vsel %vm2173_vm2, %v2789_v6, -inf  ;;  %v7550_v63 = vld [vmem:[%s10503_s6 + $0x30] sm:$0xff]  }
 0xbad   : > { %v2784_v4 = vadd.f32 %v2783_v0, %v9641_v29  ;;  %v2795_v5 = vsel %vm2173_vm2, %v2781_v62, -inf  ;;  %v7551_v0 = vld [vmem:[%s10503_s6 + $0x38] sm:$0xff]  }
 0xbae   : > { %2796 = vmax.xlane.f32.xlu1 %v2795_v5  ;;  %v2804_v8 = vsel %vm2173_vm2, %v2792_v3, -inf }
 0xbaf   : > { %v2798_v7 = vsel %vm2173_vm2, %v2784_v4, -inf }
 0xbb0   : > { %2799 = vmax.xlane.f32.xlu0 %v2798_v7 }
 0xbb2   : > { %2805 = vmax.xlane.f32.xlu1 %v2804_v8 }
 0xbb4   : > { %2802 = vmax.xlane.f32.xlu0 %v2801_v9 }
 0xc3b   : > { %v2797_v14 = vpop.xlane.xlu1 %2796 }
 0xc3c   : > { %v2807_v20 = vsub.f32 %v2781_v62, %v2797_v14  ;;  %v7549_v62 = vld [vmem:[%s10503_s6 + $0x28] sm:$0xff]  }
 0xc3d   : > { %v2800_v15 = vpop.xlane.xlu0 %2799 }
 0xc3e   : > { %v2808_v16 = vsub.f32 %v2784_v4, %v2800_v15  ;;  %v2811_v30 = vmul.f32 1.442695, %v2807_v20 }
 0xc3f   : > { %v2806_v18 = vpop.xlane.xlu1 %2805 }
 0xc40   : > { %v2810_v21 = vsub.f32 %v2792_v3, %v2806_v18  ;;  %v2813_v22 = vmul.f32 1.442695, %v2808_v16  ;;  %v6352_v18 = vld [vmem:[#allocation21] ss:$0 sm:$0xff] }
 0xc41   : > { %v2803_v26 = vpop.xlane.xlu0 %2802 }
 0xc42   : > { %v2817_v27 = vmul.f32 1.442695, %v2810_v21  ;;  %v2809_v28 = vsub.f32 %v2789_v6, %v2803_v26 }
 0xc44   : > { %7758 = vpow2.f32 %v2817_v27  ;;  %v2815_v50 = vmul.f32 1.442695, %v2809_v28 }
 0xc45   : > { %7760 = vpow2.f32 %v2813_v22 }
 0xc46   : > { %7762 = vpow2.f32 %v2815_v50 }
 0xc47   : > { %7764 = vpow2.f32 %v2811_v30 }
 0xc4e   : > { %v7759_v31 = vpop.eup %7758 }
 0xc4f   : > { %v7761_v51 = vpop.eup %7760  ;;  %v2828_v32 = vsel %vm2173_vm2, %v7759_v31, 0.0 }
 0xc50   : > { %v7763_v33 = vpop.eup %7762  ;;  %2829 = vadd.xlane.f32.xlu1 %v2828_v32  ;;  %v2822_v13 = vsel %vm2173_vm2, %v7761_v51, 0.0 }
 0xc51   : > { %v2825_v11 = vsel %vm2173_vm2, %v7763_v33, 0.0  ;;  %v7765_v34 = vpop.eup %7764 }
 0xc52   : > { %2826 = vadd.xlane.f32.xlu0 %v2825_v11  ;;  %v2819_v36 = vsel %vm2173_vm2, %v7765_v34, 0.0  ;;  %v7554_v11 = vld [vmem:[%s10505_s12 + $0x4] ss:$8 sps:$4 sm:$0xff]  }
 0xc53   : > { %3217 = vmatprep.subr.bf16.mxu1 %v7554_v11 }
 0xc54   : > { %2823 = vadd.xlane.f32.xlu1 %v2822_v13  ;;  %v7555_v13 = vld [vmem:[%s10505_s12 + $0x10] ss:$8 sps:$4 sm:$0xff]  }
 0xc56   : > { %2820 = vadd.xlane.f32.xlu0 %v2819_v36 }
 0xc65   : > { %2843 = vrot.lane.b32.xlu1 %v9608_v10, %s8836_s1 }
 0xc69   : > { %2528 = vrot.lane.b32.xlu1 %v2524_v44, %s8836_s1 }
 0xc6c   : > { %2841 = vrot.lane.b32.xlu0 %v9612_v12, %s8836_s1 }
 0xc6d   : > { %2717 = vrot.lane.b32.xlu1 %v2713_v59, %s8835_s11  ;;  %v7546_v59 = vld [vmem:[%s10503_s6 + $0x10] sm:$0xff]  }
 0xc70   : > { %2530 = vrot.lane.b32.xlu0 %v2525_v42, %s8836_s1 }
 0xc74   : > { %2719 = vrot.lane.b32.xlu0 %v2714_v57, %s8835_s11  ;;  %v7544_v57 = vld [vmem:[%s10503_s6] sm:$0xff]  }
 0xcdd   : > { %v2830_v37 = vpop.xlane.xlu1 %2829 }
 0xcdf   : > { %v2827_v38 = vpop.xlane.xlu0 %2826 }
 0xce0   : > { %7766 = vrcp.f32 %v2827_v38 }
 0xce1   : > { %v2824_v10 = vpop.xlane.xlu1 %2823 }
 0xce2   : > { %7768 = vrcp.f32 %v2824_v10 }
 0xce3   : > { %7770 = vrcp.f32 %v2830_v37  ;;  %v2821_v40 = vpop.xlane.xlu0 %2820 }
 0xce4   : > { %7772 = vrcp.f32 %v2821_v40 }
 0xce5   : > { %v2844_v43 = vpop.permute.xlu1 %2843 }
 0xce7   : > { %v2842_v44 = vpop.permute.xlu0 %2841 }
 0xce8   : > { %6914 = vmatprep.subr.bf16.mxu0 %v2842_v44 }
 0xce9   : > { %6915 = vmatpush3.bf16.msra.mxu0 %v2842_v44  ;;  %v2529_v12 = vpop.permute.xlu1 %2528 }
 0xcea   : > { %2535 = vst.msk [vmem:[#allocation2] sm:$0xff] %vm2534_vm3, %v2529_v12  ;;  %6916 = vmatprep.subr.bf16.mxu0 %v2844_v43  ;;  %v7767_v39 = vpop.eup %7766 }
 0xceb   : > { %v2531_v41 = vpop.permute.xlu0 %2530  ;;  %v2837_v48 = vmul.f32 %v7767_v39, %v7763_v33  ;;  %v7552_v33 = vld [vmem:[%s10504_s15] ss:$8 sps:$4 sm:$0xff]  }
 0xcec   : > { %v7769_v42 = vpop.eup %7768  ;;  %2536 = vst.msk [vmem:[#allocation2 + $0x8] sm:$0xff] %vm2534_vm3, %v2531_v41  ;;  %3218 = vmatpush1.bf16.msra.mxu1 %v7552_v33 }
 0xced   : > { %v7771_v45 = vpop.eup %7770  ;;  %6917 = vmatpush3.bf16.msra.mxu0 %v2844_v43  ;;  %v2718_v46 = vpop.permute.xlu1 %2717  ;;  %v2836_v53 = vmul.f32 %v7769_v42, %v7761_v51 }
 0xcee   : > { %v7773_v47 = vpop.eup %7772  ;;  %2724 = vst.msk [vmem:[#allocation2] sm:$0xff] %vm2723_vm4, %v2718_v46  ;;  %v2838_v54 = vmul.f32 %v7771_v45, %v7759_v31  ;;  %6922 = vmatprep.subr.bf16.mxu0 %v7544_v57 }
 0xcef   : > { %v2720_v49 = vpop.permute.xlu0 %2719  ;;  %v2835_v52 = vmul.f32 %v7773_v47, %v7765_v34  ;;  %v7557_v34 = vld [vmem:[%s10505_s12 + $0x14] ss:$8 sps:$4 sm:$0xff]   ;;  %v7560_v47 = vld [vmem:[%s10505_s12 + $0x24] ss:$8 sps:$4 sm:$0xff]  }
 0xcf0   : > { %2725 = vst.msk [vmem:[#allocation2 + $0x8] sm:$0xff] %vm2723_vm4, %v2720_v49  ;;  %v2840_v56 = vpack.c.bf16 %v2838_v54, %v2837_v48  ;;  %3219 = vmatprep.subr.bf16.mxu1 %v7557_v34  ;;  %v7558_v48 = vld [vmem:[%s10505_s12 + $0x20] ss:$8 sps:$4 sm:$0xff]   ;;  %v7563_v49 = vld [vmem:[%s10505_s12 + $0x34] ss:$8 sps:$4 sm:$0xff]  }
 0xcf1   : > { %v2839_v55 = vpack.c.bf16 %v2836_v53, %v2835_v52  ;;  %3220 = vmatpush1.bf16.msra.mxu1 %v7555_v13  ;;  %v7561_v52 = vld [vmem:[%s10505_s12 + $0x30] ss:$8 sps:$4 sm:$0xff]   ;;  %v7566_v53 = vld [vmem:[%s10505_s12 + $0x44] ss:$8 sps:$4 sm:$0xff]   ;;  %v7564_v54 = vld [vmem:[%s10505_s12 + $0x40] ss:$8 sps:$4 sm:$0xff]  }
 0xcf2   : > { %3221 = vmatprep.subr.bf16.mxu1 %v7560_v47  ;;  %v7590_v47 = vld [vmem:[%s10506_s29 + $0x78] sm:$0xff]  }
 0xcf3   : > { %6918 = vmatprep.mubr.msk.bf16.mxu0 %vm2173_vm2, %v2839_v55  ;;  %v7569_v55 = vld [vmem:[%s10505_s12 + $0x54] ss:$8 sps:$4 sm:$0xff]  }
 0xcf4   : > { %6919 = vmatmul.mubr.msk.bf16.vlgmr.msra.gmra.mrb[16].mxu0 %vm2173_vm2, %v2840_v56  ;;  %v7567_v56 = vld [vmem:[%s10505_s12 + $0x50] ss:$8 sps:$4 sm:$0xff]  }
 0xcf5   : > { %6923 = vmatpush3.bf16.msra.mxu0 %v7544_v57  ;;  %3222 = vmatpush1.bf16.msra.mxu1 %v7558_v48  ;;  %v7572_v57 = vld [vmem:[%s10505_s12 + $0x64] ss:$8 sps:$4 sm:$0xff]   ;;  %v7591_v48 = vld [vmem:[%s10506_s29 + $0x38] sm:$0xff]  }
 0xcf6   : > { %6924 = vmatprep.subr.bf16.mxu0 %v7545_v58  ;;  %3223 = vmatprep.subr.bf16.mxu1 %v7563_v49  ;;  %v3125_v49 = vld [vmem:[#allocation26] sm:$0x3] }
 0xcf9   : > { %6925 = vmatpush3.bf16.msra.mxu0 %v7545_v58  ;;  %3224 = vmatpush1.bf16.msra.mxu1 %v7561_v52  ;;  %v7570_v58 = vld [vmem:[%s10505_s12 + $0x60] ss:$8 sps:$4 sm:$0xff]   ;;  %v3130_v52 = vrot.slane %v3125_v49, %v9529_v17 }
 0xcfa   : > { %6926 = vmatprep.subr.bf16.mxu0 %v7546_v59  ;;  %3225 = vmatprep.subr.bf16.mxu1 %v7566_v53  ;;  %v3134_v53 = vrot.slane %v3125_v49, %v9535_v19 }
 0xcfd   : > { %6927 = vmatpush3.bf16.msra.mxu0 %v7546_v59  ;;  %3226 = vmatpush1.bf16.msra.mxu1 %v7564_v54  ;;  %v7575_v59 = vld [vmem:[%s10505_s12 + $0x74] ss:$8 sps:$4 sm:$0xff]  }
 0xcfe   : > { %6928 = vmatprep.subr.bf16.mxu0 %v7547_v60  ;;  %3227 = vmatprep.subr.bf16.mxu1 %v7569_v55 }
 0xd01   : > { %6929 = vmatpush3.bf16.msra.mxu0 %v7547_v60  ;;  %3228 = vmatpush1.bf16.msra.mxu1 %v7567_v56  ;;  %v7573_v60 = vld [vmem:[%s10505_s12 + $0x70] ss:$8 sps:$4 sm:$0xff]  }
 0xd02   : > { %6930 = vmatprep.subr.bf16.mxu0 %v7548_v61  ;;  %3229 = vmatprep.subr.bf16.mxu1 %v7572_v57 }
 0xd05   : > { %6931 = vmatpush3.bf16.msra.mxu0 %v7548_v61  ;;  %3230 = vmatpush1.bf16.msra.mxu1 %v7570_v58 }
 0xd06   : > { %6932 = vmatprep.subr.bf16.mxu0 %v7549_v62  ;;  %3231 = vmatprep.subr.bf16.mxu1 %v7575_v59 }
 0xd09   : > { %6933 = vmatpush3.bf16.msra.mxu0 %v7549_v62  ;;  %3232 = vmatpush1.bf16.msra.mxu1 %v7573_v60 }
 0xd0a   : > { %6934 = vmatprep.subr.bf16.mxu0 %v7550_v63 }
 0xd0d   : > { %6935 = vmatpush3.bf16.msra.mxu0 %v7550_v63 }
 0xd0e   : > { %6936 = vmatprep.subr.bf16.mxu0 %v7551_v0 }
 0xd11   : > { %6937 = vmatpush3.bf16.msra.mxu0 %v7551_v0 }
 0xdc7   : > { %v6920_v3 = vpop.f32.mrb[16].mxu0 }
 0xdc8   : > { %v2887_v4 = vpop.f32.mrb[17].mxu0 }
 0xdc9   : > { %v6921_v5 = vpop.f32.mrb[18].mxu0 }
 0xdca   : > { %v2903_v6 = vpack.c.bf16 %v6921_v5, %v6920_v3  ;;  %v2890_v7 = vpop.f32.mrb[19].mxu0 }
 0xdcb   : > { %v2902_v8 = vpack.c.bf16 %v2890_v7, %v2887_v4 }
 0xdcc   : > { %2908 = vrot.lane.b32.xlu0 %v2903_v6, %s8834_s16 }
 0xdcd   : > { %2906 = vrot.lane.b32.xlu1 %v2902_v8, %s8834_s16 }
 0xe3e   : > { %v2909_v9 = vpop.permute.xlu0 %2908 }
 0xe3f   : > { %2914 = vst.msk [vmem:[#allocation2 + $0x8] sm:$0xff] %vm2912_vm5, %v2909_v9  ;;  %v2907_v14 = vpop.permute.xlu1 %2906 }
 0xe40   : > { %2913 = vst.msk [vmem:[#allocation2] sm:$0xff] %vm2912_vm5, %v2907_v14 }
 0xe46   : > { %v2916_v16 = vld [vmem:[#allocation2 + $0x8] sm:$0xff] }
 0xe47   : > { %v2915_v15 = vld [vmem:[#allocation2] sm:$0xff] }
 0xe48   : > { %6938 = vmatprep.mubr.bf16.mxu0 %v2915_v15 }
 0xe49   : > { %6939 = vmatmul.mubr.bf16.vlgmr.msra.gmra.mrb[20].mxu0 %v2916_v16  ;;  %v6361_v16 = vld [vmem:[#allocation23] ss:$0 sm:$0xff] }
 0xf1c   : > { %v6940_v20 = vpop.f32.mrb[20].mxu0 }
 0xf1d   : > { %v3022_v21 = vpop.f32.mrb[21].mxu0  ;;  %v3031_v50 = vadd.f32 %v6940_v20, %v6352_v18 }
 0xf1e   : > { %v3023_v22 = vadd.f32 %v6352_v18, %v3022_v21  ;;  %v6941_v26 = vpop.f32.mrb[22].mxu0 }
 0xf1f   : > { %v3025_v27 = vpop.f32.mrb[23].mxu0  ;;  %v3034_v51 = vadd.f32 %v6941_v26, %v6352_v18  ;;  %v3039_v32 = vadd.f32 %v3031_v50, %v9589_v35  ;;  %v6362_v26 = vld [vmem:[#allocation24] ss:$0 sm:$0xff] }
 0xf20   : > { %v3026_v28 = vadd.f32 %v6352_v18, %v3025_v27  ;;  %v3037_v30 = vadd.f32 %v3023_v22, %v9582_v23 }
 0xf22   : > { %3043 = vadd.xlane.f32.xlu1 %v3037_v30  ;;  %v3038_v31 = vadd.f32 %v3026_v28, %v9584_v24 }
 0xf24   : > { %3045 = vadd.xlane.f32.xlu0 %v3038_v31 }
 0xf26   : > { %3049 = vadd.xlane.f32.xlu1 %v3034_v51 }
 0xf28   : > { %3047 = vadd.xlane.f32.xlu0 %v3039_v32 }
 0xfaf   : > { %v3044_v36 = vpop.xlane.xlu1 %3043 }
 0xfb0   : > { %v3051_v23 = vmul.f32 0.0078125, %v3044_v36 }
 0xfb1   : > { %v3046_v37 = vpop.xlane.xlu0 %3045 }
 0xfb2   : > { %v3055_v38 = vsub.f32 %v3037_v30, %v3051_v23  ;;  %v3052_v10 = vmul.f32 0.0078125, %v3046_v37  ;;  %v7576_v37 = vld [vmem:[%s10506_s29 + $0x40] sm:$0xff]  }
 0xfb3   : > { %v3050_v24 = vpop.xlane.xlu1 %3049  ;;  %6682 = vmatprep.subr.bf16.mxu0 %v7576_v37 }
 0xfb4   : > { %v3056_v40 = vsub.f32 %v3038_v31, %v3052_v10  ;;  %v3054_v43 = vmul.f32 0.0078125, %v3050_v24  ;;  %v3059_v35 = vmul.f32 %v3055_v38, %v3055_v38  ;;  %v7578_v10 = vld [vmem:[%s10506_s29 + $0x48] sm:$0xff]  }
 0xfb5   : > { %v3048_v44 = vpop.xlane.xlu0 %3047  ;;  %v7579_v24 = vld [vmem:[%s10506_s29 + $0x8] sm:$0xff]  }
 0xfb6   : > { %v9787_v12 = vsub.f32 %v3034_v51, %v3054_v43  ;;  %v3053_v39 = vmul.f32 0.0078125, %v3048_v44  ;;  %3063 = vadd.xlane.f32.xlu0 %v3059_v35  ;;  %v3060_v41 = vmul.f32 %v3056_v40, %v3056_v40  ;;  %v7581_v43 = vld [vmem:[%s10506_s29 + $0x10] sm:$0xff]   ;;  %v7582_v35 = vld [vmem:[%s10506_s29 + $0x58] sm:$0xff]  }
 0xfb7   : > { %v7583_v44 = vld [vmem:[%s10506_s29 + $0x18] sm:$0xff]  }
 0xfb8   : > { %v3057_v42 = vsub.f32 %v3039_v32, %v3053_v39  ;;  %3065 = vadd.xlane.f32.xlu1 %v3060_v41  ;;  %v3062_v46 = vmul.f32 %v9787_v12, %v9787_v12  ;;  %v7585_v39 = vld [vmem:[%s10506_s29 + $0x20] sm:$0xff]   ;;  %v7586_v41 = vld [vmem:[%s10506_s29 + $0x68] sm:$0xff]  }
 0xfba   : > { %v3061_v45 = vmul.f32 %v3057_v42, %v3057_v42 }
 0xfbc   : > { %3067 = vadd.xlane.f32.xlu0 %v3061_v45  ;;  %3069 = vadd.xlane.f32.xlu1 %v3062_v46  ;;  %v7588_v45 = vld [vmem:[%s10506_s29 + $0x70] sm:$0xff]  }
 0xfbd   : > { %v7589_v46 = vld [vmem:[%s10506_s29 + $0x30] sm:$0xff]  }
0x1043   : > { %v3064_v61 = vpop.xlane.xlu0 %3063 }
0x1044   : > { %v3071_v62 = vmul.f32 0.0078125, %v3064_v61 }
0x1045   : > { %v3066_v63 = vpop.xlane.xlu1 %3065 }
0x1046   : > { %v3075_v0 = vadd.f32 1e-12, %v3071_v62  ;;  %v3072_v3 = vmul.f32 0.0078125, %v3066_v63 }
0x1048   : > { %7774 = vrsqrt.f32 %v3075_v0  ;;  %v3076_v4 = vadd.f32 1e-12, %v3072_v3 }
0x1049   : > { %v3068_v5 = vpop.xlane.xlu0 %3067  ;;  %v3070_v6 = vpop.xlane.xlu1 %3069 }
0x104a   : > { %7776 = vrsqrt.f32 %v3076_v4  ;;  %v3073_v7 = vmul.f32 0.0078125, %v3068_v5  ;;  %v3074_v8 = vmul.f32 0.0078125, %v3070_v6 }
0x104c   : > { %v3077_v9 = vadd.f32 1e-12, %v3073_v7  ;;  %v3078_v14 = vadd.f32 1e-12, %v3074_v8 }
0x104e   : > { %7778 = vrsqrt.f32 %v3077_v9 }
0x104f   : > { %7780 = vrsqrt.f32 %v3078_v14 }
0x1052   : > { %v7775_v15 = vpop.eup %7774 }
0x1053   : > { %v3083_v18 = vmul.f32 %v7775_v15, %v3055_v38  ;;  %v7577_v38 = vld [vmem:[%s10506_s29] sm:$0xff]  }
0x1054   : > { %v7777_v20 = vpop.eup %7776  ;;  %6683 = vmatpush3.bf16.msra.mxu0 %v7577_v38 }
0x1055   : > { %v3084_v21 = vmul.f32 %v7777_v20, %v3056_v40  ;;  %v3093_v22 = vmul.f32 %v6361_v16, %v3083_v18  ;;  %6684 = vmatprep.subr.bf16.mxu0 %v7578_v10  ;;  %v7580_v40 = vld [vmem:[%s10506_s29 + $0x50] sm:$0xff]  }
0x1057   : > { %v3094_v27 = vmul.f32 %v6361_v16, %v3084_v21  ;;  %v9803_v50 = vadd.f32 %v6362_v26, %v3093_v22 }
0x1058   : > { %v7779_v28 = vpop.eup %7778  ;;  %6685 = vmatpush3.bf16.msra.mxu0 %v7579_v24 }
0x1059   : > { %v7781_v30 = vpop.eup %7780  ;;  %v9805_v31 = vadd.f32 %v6362_v26, %v3094_v27  ;;  %v3085_v51 = vmul.f32 %v7779_v28, %v3057_v42  ;;  %6686 = vmatprep.subr.bf16.mxu0 %v7580_v40  ;;  %v7587_v42 = vld [vmem:[%s10506_s29 + $0x28] sm:$0xff]  }
0x105a   : > { %v3086_v32 = vmul.f32 %v7781_v30, %v9787_v12  ;;  %v7584_v12 = vld [vmem:[%s10506_s29 + $0x60] sm:$0xff]  }
0x105b   : > { %v3107_v33 = vpack.c.bf16 %v9805_v31, %v9803_v50  ;;  %v3095_v11 = vmul.f32 %v6361_v16, %v3085_v51 }
0x105c   : > { %v3096_v34 = vmul.f32 %v6361_v16, %v3086_v32  ;;  %6687 = vmatpush3.bf16.msra.mxu0 %v7581_v43 }
0x105d   : > { %3250 = vmatmul.mubr.bf16.vlgmr.msra.gmra.mrb[28].mxu1 %v3107_v33  ;;  %v9811_v13 = vadd.f32 %v6362_v26, %v3095_v11  ;;  %6688 = vmatprep.subr.bf16.mxu0 %v7582_v35 }
0x105e   : > { %3259 = vmatprep.mubr.bf16.mxu1 %v8829_v2  ;;  %v9813_v36 = vadd.f32 %v6362_v26, %v3096_v34 }
0x1060   : > { %v3108_v23 = vpack.c.bf16 %v9813_v36, %v9811_v13  ;;  %6689 = vmatpush3.bf16.msra.mxu0 %v7583_v44 }
0x1061   : > { %6690 = vmatprep.subr.bf16.mxu0 %v7584_v12 }
0x1064   : > { %6691 = vmatpush3.bf16.msra.mxu0 %v7585_v39 }
0x1065   : > { %3260 = vmatmul.mubr.bf16.gmra.mrb[32].mxu1 %v3108_v23  ;;  %6692 = vmatprep.subr.bf16.mxu0 %v7586_v41 }
0x1066   : > { %3813 = vmatprep.mubr.bf16.mxu1 %v8829_v2 }
0x1068   : > { %6693 = vmatpush3.bf16.msra.mxu0 %v7587_v42 }
0x1069   : > { %6694 = vmatprep.subr.bf16.mxu0 %v7588_v45 }
0x106c   : > { %6695 = vmatpush3.bf16.msra.mxu0 %v7589_v46 }
0x106d   : > { %6696 = vmatprep.subr.bf16.mxu0 %v7590_v47 }
0x1070   : > { %6697 = vmatpush3.bf16.msra.mxu0 %v7591_v48 }
0x1130   : > { %v3251_v54 = vpop.f32.mrb[28].mxu1 }
0x1131   : > { %v9836_v55 = vadd.f32 %v3251_v54, %v3130_v52  ;;  %v3253_v56 = vpop.f32.mrb[29].mxu1 }
0x1132   : > { %v9838_v57 = vadd.f32 %v3253_v56, %v3134_v53  ;;  %v3255_v58 = vpop.f32.mrb[30].mxu1 }
0x1133   : > { %v3270_v59 = vmul.f32 %v9836_v55, %v9836_v55  ;;  %v9842_v60 = vadd.f32 %v3255_v58, %v3130_v52  ;;  %v3257_v61 = vpop.f32.mrb[31].mxu1 }
0x1134   : > { %v3271_v62 = vmul.f32 %v9838_v57, %v9838_v57  ;;  %v9846_v63 = vadd.f32 %v3257_v61, %v3134_v53 }
0x1135   : > { %v3278_v0 = vmul.f32 %v3270_v59, %v9836_v55  ;;  %v3272_v3 = vmul.f32 %v9842_v60, %v9842_v60 }
0x1136   : > { %v3279_v4 = vmul.f32 %v3271_v62, %v9838_v57  ;;  %v3273_v5 = vmul.f32 %v9846_v63, %v9846_v63 }
0x1137   : > { %v3286_v6 = vmul.f32 0.044715, %v3278_v0  ;;  %v3280_v7 = vmul.f32 %v3272_v3, %v9842_v60 }
0x1138   : > { %v3287_v8 = vmul.f32 0.044715, %v3279_v4  ;;  %v3281_v9 = vmul.f32 %v3273_v5, %v9846_v63  ;;  %v3261_v14 = vpop.f32.mrb[32].mxu1 }
0x1139   : > { %v3294_v15 = vadd.f32 %v3286_v6, %v9836_v55  ;;  %v3288_v16 = vmul.f32 0.044715, %v3280_v7  ;;  %v9857_v18 = vadd.f32 %v3261_v14, %v3130_v52  ;;  %v3263_v20 = vpop.f32.mrb[33].mxu1 }
0x113a   : > { %v3295_v21 = vadd.f32 %v3287_v8, %v9838_v57  ;;  %v3289_v22 = vmul.f32 0.044715, %v3281_v9  ;;  %v9860_v26 = vadd.f32 %v3263_v20, %v3134_v53  ;;  %v3265_v27 = vpop.f32.mrb[34].mxu1 }
0x113b   : > { %v3302_v28 = vmul.f32 0.7978846, %v3294_v15  ;;  %v3296_v30 = vadd.f32 %v3288_v16, %v9842_v60  ;;  %v3274_v51 = vmul.f32 %v9857_v18, %v9857_v18  ;;  %v9865_v32 = vadd.f32 %v3265_v27, %v3130_v52  ;;  %v3267_v33 = vpop.f32.mrb[35].mxu1 }
0x113c   : > { %v3303_v11 = vmul.f32 0.7978846, %v3295_v21  ;;  %v3297_v34 = vadd.f32 %v3289_v22, %v9846_v63  ;;  %v3275_v23 = vmul.f32 %v9860_v26, %v9860_v26  ;;  %v9870_v37 = vadd.f32 %v3267_v33, %v3134_v53 }
0x113d   : > { %7782 = vtanh.f32 %v3302_v28  ;;  %v3304_v38 = vmul.f32 0.7978846, %v3296_v30  ;;  %v3282_v10 = vmul.f32 %v3274_v51, %v9857_v18  ;;  %v3276_v24 = vmul.f32 %v9865_v32, %v9865_v32 }
0x113e   : > { %7784 = vtanh.f32 %v3303_v11  ;;  %v3305_v40 = vmul.f32 0.7978846, %v3297_v34  ;;  %v3283_v43 = vmul.f32 %v3275_v23, %v9860_v26  ;;  %v3277_v35 = vmul.f32 %v9870_v37, %v9870_v37 }
0x113f   : > { %7786 = vtanh.f32 %v3304_v38  ;;  %v3290_v44 = vmul.f32 0.044715, %v3282_v10  ;;  %v3284_v12 = vmul.f32 %v3276_v24, %v9865_v32 }
0x1140   : > { %7788 = vtanh.f32 %v3305_v40  ;;  %v3291_v39 = vmul.f32 0.044715, %v3283_v43  ;;  %v3285_v41 = vmul.f32 %v3277_v35, %v9870_v37 }
0x1141   : > { %v3298_v42 = vadd.f32 %v3290_v44, %v9857_v18  ;;  %v3292_v45 = vmul.f32 0.044715, %v3284_v12  ;;  %v6379_v12 = vld [vmem:[#allocation27] ss:$0 sm:$0xff] }
0x1142   : > { %v3299_v46 = vadd.f32 %v3291_v39, %v9860_v26  ;;  %v3293_v47 = vmul.f32 0.044715, %v3285_v41 }
0x1143   : > { %v3306_v48 = vmul.f32 0.7978846, %v3298_v42  ;;  %v3300_v49 = vadd.f32 %v3292_v45, %v9865_v32 }
0x1144   : > { %v3307_v52 = vmul.f32 0.7978846, %v3299_v46  ;;  %v3301_v53 = vadd.f32 %v3293_v47, %v9870_v37 }
0x1145   : > { %7790 = vtanh.f32 %v3306_v48  ;;  %v3308_v54 = vmul.f32 0.7978846, %v3300_v49 }
0x1146   : > { %7792 = vtanh.f32 %v3307_v52  ;;  %v3309_v56 = vmul.f32 0.7978846, %v3301_v53 }
0x1147   : > { %v7783_v58 = vpop.eup %7782  ;;  %7794 = vtanh.f32 %v3308_v54 }
0x1148   : > { %v7785_v59 = vpop.eup %7784  ;;  %v3318_v61 = vadd.f32 1.0, %v7783_v58  ;;  %7796 = vtanh.f32 %v3309_v56 }
0x1149   : > { %v7787_v62 = vpop.eup %7786  ;;  %v3319_v0 = vadd.f32 1.0, %v7785_v59 }
0x114a   : > { %v7789_v3 = vpop.eup %7788  ;;  %v3326_v4 = vmul.f32 0.5, %v3318_v61  ;;  %v3320_v5 = vadd.f32 1.0, %v7787_v62  ;;  %v7592_v61 = vld [vmem:[%s10501_s17 + $0xc0] ss:$12 sps:$4 sm:$0xff]   ;;  %v7594_v62 = vld [vmem:[%s10501_s17 + $0xc4] ss:$12 sps:$4 sm:$0xff]  }
0x114b   : > { %v3321_v6 = vadd.f32 1.0, %v7789_v3  ;;  %v3327_v7 = vmul.f32 0.5, %v3319_v0  ;;  %v7597_v0 = vld [vmem:[%s10501_s17 + $0xdc] ss:$12 sps:$4 sm:$0xff]   ;;  %3781 = vmatprep.subr.bf16.mxu1 %v7594_v62 }
0x114c   : > { %v3328_v8 = vmul.f32 0.5, %v3320_v5  ;;  %v3334_v14 = vmul.f32 %v3326_v4, %v9836_v55  ;;  %3782 = vmatpush1.bf16.msra.mxu1 %v7592_v61  ;;  %v6397_v61 = vld [vmem:[#allocation30] ss:$0 sm:$0xff] }
0x114d   : > { %v3329_v9 = vmul.f32 0.5, %v3321_v6  ;;  %v3335_v20 = vmul.f32 %v3327_v7, %v9838_v57  ;;  %3783 = vmatprep.subr.bf16.mxu1 %v7597_v0 }
0x114e   : > { %v3336_v15 = vmul.f32 %v3328_v8, %v9842_v60 }
0x114f   : > { %v7791_v16 = vpop.eup %7790  ;;  %v3337_v21 = vmul.f32 %v3329_v9, %v9846_v63 }
0x1150   : > { %v7793_v22 = vpop.eup %7792  ;;  %v3342_v27 = vpack.c.bf16 %v3336_v15, %v3334_v14  ;;  %v3322_v28 = vadd.f32 1.0, %v7791_v16 }
0x1151   : > { %v7795_v30 = vpop.eup %7794  ;;  %v3343_v51 = vpack.c.bf16 %v3337_v21, %v3335_v20  ;;  %v3323_v33 = vadd.f32 1.0, %v7793_v22 }
0x1152   : > { %v7797_v11 = vpop.eup %7796  ;;  %v3324_v34 = vadd.f32 1.0, %v7795_v30  ;;  %v3330_v23 = vmul.f32 0.5, %v3322_v28  ;;  %v7600_v28 = vld [vmem:[%s10501_s17 + $0xf4] ss:$12 sps:$4 sm:$0xff]  }
0x1153   : > { %3513 = vmatprep.mubr.bf16.mxu0 %v3343_v51  ;;  %v3325_v38 = vadd.f32 1.0, %v7797_v11  ;;  %v3331_v10 = vmul.f32 0.5, %v3323_v33  ;;  %v7601_v30 = vld [vmem:[%s10501_s17 + $0xc8] ss:$12 sps:$4 sm:$0xff]   ;;  %v7598_v51 = vld [vmem:[%s10501_s17 + $0xf0] ss:$12 sps:$4 sm:$0xff]  }
0x1154   : > { %3514 = vmatmul.mubr.bf16.vlgmr.msra.gmra.mrb[24].mxu0 %v3342_v27  ;;  %v3332_v55 = vmul.f32 0.5, %v3324_v34  ;;  %v3338_v24 = vmul.f32 %v3330_v23, %v9857_v18  ;;  %6942 = vmatprep.subr.bf16.mxu0 %v7601_v30  ;;  %v7604_v33 = vld [vmem:[%s10501_s17 + $0x10c] ss:$12 sps:$4 sm:$0xff]   ;;  %v7602_v34 = vld [vmem:[%s10501_s17 + $0x108] ss:$12 sps:$4 sm:$0xff]  }
0x1155   : > { %v3333_v60 = vmul.f32 0.5, %v3325_v38  ;;  %v3339_v63 = vmul.f32 %v3331_v10, %v9860_v26  ;;  %6943 = vmatpush3.bf16.msra.mxu0 %v7601_v30  ;;  %v7605_v11 = vld [vmem:[%s10501_s17 + $0xe0] ss:$12 sps:$4 sm:$0xff]   ;;  %v7608_v23 = vld [vmem:[%s10501_s17 + $0x124] ss:$12 sps:$4 sm:$0xff]  }
0x1156   : > { %v3340_v57 = vmul.f32 %v3332_v55, %v9865_v32  ;;  %6944 = vmatprep.subr.bf16.mxu0 %v7605_v11  ;;  %v7609_v38 = vld [vmem:[%s10501_s17 + $0xf8] ss:$12 sps:$4 sm:$0xff]   ;;  %v7606_v10 = vld [vmem:[%s10501_s17 + $0x120] ss:$12 sps:$4 sm:$0xff]   ;;  %v7612_v55 = vld [vmem:[%s10501_s17 + $0x13c] ss:$12 sps:$4 sm:$0xff]  }
0x1157   : > { %v3341_v40 = vmul.f32 %v3333_v60, %v9870_v37  ;;  %v7613_v60 = vld [vmem:[%s10501_s17 + $0x110] ss:$12 sps:$4 sm:$0xff]  }
0x1158   : > { %v3344_v43 = vpack.c.bf16 %v3340_v57, %v3338_v24  ;;  %v7610_v24 = vld [vmem:[%s10501_s17 + $0x138] ss:$12 sps:$4 sm:$0xff]   ;;  %v7616_v57 = vld [vmem:[%s10501_s17 + $0x154] ss:$12 sps:$4 sm:$0xff]  }
0x1159   : > { %v3345_v35 = vpack.c.bf16 %v3341_v40, %v3339_v63  ;;  %6945 = vmatpush3.bf16.msra.mxu0 %v7605_v11  ;;  %v7617_v63 = vld [vmem:[%s10501_s17 + $0x128] ss:$12 sps:$4 sm:$0xff]   ;;  %v7614_v40 = vld [vmem:[%s10501_s17 + $0x150] ss:$12 sps:$4 sm:$0xff]  }
0x115a   : > { %6946 = vmatprep.subr.bf16.mxu0 %v7609_v38 }
0x115b   : > { %3521 = vmatprep.mubr.bf16.mxu0 %v3345_v35  ;;  %v7620_v35 = vld [vmem:[%s10501_s17 + $0x16c] ss:$12 sps:$4 sm:$0xff]  }
0x115c   : > { %3522 = vmatmul.mubr.bf16.gmra.mrb[28].mxu0 %v3344_v43  ;;  %v7618_v43 = vld [vmem:[%s10501_s17 + $0x168] ss:$12 sps:$4 sm:$0xff]  }
0x115d   : > { %6947 = vmatpush3.bf16.msra.mxu0 %v7609_v38 }
0x115e   : > { %6948 = vmatprep.subr.bf16.mxu0 %v7613_v60 }
0x1161   : > { %6949 = vmatpush3.bf16.msra.mxu0 %v7613_v60 }
0x1162   : > { %6950 = vmatprep.subr.bf16.mxu0 %v7617_v63 }
0x1165   : > { %6951 = vmatpush3.bf16.msra.mxu0 %v7617_v63 }
0x1227   : > { %v6698_v44 = vpop.f32.mrb[24].mxu0 }
0x1228   : > { %v6699_v39 = vpop.f32.mrb[25].mxu0 }
0x1229   : > { %v6700_v41 = vadd.f32 %v6699_v39, %v6698_v44  ;;  %v6701_v42 = vpop.f32.mrb[26].mxu0  ;;  %v7621_v44 = vld [vmem:[%s10501_s17 + $0x140] ss:$12 sps:$4 sm:$0xff]   ;;  %v7623_v39 = vld [vmem:[%s10501_s17 + $0x170] ss:$12 sps:$4 sm:$0xff]  }
0x122a   : > { %v6702_v45 = vpop.f32.mrb[27].mxu0  ;;  %6952 = vmatprep.subr.bf16.mxu0 %v7621_v44 }
0x122b   : > { %v3516_v46 = vadd.f32 %v6700_v41, %v6379_v12  ;;  %v6703_v47 = vadd.f32 %v6702_v45, %v6701_v42  ;;  %6953 = vmatpush3.bf16.msra.mxu0 %v7621_v44 }
0x122d   : > { %v3519_v48 = vadd.f32 %v6703_v47, %v6379_v12  ;;  %v3530_v18 = vadd.f32 %v3516_v46, %v9803_v50 }
0x122f   : > { %3536 = vadd.xlane.f32.xlu0 %v3530_v18  ;;  %v6704_v26 = vpop.f32.mrb[28].mxu0  ;;  %v3531_v32 = vadd.f32 %v3519_v48, %v9805_v31  ;;  %v7595_v31 = vld [vmem:[%s10501_s17 + $0xd8] ss:$12 sps:$4 sm:$0xff]  }
0x1230   : > { %v6705_v37 = vpop.f32.mrb[29].mxu0  ;;  %3784 = vmatpush1.bf16.msra.mxu1 %v7595_v31 }
0x1231   : > { %v6706_v49 = vadd.f32 %v6705_v37, %v6704_v26  ;;  %3538 = vadd.xlane.f32.xlu1 %v3531_v32  ;;  %v6707_v52 = vpop.f32.mrb[30].mxu0  ;;  %3785 = vmatprep.subr.bf16.mxu1 %v7600_v28 }
0x1232   : > { %v6708_v53 = vpop.f32.mrb[31].mxu0 }
0x1233   : > { %v3524_v54 = vadd.f32 %v6706_v49, %v6379_v12  ;;  %v6709_v56 = vadd.f32 %v6708_v53, %v6707_v52 }
0x1234   : > { %3786 = vmatpush1.bf16.msra.mxu1 %v7598_v51 }
0x1235   : > { %v3527_v58 = vadd.f32 %v6709_v56, %v6379_v12  ;;  %v3532_v59 = vadd.f32 %v3524_v54, %v9811_v13  ;;  %3787 = vmatprep.subr.bf16.mxu1 %v7604_v33  ;;  %v7622_v12 = vld [vmem:[%s10501_s17 + $0x158] ss:$12 sps:$4 sm:$0xff]   ;;  %v6396_v54 = vld [vmem:[#allocation29] ss:$0 sm:$0xff] }
0x1236   : > { %6954 = vmatprep.subr.bf16.mxu0 %v7622_v12 }
0x1237   : > { %3540 = vadd.xlane.f32.xlu0 %v3532_v59  ;;  %v3533_v50 = vadd.f32 %v3527_v58, %v9813_v36  ;;  %6955 = vmatpush3.bf16.msra.mxu0 %v7622_v12 }
0x1238   : > { %3788 = vmatpush1.bf16.msra.mxu1 %v7602_v34  ;;  %6956 = vmatprep.subr.bf16.mxu0 %v7623_v39 }
0x1239   : > { %3542 = vadd.xlane.f32.xlu1 %v3533_v50  ;;  %3789 = vmatprep.subr.bf16.mxu1 %v7608_v23 }
0x123b   : > { %6957 = vmatpush3.bf16.msra.mxu0 %v7623_v39 }
0x123c   : > { %3790 = vmatpush1.bf16.msra.mxu1 %v7606_v10 }
0x123d   : > { %3791 = vmatprep.subr.bf16.mxu1 %v7612_v55 }
0x1240   : > { %3792 = vmatpush1.bf16.msra.mxu1 %v7610_v24 }
0x1241   : > { %3793 = vmatprep.subr.bf16.mxu1 %v7616_v57 }
0x1244   : > { %3794 = vmatpush1.bf16.msra.mxu1 %v7614_v40 }
0x1245   : > { %3795 = vmatprep.subr.bf16.mxu1 %v7620_v35 }
0x1248   : > { %3796 = vmatpush1.bf16.msra.mxu1 %v7618_v43 }
0x12bc   : > { %v3537_v3 = vpop.xlane.xlu0 %3536 }
0x12bd   : > { %v3544_v4 = vmul.f32 0.0078125, %v3537_v3 }
0x12be   : > { %v3539_v5 = vpop.xlane.xlu1 %3538 }
0x12bf   : > { %v9900_v6 = vsub.f32 %v3530_v18, %v3544_v4  ;;  %v3545_v7 = vmul.f32 0.0078125, %v3539_v5 }
0x12c1   : > { %v9902_v13 = vsub.f32 %v3531_v32, %v3545_v7  ;;  %v3552_v36 = vmul.f32 %v9900_v6, %v9900_v6 }
0x12c3   : > { %3556 = vadd.xlane.f32.xlu0 %v3552_v36  ;;  %v3553_v8 = vmul.f32 %v9902_v13, %v9902_v13 }
0x12c4   : > { %v3541_v9 = vpop.xlane.xlu0 %3540 }
0x12c5   : > { %v3546_v14 = vmul.f32 0.0078125, %v3541_v9  ;;  %3558 = vadd.xlane.f32.xlu1 %v3553_v8 }
0x12c6   : > { %v3543_v15 = vpop.xlane.xlu1 %3542 }
0x12c7   : > { %v9908_v16 = vsub.f32 %v3532_v59, %v3546_v14  ;;  %v3547_v20 = vmul.f32 0.0078125, %v3543_v15  ;;  %v3636_v15 = vld [vmem:[#allocation20 + $0x3] sm:$0x7] }
0x12c8   : > { %v3649_v55 = vrot.slane %v3636_v15, %v9539_v25 }
0x12c9   : > { %v9910_v21 = vsub.f32 %v3533_v50, %v3547_v20  ;;  %v3554_v22 = vmul.f32 %v9908_v16, %v9908_v16 }
0x12cb   : > { %3560 = vadd.xlane.f32.xlu0 %v3554_v22  ;;  %v3555_v27 = vmul.f32 %v9910_v21, %v9910_v21  ;;  %v3645_v22 = vrot.slane %v3636_v15, %v9535_v19 }
0x12cd   : > { %3562 = vadd.xlane.f32.xlu1 %v3555_v27 }
0x1350   : > { %v3557_v41 = vpop.xlane.xlu0 %3556 }
0x1351   : > { %v3564_v42 = vmul.f32 0.0078125, %v3557_v41 }
0x1352   : > { %v3559_v45 = vpop.xlane.xlu1 %3558 }
0x1353   : > { %v3568_v46 = vadd.f32 1e-12, %v3564_v42  ;;  %v3565_v47 = vmul.f32 0.0078125, %v3559_v45 }
0x1355   : > { %7798 = vrsqrt.f32 %v3568_v46  ;;  %v3569_v48 = vadd.f32 1e-12, %v3565_v47 }
0x1357   : > { %7800 = vrsqrt.f32 %v3569_v48 }
0x1358   : > { %v3561_v18 = vpop.xlane.xlu0 %3560 }
0x1359   : > { %v3566_v26 = vmul.f32 0.0078125, %v3561_v18 }
0x135a   : > { %v3563_v32 = vpop.xlane.xlu1 %3562 }
0x135b   : > { %v3570_v37 = vadd.f32 1e-12, %v3566_v26  ;;  %v3567_v49 = vmul.f32 0.0078125, %v3563_v32 }
0x135d   : > { %7802 = vrsqrt.f32 %v3570_v37  ;;  %v3571_v52 = vadd.f32 1e-12, %v3567_v49 }
0x135f   : > { %v7799_v53 = vpop.eup %7798  ;;  %7804 = vrsqrt.f32 %v3571_v52 }
0x1360   : > { %v3576_v56 = vmul.f32 %v7799_v53, %v9900_v6 }
0x1361   : > { %v7801_v58 = vpop.eup %7800 }
0x1362   : > { %v3586_v59 = vmul.f32 %v6396_v54, %v3576_v56  ;;  %v3577_v50 = vmul.f32 %v7801_v58, %v9902_v13 }
0x1364   : > { %v3587_v62 = vmul.f32 %v6396_v54, %v3577_v50  ;;  %v9938_v0 = vadd.f32 %v6397_v61, %v3586_v59 }
0x1366   : > { %v9940_v31 = vadd.f32 %v6397_v61, %v3587_v62 }
0x1367   : > { %v7803_v3 = vpop.eup %7802 }
0x1368   : > { %v3600_v4 = vpack.c.bf16 %v9940_v31, %v9938_v0  ;;  %v3578_v5 = vmul.f32 %v7803_v3, %v9908_v16  ;;  %v3641_v16 = vrot.slane %v3636_v15, %v9529_v17 }
0x1369   : > { %v7805_v7 = vpop.eup %7804 }
0x136a   : > { %3814 = vmatmul.mubr.bf16.vlgmr.msra.gmra.mrb[36].mxu1 %v3600_v4  ;;  %6958 = vmatprep.mubr.bf16.mxu0 %v3600_v4  ;;  %v3579_v6 = vmul.f32 %v7805_v7, %v9910_v21  ;;  %v3588_v36 = vmul.f32 %v6396_v54, %v3578_v5 }
0x136b   : > { %3823 = vmatprep.mubr.bf16.mxu1 %v8829_v2 }
0x136c   : > { %v3589_v13 = vmul.f32 %v6396_v54, %v3579_v6  ;;  %v9947_v8 = vadd.f32 %v6397_v61, %v3588_v36 }
0x136e   : > { %v9949_v9 = vadd.f32 %v6397_v61, %v3589_v13 }
0x1370   : > { %v3601_v14 = vpack.c.bf16 %v9949_v9, %v9947_v8 }
0x1372   : > { %3824 = vmatmul.mubr.bf16.gmra.mrb[40].mxu1 %v3601_v14  ;;  %6959 = vmatmul.mubr.bf16.vlgmr.msra.gmra.mrb[32].mxu0 %v3601_v14 }
0x143d   : > { %v3815_v20 = vpop.f32.mrb[36].mxu1 }
0x143e   : > { %v3816_v21 = vadd.f32 %v3815_v20, %v3641_v16  ;;  %v3817_v27 = vpop.f32.mrb[37].mxu1 }
0x143f   : > { %v3819_v28 = vpop.f32.mrb[38].mxu1  ;;  %v3818_v33 = vadd.f32 %v3817_v27, %v3645_v22 }
0x1440   : > { %v3820_v30 = vadd.f32 %v3819_v28, %v3641_v16  ;;  %v3821_v51 = vpop.f32.mrb[39].mxu1  ;;  %v3883_v34 = vmul.f32 0.17677669, %v3816_v21 }
0x1441   : > { %v3822_v11 = vadd.f32 %v3821_v51, %v3645_v22 }
0x1442   : > { %v3884_v23 = vmul.f32 0.17677669, %v3820_v30 }
0x1443   : > { %v9955_v38 = vpack.c.bf16 %v3822_v11, %v3818_v33 }
0x1444   : > { %v9957_v10 = vpack.c.bf16 %v3884_v23, %v3883_v34 }
0x1445   : > { %v3825_v60 = vpop.f32.mrb[40].mxu1  ;;  %v6960_v24 = vpop.f32.mrb[32].mxu0  ;;  %7134 = vmatprep.subr.msk.bf16.mxu1 %vm2173_vm2, %v9955_v38  ;;  %v3898_v57 = vsel %vm2173_vm2, %v9955_v38, 0 }
0x1446   : > { %v3826_v63 = vadd.f32 %v3825_v60, %v3641_v16  ;;  %v3827_v40 = vpop.f32.mrb[41].mxu1  ;;  %v3868_v43 = vpop.f32.mrb[33].mxu0  ;;  %6963 = vmatpush3.bf16.xpose.msra.mxu1 %v3898_v57  ;;  %6966 = vmatprep.mubr.msk.bf16.mxu1 %vm2173_vm2, %v9957_v10  ;;  %v3877_v12 = vadd.f32 %v6960_v24, %v3649_v55 }
0x1447   : > { %v3829_v35 = vpop.f32.mrb[42].mxu1  ;;  %v6961_v44 = vpop.f32.mrb[34].mxu0  ;;  %v3828_v45 = vadd.f32 %v3827_v40, %v3645_v22  ;;  %v3869_v46 = vadd.f32 %v3868_v43, %v3649_v55 }
0x1448   : > { %v3830_v39 = vadd.f32 %v3829_v35, %v3641_v16  ;;  %v3880_v25 = vadd.f32 %v6961_v44, %v3649_v55  ;;  %v3831_v41 = vpop.f32.mrb[43].mxu1  ;;  %v3871_v42 = vpop.f32.mrb[35].mxu0  ;;  %v3885_v18 = vmul.f32 0.17677669, %v3826_v63 }
0x1449   : > { %v3832_v47 = vadd.f32 %v3831_v41, %v3645_v22  ;;  %v3872_v48 = vadd.f32 %v3871_v42, %v3649_v55 }
0x144a   : > { %v3886_v26 = vmul.f32 0.17677669, %v3830_v39  ;;  %v9966_v32 = vpack.c.bf16 %v3880_v25, %v3877_v12 }
0x144b   : > { %v9968_v37 = vpack.c.bf16 %v3832_v47, %v3828_v45  ;;  %v9970_v49 = vpack.c.bf16 %v3872_v48, %v3869_v46 }
0x144c   : > { %v9972_v52 = vpack.c.bf16 %v3886_v26, %v3885_v18 }
0x144d   : > { %7135 = vmatprep.subr.msk.bf16.mxu1 %vm2173_vm2, %v9968_v37  ;;  %v3901_v53 = vsel %vm2173_vm2, %v9968_v37, 0 }
0x144e   : > { %6965 = vmatpush3.bf16.xpose.msra.mxu1 %v3901_v53 }
0x144f   : > { %6970 = vmatprep.subr.bf16.mxu1 %v9970_v49 }
0x1455   : > { %6967 = vmatmul.mubr.msk.bf16.vlgmr.msra.gmra.mrb[44].mxu1 %vm2173_vm2, %v9972_v52 }
0x1456   : > { %6971 = vmatpush3.bf16.msra.mxu1 %v9970_v49 }
0x1457   : > { %6972 = vmatprep.subr.bf16.mxu1 %v9966_v32 }
0x145a   : > { %6973 = vmatpush3.bf16.msra.mxu1 %v9966_v32 }
0x1528   : > { %v6968_v54 = vpop.f32.mrb[44].mxu1 }
0x1529   : > { %v3937_v56 = vpop.f32.mrb[45].mxu1  ;;  %v3946_v61 = vadd.f32 %v6968_v54, %v9641_v29 }
0x152a   : > { %v3938_v58 = vadd.f32 %v3937_v56, %v9641_v29  ;;  %v6969_v59 = vpop.f32.mrb[46].mxu1 }
0x152b   : > { %v3940_v50 = vpop.f32.mrb[47].mxu1  ;;  %v3949_v4 = vadd.f32 %v6969_v59, %v9641_v29  ;;  %v3958_v7 = vsel %vm2173_vm2, %v3946_v61, -inf }
0x152c   : > { %v3941_v62 = vadd.f32 %v3940_v50, %v9641_v29  ;;  %v3952_v3 = vsel %vm2173_vm2, %v3938_v58, -inf }
0x152d   : > { %3953 = vmax.xlane.f32.xlu0 %v3952_v3  ;;  %v3961_v6 = vsel %vm2173_vm2, %v3949_v4, -inf }
0x152e   : > { %v3955_v5 = vsel %vm2173_vm2, %v3941_v62, -inf }
0x152f   : > { %3956 = vmax.xlane.f32.xlu1 %v3955_v5 }
0x1531   : > { %3959 = vmax.xlane.f32.xlu0 %v3958_v7 }
0x1533   : > { %3962 = vmax.xlane.f32.xlu1 %v3961_v6 }
0x15ba   : > { %v3954_v36 = vpop.xlane.xlu0 %3953 }
0x15bb   : > { %v3964_v13 = vsub.f32 %v3938_v58, %v3954_v36 }
0x15bc   : > { %v3957_v14 = vpop.xlane.xlu1 %3956 }
0x15bd   : > { %v3965_v15 = vsub.f32 %v3941_v62, %v3957_v14  ;;  %v3968_v21 = vmul.f32 1.442695, %v3964_v13 }
0x15be   : > { %v3960_v16 = vpop.xlane.xlu0 %3959 }
0x15bf   : > { %v3970_v20 = vmul.f32 1.442695, %v3965_v15  ;;  %v3966_v22 = vsub.f32 %v3946_v61, %v3960_v16 }
0x15c0   : > { %v3963_v27 = vpop.xlane.xlu1 %3962 }
0x15c1   : > { %7806 = vpow2.f32 %v3970_v20  ;;  %v3972_v28 = vmul.f32 1.442695, %v3966_v22  ;;  %v3967_v30 = vsub.f32 %v3949_v4, %v3963_v27 }
0x15c3   : > { %7808 = vpow2.f32 %v3972_v28  ;;  %v3974_v51 = vmul.f32 1.442695, %v3967_v30 }
0x15c4   : > { %7810 = vpow2.f32 %v3968_v21 }
0x15c5   : > { %7812 = vpow2.f32 %v3974_v51 }
0x15cb   : > { %v7807_v33 = vpop.eup %7806 }
0x15cc   : > { %v3979_v11 = vsel %vm2173_vm2, %v7807_v33, 0.0 }
0x15cd   : > { %v7809_v34 = vpop.eup %7808  ;;  %3980 = vadd.xlane.f32.xlu1 %v3979_v11 }
0x15ce   : > { %v7811_v23 = vpop.eup %7810  ;;  %v3982_v55 = vsel %vm2173_vm2, %v7809_v34, 0.0 }
0x15cf   : > { %v7813_v60 = vpop.eup %7812  ;;  %3983 = vadd.xlane.f32.xlu0 %v3982_v55  ;;  %v3976_v57 = vsel %vm2173_vm2, %v7811_v23, 0.0 }
0x15d0   : > { %v3985_v24 = vsel %vm2173_vm2, %v7813_v60, 0.0 }
0x15d1   : > { %3986 = vadd.xlane.f32.xlu1 %v3985_v24 }
0x15d3   : > { %3977 = vadd.xlane.f32.xlu0 %v3976_v57 }
0x15e2   : > { %4069 = vrot.lane.b32.xlu1 %v9968_v37, %s8834_s16 }
0x15e6   : > { %4061 = vrot.lane.b32.xlu1 %v9957_v10, %s8834_s16 }
0x15e9   : > { %4067 = vrot.lane.b32.xlu0 %v9955_v38, %s8834_s16 }
0x15ed   : > { %4063 = vrot.lane.b32.xlu0 %v9972_v52, %s8834_s16 }
0x165a   : > { %v3981_v63 = vpop.xlane.xlu1 %3980 }
0x165b   : > { %7814 = vrcp.f32 %v3981_v63 }
0x165c   : > { %v3984_v40 = vpop.xlane.xlu0 %3983 }
0x165e   : > { %v3987_v43 = vpop.xlane.xlu1 %3986 }
0x165f   : > { %7816 = vrcp.f32 %v3987_v43 }
0x1660   : > { %7818 = vrcp.f32 %v3984_v40  ;;  %v3978_v35 = vpop.xlane.xlu0 %3977 }
0x1661   : > { %7820 = vrcp.f32 %v3978_v35 }
0x1662   : > { %v4070_v45 = vpop.permute.xlu1 %4069 }
0x1663   : > { %v4081_v56 = vsel %vm2173_vm2, %v4070_v45, 0 }
0x1664   : > { %v4068_v44 = vpop.permute.xlu0 %4067 }
0x1665   : > { %7136 = vmatprep.subr.msk.bf16.mxu1 %vm2173_vm2, %v4068_v44  ;;  %v7815_v12 = vpop.eup %7814  ;;  %v4078_v53 = vsel %vm2173_vm2, %v4068_v44, 0 }
0x1666   : > { %v3993_v47 = vmul.f32 %v7815_v12, %v7807_v33  ;;  %v4062_v54 = vpop.permute.xlu1 %4061 }
0x1668   : > { %v4064_v58 = vpop.permute.xlu0 %4063 }
0x1669   : > { %v7817_v39 = vpop.eup %7816 }
0x166a   : > { %v7819_v25 = vpop.eup %7818  ;;  %v3995_v42 = vmul.f32 %v7817_v39, %v7813_v60 }
0x166b   : > { %v7821_v41 = vpop.eup %7820  ;;  %v3994_v48 = vmul.f32 %v7819_v25, %v7809_v34 }
0x166c   : > { %v3992_v46 = vmul.f32 %v7821_v41, %v7811_v23 }
0x166d   : > { %v3997_v26 = vpack.c.bf16 %v3995_v42, %v3994_v48 }
0x166e   : > { %v3996_v18 = vpack.c.bf16 %v3993_v47, %v3992_v46 }
0x1670   : > { %6974 = vmatprep.mubr.msk.bf16.mxu1 %vm2173_vm2, %v3996_v18 }
0x1671   : > { %6975 = vmatmul.mubr.msk.bf16.vlgmr.msra.gmra.mrb[48].mxu1 %vm2173_vm2, %v3997_v26 }
0x1672   : > { %6979 = vmatpush3.bf16.xpose.msra.mxu1 %v4078_v53  ;;  %6982 = vmatprep.mubr.msk.bf16.mxu1 %vm2173_vm2, %v4062_v54 }
0x1673   : > { %7137 = vmatprep.subr.msk.bf16.mxu1 %vm2173_vm2, %v4070_v45 }
0x167a   : > { %6981 = vmatpush3.bf16.xpose.msra.mxu1 %v4081_v56 }
0x1681   : > { %6983 = vmatmul.mubr.msk.bf16.vlgmr.msra.gmra.mrb[52].mxu1 %vm2173_vm2, %v4064_v58 }
0x1744   : > { %v6976_v59 = vpop.f32.mrb[48].mxu1 }
0x1745   : > { %v4040_v50 = vpop.f32.mrb[49].mxu1 }
0x1746   : > { %v6977_v61 = vpop.f32.mrb[50].mxu1 }
0x1747   : > { %v4056_v62 = vpack.c.bf16 %v6977_v61, %v6976_v59  ;;  %v4043_v3 = vpop.f32.mrb[51].mxu1 }
0x1748   : > { %v4055_v4 = vpack.c.bf16 %v4043_v3, %v4040_v50 }
0x1749   : > { %4058 = vst.msk [vmem:[#allocation2 + $0x8] sm:$0xff] %vm2173_vm2, %v4056_v62 }
0x174a   : > { %4057 = vst.msk [vmem:[#allocation2] sm:$0xff] %vm2173_vm2, %v4055_v4 }
0x1754   : > { %v6984_v5 = vpop.f32.mrb[52].mxu1 }
0x1755   : > { %v4117_v7 = vpop.f32.mrb[53].mxu1  ;;  %v4126_v20 = vadd.f32 %v6984_v5, %v9641_v29 }
0x1756   : > { %v4118_v6 = vadd.f32 %v4117_v7, %v9641_v29  ;;  %v6985_v36 = vpop.f32.mrb[54].mxu1 }
0x1757   : > { %v4120_v13 = vpop.f32.mrb[55].mxu1  ;;  %v4129_v14 = vadd.f32 %v6985_v36, %v9641_v29  ;;  %v4138_v27 = vsel %vm2173_vm2, %v4126_v20, -inf }
0x1758   : > { %v4121_v15 = vadd.f32 %v4120_v13, %v9641_v29  ;;  %v4132_v16 = vsel %vm2173_vm2, %v4118_v6, -inf }
0x1759   : > { %4133 = vmax.xlane.f32.xlu1 %v4132_v16  ;;  %v4141_v21 = vsel %vm2173_vm2, %v4129_v14, -inf }
0x175a   : > { %v4135_v22 = vsel %vm2173_vm2, %v4121_v15, -inf }
0x175b   : > { %4136 = vmax.xlane.f32.xlu0 %v4135_v22 }
0x175d   : > { %4142 = vmax.xlane.f32.xlu1 %v4141_v21 }
0x175f   : > { %4139 = vmax.xlane.f32.xlu0 %v4138_v27 }
0x176e   : > { %4182 = vrot.lane.b32.xlu1 %v9966_v32, %s8834_s16 }
0x17e6   : > { %v4134_v28 = vpop.xlane.xlu1 %4133 }
0x17e7   : > { %v4144_v11 = vsub.f32 %v4118_v6, %v4134_v28 }
0x17e8   : > { %v4137_v30 = vpop.xlane.xlu0 %4136 }
0x17e9   : > { %v4145_v51 = vsub.f32 %v4121_v15, %v4137_v30  ;;  %v4148_v57 = vmul.f32 1.442695, %v4144_v11 }
0x17ea   : > { %v4143_v33 = vpop.xlane.xlu1 %4142 }
0x17eb   : > { %v4147_v34 = vsub.f32 %v4129_v14, %v4143_v33  ;;  %v4150_v23 = vmul.f32 1.442695, %v4145_v51 }
0x17ec   : > { %v4140_v55 = vpop.xlane.xlu0 %4139 }
0x17ed   : > { %v4154_v60 = vmul.f32 1.442695, %v4147_v34  ;;  %v4146_v24 = vsub.f32 %v4126_v20, %v4140_v55 }
0x17ee   : > { %v4183_v42 = vpop.permute.xlu1 %4182 }
0x17ef   : > { %7822 = vpow2.f32 %v4154_v60  ;;  %v4152_v63 = vmul.f32 1.442695, %v4146_v24 }
0x17f0   : > { %7824 = vpow2.f32 %v4150_v23 }
0x17f1   : > { %7826 = vpow2.f32 %v4152_v63 }
0x17f2   : > { %7828 = vpow2.f32 %v4148_v57 }
0x17f9   : > { %v7823_v40 = vpop.eup %7822 }
0x17fa   : > { %v7825_v43 = vpop.eup %7824  ;;  %v4165_v35 = vsel %vm2173_vm2, %v7823_v40, 0.0 }
0x17fb   : > { %v7827_v44 = vpop.eup %7826  ;;  %4166 = vadd.xlane.f32.xlu1 %v4165_v35  ;;  %v4159_v25 = vsel %vm2173_vm2, %v7825_v43, 0.0 }
0x17fc   : > { %v4162_v12 = vsel %vm2173_vm2, %v7827_v44, 0.0  ;;  %v7829_v39 = vpop.eup %7828 }
0x17fd   : > { %4163 = vadd.xlane.f32.xlu0 %v4162_v12  ;;  %v4156_v41 = vsel %vm2173_vm2, %v7829_v39, 0.0 }
0x17ff   : > { %4160 = vadd.xlane.f32.xlu1 %v4159_v25 }
0x1801   : > { %4157 = vadd.xlane.f32.xlu0 %v4156_v41 }
0x1810   : > { %4257 = vrot.lane.b32.xlu1 %v9955_v38, %s8835_s11 }
0x1814   : > { %4253 = vrot.lane.b32.xlu1 %v9957_v10, %s8835_s11 }
0x1817   : > { %4180 = vrot.lane.b32.xlu0 %v9970_v49, %s8834_s16 }
0x181b   : > { %4259 = vrot.lane.b32.xlu0 %v9968_v37, %s8835_s11 }
0x181f   : > { %4255 = vrot.lane.b32.xlu0 %v9972_v52, %s8835_s11 }
0x1888   : > { %v4167_v45 = vpop.xlane.xlu1 %4166 }
0x188a   : > { %v4164_v46 = vpop.xlane.xlu0 %4163 }
0x188b   : > { %7830 = vrcp.f32 %v4164_v46 }
0x188c   : > { %v4161_v47 = vpop.xlane.xlu1 %4160 }
0x188d   : > { %7832 = vrcp.f32 %v4161_v47 }
0x188e   : > { %7834 = vrcp.f32 %v4167_v45  ;;  %v4158_v48 = vpop.xlane.xlu0 %4157 }
0x188f   : > { %7836 = vrcp.f32 %v4158_v48 }
0x1890   : > { %v4258_v56 = vpop.permute.xlu1 %4257 }
0x1891   : > { %v4268_v7 = vsel %vm2173_vm2, %v4258_v56, 0 }
0x1892   : > { %v4181_v18 = vpop.permute.xlu0 %4180 }
0x1893   : > { %6986 = vmatprep.subr.bf16.mxu0 %v4181_v18 }
0x1894   : > { %6987 = vmatpush3.bf16.msra.mxu0 %v4181_v18  ;;  %v4254_v5 = vpop.permute.xlu1 %4253 }
0x1895   : > { %6988 = vmatprep.subr.bf16.mxu0 %v4183_v42  ;;  %v7831_v26 = vpop.eup %7830 }
0x1896   : > { %v4174_v59 = vmul.f32 %v7831_v26, %v7827_v44  ;;  %v4260_v6 = vpop.permute.xlu0 %4259 }
0x1897   : > { %v7833_v53 = vpop.eup %7832  ;;  %v4271_v36 = vsel %vm2173_vm2, %v4260_v6, 0 }
0x1898   : > { %v7835_v54 = vpop.eup %7834  ;;  %6989 = vmatpush3.bf16.msra.mxu0 %v4183_v42  ;;  %v4173_v61 = vmul.f32 %v7833_v53, %v7825_v43 }
0x1899   : > { %v7837_v58 = vpop.eup %7836  ;;  %7138 = vmatprep.subr.msk.bf16.mxu0 %vm2173_vm2, %v4258_v56  ;;  %v4175_v62 = vmul.f32 %v7835_v54, %v7823_v40 }
0x189a   : > { %v4172_v50 = vmul.f32 %v7837_v58, %v7829_v39  ;;  %v4256_v13 = vpop.permute.xlu0 %4255 }
0x189b   : > { %v4177_v4 = vpack.c.bf16 %v4175_v62, %v4174_v59 }
0x189c   : > { %v4176_v3 = vpack.c.bf16 %v4173_v61, %v4172_v50 }
0x189e   : > { %6990 = vmatprep.mubr.msk.bf16.mxu0 %vm2173_vm2, %v4176_v3 }
0x189f   : > { %6991 = vmatmul.mubr.msk.bf16.vlgmr.msra.gmra.mrb[36].mxu0 %vm2173_vm2, %v4177_v4 }
0x18a0   : > { %6998 = vmatprep.mubr.msk.bf16.mxu0 %vm2173_vm2, %v4254_v5 }
0x18a1   : > { %6995 = vmatpush3.bf16.xpose.msra.mxu0 %v4268_v7 }
0x18a2   : > { %7139 = vmatprep.subr.msk.bf16.mxu0 %vm2173_vm2, %v4260_v6 }
0x18a9   : > { %6997 = vmatpush3.bf16.xpose.msra.mxu0 %v4271_v36 }
0x18b0   : > { %6999 = vmatmul.mubr.msk.bf16.vlgmr.msra.gmra.mrb[40].mxu0 %vm2173_vm2, %v4256_v13 }
0x1972   : > { %v10046_v14 = vpop.f32.mrb[36].mxu0 }
0x1973   : > { %v10048_v15 = vpop.f32.mrb[37].mxu0 }
0x1974   : > { %v10050_v16 = vpop.f32.mrb[38].mxu0 }
0x1975   : > { %v4242_v20 = vpack.c.bf16 %v10050_v16, %v10046_v14  ;;  %v10054_v22 = vpop.f32.mrb[39].mxu0 }
0x1976   : > { %v4241_v21 = vpack.c.bf16 %v10054_v22, %v10048_v15 }
0x1983   : > { %v7000_v27 = vpop.f32.mrb[40].mxu0 }
0x1984   : > { %v4307_v28 = vpop.f32.mrb[41].mxu0  ;;  %v4316_v55 = vadd.f32 %v7000_v27, %v9641_v29 }
0x1985   : > { %v4308_v30 = vadd.f32 %v4307_v28, %v9641_v29  ;;  %v7001_v51 = vpop.f32.mrb[42].mxu0 }
0x1986   : > { %v4310_v33 = vpop.f32.mrb[43].mxu0  ;;  %v4319_v11 = vadd.f32 %v7001_v51, %v9641_v29  ;;  %v4328_v57 = vsel %vm2173_vm2, %v4316_v55, -inf }
0x1987   : > { %v4311_v34 = vadd.f32 %v4310_v33, %v9641_v29  ;;  %v4322_v23 = vsel %vm2173_vm2, %v4308_v30, -inf }
0x1988   : > { %4323 = vmax.xlane.f32.xlu1 %v4322_v23  ;;  %v4331_v24 = vsel %vm2173_vm2, %v4319_v11, -inf }
0x1989   : > { %v4325_v60 = vsel %vm2173_vm2, %v4311_v34, -inf }
0x198a   : > { %4326 = vmax.xlane.f32.xlu0 %v4325_v60 }
0x198c   : > { %4332 = vmax.xlane.f32.xlu1 %v4331_v24 }
0x198e   : > { %4329 = vmax.xlane.f32.xlu0 %v4328_v57 }
0x199d   : > { %4370 = vrot.lane.b32.xlu1 %v9966_v32, %s8835_s11 }
0x1a15   : > { %v4324_v63 = vpop.xlane.xlu1 %4323 }
0x1a16   : > { %v4334_v44 = vsub.f32 %v4308_v30, %v4324_v63 }
0x1a17   : > { %v4327_v40 = vpop.xlane.xlu0 %4326 }
0x1a18   : > { %v4335_v43 = vsub.f32 %v4311_v34, %v4327_v40  ;;  %v4338_v45 = vmul.f32 1.442695, %v4334_v44 }
0x1a19   : > { %v4333_v35 = vpop.xlane.xlu1 %4332 }
0x1a1a   : > { %v4337_v12 = vsub.f32 %v4319_v11, %v4333_v35  ;;  %v4340_v39 = vmul.f32 1.442695, %v4335_v43 }
0x1a1b   : > { %v4330_v25 = vpop.xlane.xlu0 %4329 }
0x1a1c   : > { %v4344_v41 = vmul.f32 1.442695, %v4337_v12  ;;  %v4336_v42 = vsub.f32 %v4316_v55, %v4330_v25 }
0x1a1d   : > { %v4371_v59 = vpop.permute.xlu1 %4370 }
0x1a1e   : > { %7838 = vpow2.f32 %v4344_v41  ;;  %v4342_v46 = vmul.f32 1.442695, %v4336_v42 }
0x1a1f   : > { %7840 = vpow2.f32 %v4340_v39 }
0x1a20   : > { %7842 = vpow2.f32 %v4342_v46 }
0x1a21   : > { %7844 = vpow2.f32 %v4338_v45 }
0x1a28   : > { %v7839_v47 = vpop.eup %7838 }
0x1a29   : > { %v7841_v48 = vpop.eup %7840  ;;  %v4355_v18 = vsel %vm2173_vm2, %v7839_v47, 0.0 }
0x1a2a   : > { %v7843_v26 = vpop.eup %7842  ;;  %4356 = vadd.xlane.f32.xlu1 %v4355_v18  ;;  %v4349_v56 = vsel %vm2173_vm2, %v7841_v48, 0.0 }
0x1a2b   : > { %v4352_v53 = vsel %vm2173_vm2, %v7843_v26, 0.0  ;;  %v7845_v54 = vpop.eup %7844 }
0x1a2c   : > { %4353 = vadd.xlane.f32.xlu0 %v4352_v53  ;;  %v4346_v58 = vsel %vm2173_vm2, %v7845_v54, 0.0 }
0x1a2e   : > { %4350 = vadd.xlane.f32.xlu1 %v4349_v56 }
0x1a30   : > { %4347 = vadd.xlane.f32.xlu0 %v4346_v58 }
0x1a3f   : > { %4445 = vrot.lane.b32.xlu1 %v9955_v38, %s8836_s1 }
0x1a43   : > { %4441 = vrot.lane.b32.xlu1 %v9957_v10, %s8836_s1 }
0x1a46   : > { %4368 = vrot.lane.b32.xlu0 %v9970_v49, %s8835_s11 }
0x1a4a   : > { %4447 = vrot.lane.b32.xlu0 %v9968_v37, %s8836_s1 }
0x1a4e   : > { %4443 = vrot.lane.b32.xlu0 %v9972_v52, %s8836_s1 }
0x1ab7   : > { %v4357_v50 = vpop.xlane.xlu1 %4356 }
0x1ab9   : > { %v4354_v61 = vpop.xlane.xlu0 %4353 }
0x1aba   : > { %7846 = vrcp.f32 %v4354_v61 }
0x1abb   : > { %v4351_v62 = vpop.xlane.xlu1 %4350 }
0x1abc   : > { %7848 = vrcp.f32 %v4351_v62 }
0x1abd   : > { %7850 = vrcp.f32 %v4357_v50  ;;  %v4348_v38 = vpop.xlane.xlu0 %4347 }
0x1abe   : > { %7852 = vrcp.f32 %v4348_v38 }
0x1abf   : > { %v4446_v37 = vpop.permute.xlu1 %4445 }
0x1ac0   : > { %v4456_v51 = vsel %vm2173_vm2, %v4446_v37, 0 }
0x1ac1   : > { %v4369_v3 = vpop.permute.xlu0 %4368 }
0x1ac2   : > { %7002 = vmatprep.subr.bf16.mxu1 %v4369_v3 }
0x1ac3   : > { %7003 = vmatpush3.bf16.msra.mxu1 %v4369_v3  ;;  %v4442_v30 = vpop.permute.xlu1 %4441 }
0x1ac4   : > { %7004 = vmatprep.subr.bf16.mxu1 %v4371_v59  ;;  %v7847_v10 = vpop.eup %7846 }
0x1ac5   : > { %v4364_v52 = vmul.f32 %v7847_v10, %v7843_v26  ;;  %v4448_v33 = vpop.permute.xlu0 %4447 }
0x1ac6   : > { %v7849_v4 = vpop.eup %7848  ;;  %v4459_v11 = vsel %vm2173_vm2, %v4448_v33, 0 }
0x1ac7   : > { %v7851_v5 = vpop.eup %7850  ;;  %7005 = vmatpush3.bf16.msra.mxu1 %v4371_v59  ;;  %v4363_v36 = vmul.f32 %v7849_v4, %v7841_v48 }
0x1ac8   : > { %v7853_v7 = vpop.eup %7852  ;;  %7140 = vmatprep.subr.msk.bf16.mxu1 %vm2173_vm2, %v4446_v37  ;;  %v4365_v13 = vmul.f32 %v7851_v5, %v7839_v47 }
0x1ac9   : > { %v4362_v6 = vmul.f32 %v7853_v7, %v7845_v54  ;;  %v4444_v34 = vpop.permute.xlu0 %4443 }
0x1aca   : > { %v4367_v28 = vpack.c.bf16 %v4365_v13, %v4364_v52 }
0x1acb   : > { %v4366_v27 = vpack.c.bf16 %v4363_v36, %v4362_v6 }
0x1acd   : > { %7006 = vmatprep.mubr.msk.bf16.mxu1 %vm2173_vm2, %v4366_v27 }
0x1ace   : > { %7007 = vmatmul.mubr.msk.bf16.vlgmr.msra.gmra.mrb[56].mxu1 %vm2173_vm2, %v4367_v28 }
0x1acf   : > { %7014 = vmatprep.mubr.msk.bf16.mxu1 %vm2173_vm2, %v4442_v30 }
0x1ad0   : > { %7011 = vmatpush3.bf16.xpose.msra.mxu1 %v4456_v51 }
0x1ad1   : > { %7141 = vmatprep.subr.msk.bf16.mxu1 %vm2173_vm2, %v4448_v33 }
0x1ad8   : > { %7013 = vmatpush3.bf16.xpose.msra.mxu1 %v4459_v11 }
0x1adf   : > { %7015 = vmatmul.mubr.msk.bf16.vlgmr.msra.gmra.mrb[60].mxu1 %vm2173_vm2, %v4444_v34 }
0x1ae0   : > { %4969 = vmatprep.mubr.bf16.mxu1 %v8829_v2 }
0x1ba1   : > { %v7008_v23 = vpop.f32.mrb[56].mxu1 }
0x1ba2   : > { %v4414_v55 = vpop.f32.mrb[57].mxu1 }
0x1ba3   : > { %v7009_v60 = vpop.f32.mrb[58].mxu1 }
0x1ba4   : > { %v4430_v24 = vpack.c.bf16 %v7009_v60, %v7008_v23  ;;  %v4417_v57 = vpop.f32.mrb[59].mxu1  ;;  %v7624_v60 = vld [vmem:[%s10503_s6 + $0x40] sm:$0xff]  }
0x1ba5   : > { %v4429_v63 = vpack.c.bf16 %v4417_v57, %v4414_v55  ;;  %v7626_v57 = vld [vmem:[%s10503_s6 + $0x50] sm:$0xff]  }
0x1bb2   : > { %v7016_v40 = vpop.f32.mrb[60].mxu1 }
0x1bb3   : > { %v4495_v43 = vpop.f32.mrb[61].mxu1  ;;  %v4504_v42 = vadd.f32 %v7016_v40, %v9641_v29  ;;  %v7628_v40 = vld [vmem:[%s10503_s6 + $0x60] sm:$0xff]  }
0x1bb4   : > { %v4496_v35 = vadd.f32 %v4495_v43, %v9641_v29  ;;  %v7017_v44 = vpop.f32.mrb[62].mxu1  ;;  %v7629_v43 = vld [vmem:[%s10503_s6 + $0x68] sm:$0xff]  }
0x1bb5   : > { %v4498_v12 = vpop.f32.mrb[63].mxu1  ;;  %v4507_v39 = vadd.f32 %v7017_v44, %v9641_v29  ;;  %v4516_v47 = vsel %vm2173_vm2, %v4504_v42, -inf  ;;  %v7631_v44 = vld [vmem:[%s10503_s6 + $0x78] sm:$0xff]  }
0x1bb6   : > { %v4499_v25 = vadd.f32 %v4498_v12, %v9641_v29  ;;  %v4510_v41 = vsel %vm2173_vm2, %v4496_v35, -inf }
0x1bb7   : > { %4511 = vmax.xlane.f32.xlu1 %v4510_v41  ;;  %v4519_v46 = vsel %vm2173_vm2, %v4507_v39, -inf }
0x1bb8   : > { %v4513_v45 = vsel %vm2173_vm2, %v4499_v25, -inf }
0x1bb9   : > { %4514 = vmax.xlane.f32.xlu0 %v4513_v45 }
0x1bbb   : > { %4520 = vmax.xlane.f32.xlu1 %v4519_v46 }
0x1bbd   : > { %4517 = vmax.xlane.f32.xlu0 %v4516_v47 }
0x1c44   : > { %v4512_v48 = vpop.xlane.xlu1 %4511 }
0x1c45   : > { %v4522_v54 = vsub.f32 %v4496_v35, %v4512_v48  ;;  %v7630_v35 = vld [vmem:[%s10503_s6 + $0x70] sm:$0xff]  }
0x1c46   : > { %v4515_v18 = vpop.xlane.xlu0 %4514 }
0x1c47   : > { %v4523_v26 = vsub.f32 %v4499_v25, %v4515_v18  ;;  %v4526_v29 = vmul.f32 1.442695, %v4522_v54 }
0x1c48   : > { %v4521_v53 = vpop.xlane.xlu1 %4520 }
0x1c49   : > { %v4525_v56 = vsub.f32 %v4507_v39, %v4521_v53  ;;  %v4528_v58 = vmul.f32 1.442695, %v4523_v26  ;;  %v6486_v26 = vld [vmem:[#allocation21 + $0x1] ss:$0 sm:$0xff] }
0x1c4a   : > { %v4518_v59 = vpop.xlane.xlu0 %4517 }
0x1c4b   : > { %v4532_v50 = vmul.f32 1.442695, %v4525_v56  ;;  %v4524_v61 = vsub.f32 %v4504_v42, %v4518_v59 }
0x1c4d   : > { %7854 = vpow2.f32 %v4532_v50  ;;  %v4530_v62 = vmul.f32 1.442695, %v4524_v61 }
0x1c4e   : > { %7856 = vpow2.f32 %v4528_v58 }
0x1c4f   : > { %7858 = vpow2.f32 %v4530_v62 }
0x1c50   : > { %7860 = vpow2.f32 %v4526_v29 }
0x1c57   : > { %v7855_v38 = vpop.eup %7854 }
0x1c58   : > { %v7857_v3 = vpop.eup %7856  ;;  %v4543_v10 = vsel %vm2173_vm2, %v7855_v38, 0.0 }
0x1c59   : > { %v7859_v4 = vpop.eup %7858  ;;  %4544 = vadd.xlane.f32.xlu1 %v4543_v10  ;;  %v4537_v7 = vsel %vm2173_vm2, %v7857_v3, 0.0  ;;  %v7634_v10 = vld [vmem:[%s10505_s12 + $0x84] ss:$8 sps:$4 sm:$0xff]  }
0x1c5a   : > { %v4540_v5 = vsel %vm2173_vm2, %v7859_v4, 0.0  ;;  %v7861_v37 = vpop.eup %7860  ;;  %4937 = vmatprep.subr.bf16.mxu1 %v7634_v10 }
0x1c5b   : > { %4541 = vadd.xlane.f32.xlu0 %v4540_v5  ;;  %v4534_v52 = vsel %vm2173_vm2, %v7861_v37, 0.0  ;;  %v7635_v5 = vld [vmem:[%s10505_s12 + $0x90] ss:$8 sps:$4 sm:$0xff]  }
0x1c5d   : > { %4538 = vadd.xlane.f32.xlu1 %v4537_v7 }
0x1c5f   : > { %4535 = vadd.xlane.f32.xlu0 %v4534_v52 }
0x1c6e   : > { %4558 = vrot.lane.b32.xlu1 %v9966_v32, %s8836_s1 }
0x1c72   : > { %4245 = vrot.lane.b32.xlu1 %v4241_v21, %s8836_s1 }
0x1c75   : > { %4556 = vrot.lane.b32.xlu0 %v9970_v49, %s8836_s1 }
0x1c76   : > { %4433 = vrot.lane.b32.xlu1 %v4429_v63, %s8835_s11  ;;  %v7627_v63 = vld [vmem:[%s10503_s6 + $0x58] sm:$0xff]  }
0x1c79   : > { %4247 = vrot.lane.b32.xlu0 %v4242_v20, %s8836_s1 }
0x1c7d   : > { %4435 = vrot.lane.b32.xlu0 %v4430_v24, %s8835_s11  ;;  %v7625_v24 = vld [vmem:[%s10503_s6 + $0x48] sm:$0xff]   ;;  %s10291_s11 = scalar_lea.hbm %s10434_s4, %s6617_s5  ;;  %s8612_s6 = sshll.u32 %s8837_s3, 4  ;;  %s8613_s6 = int_to_ptr.vmem [resolvable:$false] %s8612_s6 }
0x1c7e   : > { %s8614_s8 = scalar_lea.vmem %s8613_s6, 32 }
0x1ce6   : > { %v4545_v6 = vpop.xlane.xlu1 %4544 }
0x1ce8   : > { %v4542_v36 = vpop.xlane.xlu0 %4541 }
0x1ce9   : > { %7862 = vrcp.f32 %v4542_v36 }
0x1cea   : > { %v4539_v32 = vpop.xlane.xlu1 %4538 }
0x1ceb   : > { %7864 = vrcp.f32 %v4539_v32 }
0x1cec   : > { %7866 = vrcp.f32 %v4545_v6  ;;  %v4536_v15 = vpop.xlane.xlu0 %4535 }
0x1ced   : > { %7868 = vrcp.f32 %v4536_v15 }
0x1cee   : > { %v4559_v22 = vpop.permute.xlu1 %4558 }
0x1cf0   : > { %v4557_v21 = vpop.permute.xlu0 %4556 }
0x1cf1   : > { %7018 = vmatprep.subr.bf16.mxu0 %v4557_v21 }
0x1cf2   : > { %7019 = vmatpush3.bf16.msra.mxu0 %v4557_v21  ;;  %v4246_v49 = vpop.permute.xlu1 %4245  ;;  %v7640_v21 = vld [vmem:[%s10505_s12 + $0xa4] ss:$8 sps:$4 sm:$0xff]  }
0x1cf3   : > { %4251 = vst.msk [vmem:[#allocation2] sm:$0xff] %vm2534_vm3, %v4246_v49  ;;  %7020 = vmatprep.subr.bf16.mxu0 %v4559_v22  ;;  %v7863_v14 = vpop.eup %7862  ;;  %v7638_v49 = vld [vmem:[%s10505_s12 + $0xa0] ss:$8 sps:$4 sm:$0xff]  }
0x1cf4   : > { %v4248_v16 = vpop.permute.xlu0 %4247  ;;  %v4552_v30 = vmul.f32 %v7863_v14, %v7859_v4  ;;  %v7637_v4 = vld [vmem:[%s10505_s12 + $0x94] ss:$8 sps:$4 sm:$0xff]  }
0x1cf5   : > { %v7865_v20 = vpop.eup %7864  ;;  %4252 = vst.msk [vmem:[#allocation2 + $0x8] sm:$0xff] %vm2534_vm3, %v4248_v16  ;;  %v7643_v14 = vld [vmem:[%s10505_s12 + $0xb4] ss:$8 sps:$4 sm:$0xff]   ;;  %v7646_v16 = vld [vmem:[%s10505_s12 + $0xc4] ss:$8 sps:$4 sm:$0xff]  }
0x1cf6   : > { %v7867_v13 = vpop.eup %7866  ;;  %7021 = vmatpush3.bf16.msra.mxu0 %v4559_v22  ;;  %v4434_v27 = vpop.permute.xlu1 %4433  ;;  %v4551_v11 = vmul.f32 %v7865_v20, %v7857_v3  ;;  %v7632_v3 = vld [vmem:[%s10505_s12 + $0x80] ss:$8 sps:$4 sm:$0xff]   ;;  %v7649_v20 = vld [vmem:[%s10505_s12 + $0xd4] ss:$8 sps:$4 sm:$0xff]  }
0x1cf7   : > { %v7869_v28 = vpop.eup %7868  ;;  %4439 = vst.msk [vmem:[#allocation2] sm:$0xff] %vm2723_vm4, %v4434_v27  ;;  %v4553_v34 = vmul.f32 %v7867_v13, %v7855_v38  ;;  %7026 = vmatprep.subr.bf16.mxu0 %v7624_v60  ;;  %4938 = vmatpush1.bf16.msra.mxu1 %v7632_v3  ;;  %v7647_v13 = vld [vmem:[%s10505_s12 + $0xd0] ss:$8 sps:$4 sm:$0xff]   ;;  %v7652_v27 = vld [vmem:[%s10505_s12 + $0xe4] ss:$8 sps:$4 sm:$0xff]  }
0x1cf8   : > { %v4436_v51 = vpop.permute.xlu0 %4435  ;;  %v4550_v33 = vmul.f32 %v7869_v28, %v7861_v37  ;;  %4939 = vmatprep.subr.bf16.mxu1 %v7637_v4  ;;  %v7650_v28 = vld [vmem:[%s10505_s12 + $0xe0] ss:$8 sps:$4 sm:$0xff]  }
0x1cf9   : > { %4440 = vst.msk [vmem:[#allocation2 + $0x8] sm:$0xff] %vm2723_vm4, %v4436_v51  ;;  %v4555_v55 = vpack.c.bf16 %v4553_v34, %v4552_v30  ;;  %v7655_v30 = vld [vmem:[%s10505_s12 + $0xf4] ss:$8 sps:$4 sm:$0xff]   ;;  %v7653_v51 = vld [vmem:[%s10505_s12 + $0xf0] ss:$8 sps:$4 sm:$0xff]  }
0x1cfa   : > { %v4554_v23 = vpack.c.bf16 %v4551_v11, %v4550_v33 }
0x1cfb   : > { %4940 = vmatpush1.bf16.msra.mxu1 %v7635_v5 }
0x1cfc   : > { %7022 = vmatprep.mubr.msk.bf16.mxu0 %vm2173_vm2, %v4554_v23  ;;  %4941 = vmatprep.subr.bf16.mxu1 %v7640_v21 }
0x1cfd   : > { %7023 = vmatmul.mubr.msk.bf16.vlgmr.msra.gmra.mrb[44].mxu0 %vm2173_vm2, %v4555_v55 }
0x1cfe   : > { %7027 = vmatpush3.bf16.msra.mxu0 %v7624_v60 }
0x1cff   : > { %7028 = vmatprep.subr.bf16.mxu0 %v7625_v24  ;;  %4942 = vmatpush1.bf16.msra.mxu1 %v7638_v49 }
0x1d00   : > { %4943 = vmatprep.subr.bf16.mxu1 %v7643_v14 }
0x1d02   : > { %7029 = vmatpush3.bf16.msra.mxu0 %v7625_v24 }
0x1d03   : > { %7030 = vmatprep.subr.bf16.mxu0 %v7626_v57 }
0x1d06   : > { %7031 = vmatpush3.bf16.msra.mxu0 %v7626_v57  ;;  %v10162_v57 = vld [vmem:[#allocation23 + $0x1] ss:$0 sm:$0xff] }
0x1d07   : > { %7032 = vmatprep.subr.bf16.mxu0 %v7627_v63 }
0x1d0a   : > { %7033 = vmatpush3.bf16.msra.mxu0 %v7627_v63 }
0x1d0b   : > { %7034 = vmatprep.subr.bf16.mxu0 %v7628_v40 }
0x1d0e   : > { %7035 = vmatpush3.bf16.msra.mxu0 %v7628_v40 }
0x1d0f   : > { %7036 = vmatprep.subr.bf16.mxu0 %v7629_v43 }
0x1d12   : > { %7037 = vmatpush3.bf16.msra.mxu0 %v7629_v43 }
0x1d13   : > { %7038 = vmatprep.subr.bf16.mxu0 %v7630_v35 }
0x1d16   : > { %7039 = vmatpush3.bf16.msra.mxu0 %v7630_v35 }
0x1d17   : > { %7040 = vmatprep.subr.bf16.mxu0 %v7631_v44 }
0x1d1a   : > { %7041 = vmatpush3.bf16.msra.mxu0 %v7631_v44  ;;  %v10165_v44 = vld [vmem:[#allocation24 + $0x1] ss:$0 sm:$0xff] }
0x1dd0   : > { %v7024_v12 = vpop.f32.mrb[44].mxu0 }
0x1dd1   : > { %v4602_v39 = vpop.f32.mrb[45].mxu0 }
0x1dd2   : > { %v7025_v25 = vpop.f32.mrb[46].mxu0 }
0x1dd3   : > { %v4618_v41 = vpack.c.bf16 %v7025_v25, %v7024_v12  ;;  %v4605_v42 = vpop.f32.mrb[47].mxu0 }
0x1dd4   : > { %v4617_v45 = vpack.c.bf16 %v4605_v42, %v4602_v39  ;;  %v7656_v42 = vld [vmem:[%s10506_s29 + $0xc0] sm:$0xff]  }
0x1dd5   : > { %4623 = vrot.lane.b32.xlu0 %v4618_v41, %s8834_s16  ;;  %6762 = vmatprep.subr.bf16.mxu0 %v7656_v42 }
0x1dd6   : > { %4621 = vrot.lane.b32.xlu1 %v4617_v45, %s8834_s16  ;;  %v7657_v45 = vld [vmem:[%s10506_s29 + $0x80] sm:$0xff]   ;;  %s10274_s16 = sand.u32 1, %s8746_s0  }
0x1dd7   : > { %s1535_s23 = scalar_lea.vmem [#allocation42], %s10274_s16  ;;  %s5796_s15 = scalar_lea.sflag [#allocation5], %s10274_s16 }
0x1dd8   : > { %s5813_s1 = sshll.u32 %s1535_s23, 4  ;;  %s5814_s1 = int_to_ptr.vmem [resolvable:$true] %s5813_s1 }
0x1dd9   : > { %s8608_s2 = scalar_lea.vmem %s5814_s1, 16  ;;  %p8615_p3 = scmp.lt.s32.totalorder %s5814_s1, %s8613_s6 }
0x1dda   : > { %p8609_p13 = scmp.ne.s32.totalorder %s5814_s1, %s8608_s2  ;;  %p8616_p4 = scmp.lt.s32.totalorder %s8614_s8, %s8608_s2 }
0x1ddc   : > { %p8610_p2 = pnand %p8609_p13, %p10509_p1  ;;  %p8617_p12 = por %p8616_p4, %p8615_p3 }
0x1dde   : > { %p8611_p0 = pneg %p8610_p2 }
0x1de0   : > { %p8618_p5 = pnand %p8617_p12, %p8611_p0 }
0x1e47   : > { %v4624_v46 = vpop.permute.xlu0 %4623 }
0x1e48   : > { %4628 = vst.msk [vmem:[#allocation2 + $0x8] sm:$0xff] %vm2912_vm5, %v4624_v46  ;;  %v4622_v47 = vpop.permute.xlu1 %4621  ;;  %v7658_v46 = vld [vmem:[%s10506_s29 + $0xc8] sm:$0xff]  }
0x1e49   : > { %4627 = vst.msk [vmem:[#allocation2] sm:$0xff] %vm2912_vm5, %v4622_v47  ;;  %v7659_v47 = vld [vmem:[%s10506_s29 + $0x88] sm:$0xff]  }
0x1e4f   : > { %v4630_v18 = vld [vmem:[#allocation2 + $0x8] sm:$0xff] }
0x1e50   : > { %v4629_v48 = vld [vmem:[#allocation2] sm:$0xff] }
0x1e51   : > { %7042 = vmatprep.mubr.bf16.mxu0 %v4629_v48  ;;  %v7660_v48 = vld [vmem:[%s10506_s29 + $0xd0] sm:$0xff]  }
0x1e52   : > { %7043 = vmatmul.mubr.bf16.vlgmr.msra.gmra.mrb[48].mxu0 %v4630_v18  ;;  %v7661_v18 = vld [vmem:[%s10506_s29 + $0x90] sm:$0xff]  }
0x1e53   : > { %6763 = vmatpush3.bf16.msra.mxu0 %v7657_v45 }
0x1e54   : > { %6764 = vmatprep.subr.bf16.mxu0 %v7658_v46 }
0x1e57   : > { %6765 = vmatpush3.bf16.msra.mxu0 %v7659_v47 }
0x1e58   : > { %6766 = vmatprep.subr.bf16.mxu0 %v7660_v48 }
0x1e5b   : > { %6767 = vmatpush3.bf16.msra.mxu0 %v7661_v18 }
0x1f25   : > { %v7044_v53 = vpop.f32.mrb[48].mxu0 }
0x1f26   : > { %v4747_v54 = vadd.f32 %v7044_v53, %v6486_v26  ;;  %v4738_v56 = vpop.f32.mrb[49].mxu0  ;;  %v7664_v53 = vld [vmem:[%s10506_s29 + $0xe0] sm:$0xff]  }
0x1f27   : > { %v4739_v58 = vadd.f32 %v6486_v26, %v4738_v56  ;;  %v7045_v59 = vpop.f32.mrb[50].mxu0  ;;  %v7666_v56 = vld [vmem:[%s10506_s29 + $0xe8] sm:$0xff]  }
0x1f28   : > { %v4750_v50 = vadd.f32 %v7045_v59, %v6486_v26  ;;  %v4741_v61 = vpop.f32.mrb[51].mxu0  ;;  %v10142_v15 = vadd.f32 %v4747_v54, %v9947_v8  ;;  %v7641_v8 = vld [vmem:[%s10505_s12 + $0xb0] ss:$8 sps:$4 sm:$0xff]   ;;  %v7665_v54 = vld [vmem:[%s10506_s29 + $0xa0] sm:$0xff]  }
0x1f29   : > { %v4753_v29 = vadd.f32 %v4739_v58, %v9938_v0  ;;  %v4742_v62 = vadd.f32 %v6486_v26, %v4741_v61  ;;  %4944 = vmatpush1.bf16.msra.mxu1 %v7641_v8  ;;  %v7662_v26 = vld [vmem:[%s10506_s29 + $0xd8] sm:$0xff]   ;;  %v7667_v58 = vld [vmem:[%s10506_s29 + $0xa8] sm:$0xff]   ;;  %v7668_v59 = vld [vmem:[%s10506_s29 + $0xf0] sm:$0xff]  }
0x1f2a   : > { %v10145_v22 = vadd.f32 %v4750_v50, %v9949_v9  ;;  %v7644_v9 = vld [vmem:[%s10505_s12 + $0xc0] ss:$8 sps:$4 sm:$0xff]   ;;  %4945 = vmatprep.subr.bf16.mxu1 %v7646_v16  ;;  %6768 = vmatprep.subr.bf16.mxu0 %v7662_v26  ;;  %v7669_v50 = vld [vmem:[%s10506_s29 + $0xb0] sm:$0xff]   ;;  %v7670_v61 = vld [vmem:[%s10506_s29 + $0xf8] sm:$0xff]  }
0x1f2b   : > { %v4754_v38 = vadd.f32 %v4742_v62, %v9940_v31  ;;  %4761 = vadd.xlane.f32.xlu1 %v4753_v29  ;;  %v4845_v62 = vld [vmem:[#allocation26 + $0x2] sm:$0x3] }
0x1f2c   : > { %v10198_v3 = vrot.slane %v4845_v62, %v9535_v19 }
0x1f2d   : > { %4763 = vadd.xlane.f32.xlu0 %v4754_v38  ;;  %4946 = vmatpush1.bf16.msra.mxu1 %v7644_v9 }
0x1f2e   : > { %4947 = vmatprep.subr.bf16.mxu1 %v7649_v20 }
0x1f31   : > { %4948 = vmatpush1.bf16.msra.mxu1 %v7647_v13 }
0x1f32   : > { %4949 = vmatprep.subr.bf16.mxu1 %v7652_v27 }
0x1f35   : > { %4950 = vmatpush1.bf16.msra.mxu1 %v7650_v28 }
0x1f36   : > { %4951 = vmatprep.subr.bf16.mxu1 %v7655_v30 }
0x1f39   : > { %4952 = vmatpush1.bf16.msra.mxu1 %v7653_v51 }
0x1f3a   : > { %7046 = vmatprep.subr.bf16.mxu1 %v8828_v1 }
0x1fb8   : > { %v4762_v37 = vpop.xlane.xlu1 %4761 }
0x1fb9   : > { %v4769_v7 = vmul.f32 0.0078125, %v4762_v37 }
0x1fba   : > { %v4764_v52 = vpop.xlane.xlu0 %4763 }
0x1fbb   : > { %v4773_v0 = vsub.f32 %v4753_v29, %v4769_v7  ;;  %v4770_v6 = vmul.f32 0.0078125, %v4764_v52  ;;  %v7671_v29 = vld [vmem:[%s10506_s29 + $0xb8] sm:$0xff]  }
0x1fbd   : > { %v4774_v31 = vsub.f32 %v4754_v38, %v4770_v6  ;;  %v4777_v36 = vmul.f32 %v4773_v0, %v4773_v0  ;;  %v10195_v38 = vrot.slane %v4845_v62, %v9529_v17 }
0x1fbf   : > { %4781 = vadd.xlane.f32.xlu0 %v4777_v36  ;;  %v4778_v32 = vmul.f32 %v4774_v31, %v4774_v31 }
0x1fc1   : > { %4783 = vadd.xlane.f32.xlu1 %v4778_v32 }
0x1fc3   : > { %4765 = vadd.xlane.f32.xlu0 %v10142_v15 }
0x1fc5   : > { %4767 = vadd.xlane.f32.xlu1 %v10145_v22 }
0x204c   : > { %v4782_v33 = vpop.xlane.xlu0 %4781 }
0x204d   : > { %v4789_v11 = vmul.f32 0.0078125, %v4782_v33 }
0x204e   : > { %v4784_v34 = vpop.xlane.xlu1 %4783 }
0x204f   : > { %v4793_v23 = vadd.f32 1e-12, %v4789_v11  ;;  %v4790_v55 = vmul.f32 0.0078125, %v4784_v34 }
0x2051   : > { %7870 = vrsqrt.f32 %v4793_v23  ;;  %v4794_v60 = vadd.f32 1e-12, %v4790_v55 }
0x2053   : > { %7872 = vrsqrt.f32 %v4794_v60 }
0x205b   : > { %v7871_v24 = vpop.eup %7870 }
0x205c   : > { %v4801_v63 = vmul.f32 %v7871_v24, %v4773_v0 }
0x205d   : > { %v7873_v40 = vpop.eup %7872 }
0x205e   : > { %v4802_v43 = vmul.f32 %v7873_v40, %v4774_v31  ;;  %v4811_v35 = vmul.f32 %v10162_v57, %v4801_v63 }
0x2060   : > { %v4812_v12 = vmul.f32 %v10162_v57, %v4802_v43  ;;  %v10169_v39 = vadd.f32 %v10165_v44, %v4811_v35 }
0x2062   : > { %v10172_v25 = vadd.f32 %v10165_v44, %v4812_v12 }
0x2064   : > { %v4825_v41 = vpack.c.bf16 %v10172_v25, %v10169_v39 }
0x2066   : > { %4970 = vmatmul.mubr.bf16.vlgmr.msra.gmra.mrb[64].mxu1 %v4825_v41 }
0x2067   : > { %4979 = vmatprep.mubr.bf16.mxu1 %v8829_v2  ;;  %v7663_v2 = vld [vmem:[%s10506_s29 + $0x98] sm:$0xff]  }
0x2068   : > { %6769 = vmatpush3.bf16.msra.mxu0 %v7663_v2 }
0x2069   : > { %6770 = vmatprep.subr.bf16.mxu0 %v7664_v53  ;;  %v4766_v53 = vpop.xlane.xlu0 %4765 }
0x206c   : > { %6771 = vmatpush3.bf16.msra.mxu0 %v7665_v54 }
0x206d   : > { %6772 = vmatprep.subr.bf16.mxu0 %v7666_v56  ;;  %v4768_v56 = vpop.xlane.xlu1 %4767 }
0x2070   : > { %6773 = vmatpush3.bf16.msra.mxu0 %v7667_v58  ;;  %v6561_v58 = vld [vmem:[#allocation27 + $0x1] ss:$0 sm:$0xff] }
0x2071   : > { %6774 = vmatprep.subr.bf16.mxu0 %v7668_v59 }
0x2074   : > { %6775 = vmatpush3.bf16.msra.mxu0 %v7669_v50  ;;  %v4771_v50 = vmul.f32 0.0078125, %v4766_v53 }
0x2075   : > { %6776 = vmatprep.subr.bf16.mxu0 %v7670_v61 }
0x2078   : > { %6777 = vmatpush3.bf16.msra.mxu0 %v7671_v29 }
0x2079   : > { %7066 = vmatprep.subr.bf16.mxu0 %v8828_v1 }
0x2139   : > { %v4971_v10 = vpop.f32.mrb[64].mxu1 }
0x213a   : > { %v4972_v4 = vadd.f32 %v4971_v10, %v10195_v38  ;;  %v4973_v5 = vpop.f32.mrb[65].mxu1  ;;  %v4772_v10 = vmul.f32 0.0078125, %v4768_v56 }
0x213b   : > { %v4974_v37 = vadd.f32 %v4973_v5, %v10198_v3  ;;  %v4975_v7 = vpop.f32.mrb[66].mxu1 }
0x213c   : > { %v4990_v52 = vmul.f32 %v4972_v4, %v4972_v4  ;;  %v4976_v0 = vadd.f32 %v4975_v7, %v10195_v38  ;;  %v4977_v6 = vpop.f32.mrb[67].mxu1 }
0x213d   : > { %v4991_v31 = vmul.f32 %v4974_v37, %v4974_v37  ;;  %v4978_v36 = vadd.f32 %v4977_v6, %v10198_v3 }
0x213e   : > { %v4998_v32 = vmul.f32 %v4990_v52, %v4972_v4  ;;  %v4992_v17 = vmul.f32 %v4976_v0, %v4976_v0 }
0x213f   : > { %v4999_v21 = vmul.f32 %v4991_v31, %v4974_v37  ;;  %v4993_v49 = vmul.f32 %v4978_v36, %v4978_v36 }
0x2140   : > { %v5006_v19 = vmul.f32 0.044715, %v4998_v32  ;;  %v5000_v14 = vmul.f32 %v4992_v17, %v4976_v0  ;;  %v7672_v32 = vld [vmem:[%s10507_s10] sm:$0xff]   ;;  %v7673_v17 = vld [vmem:[%s10507_s10 + $0x8] sm:$0xff]  }
0x2141   : > { %v5007_v8 = vmul.f32 0.044715, %v4999_v21  ;;  %v5001_v16 = vmul.f32 %v4993_v49, %v4978_v36  ;;  %7047 = vmatpush3.bf16.msra.mxu1 %v7672_v32 }
0x2142   : > { %v5014_v9 = vadd.f32 %v5006_v19, %v4972_v4  ;;  %v5008_v20 = vmul.f32 0.044715, %v5000_v14  ;;  %7048 = vmatprep.subr.bf16.mxu1 %v8828_v1 }
0x2143   : > { %v5015_v13 = vadd.f32 %v5007_v8, %v4974_v37  ;;  %v5009_v27 = vmul.f32 0.044715, %v5001_v16 }
0x2144   : > { %v5022_v28 = vmul.f32 0.7978846, %v5014_v9  ;;  %v5016_v30 = vadd.f32 %v5008_v20, %v4976_v0 }
0x2145   : > { %v5023_v51 = vmul.f32 0.7978846, %v5015_v13  ;;  %v5017_v33 = vadd.f32 %v5009_v27, %v4978_v36  ;;  %7049 = vmatpush3.bf16.msra.mxu1 %v7673_v17 }
0x2146   : > { %7874 = vtanh.f32 %v5022_v28  ;;  %v5024_v11 = vmul.f32 0.7978846, %v5016_v30  ;;  %7050 = vmatprep.subr.bf16.mxu1 %v8828_v1 }
0x2147   : > { %7876 = vtanh.f32 %v5023_v51  ;;  %v5025_v34 = vmul.f32 0.7978846, %v5017_v33 }
0x2148   : > { %7878 = vtanh.f32 %v5024_v11 }
0x2149   : > { %7880 = vtanh.f32 %v5025_v34 }
0x2150   : > { %v7875_v23 = vpop.eup %7874 }
0x2151   : > { %v7877_v55 = vpop.eup %7876  ;;  %v5038_v60 = vadd.f32 1.0, %v7875_v23  ;;  %v7675_v23 = vld [vmem:[%s10507_s10 + $0x18] sm:$0xff]  }
0x2152   : > { %v7879_v24 = vpop.eup %7878  ;;  %v5039_v63 = vadd.f32 1.0, %v7877_v55 }
0x2153   : > { %v7881_v40 = vpop.eup %7880  ;;  %v5046_v43 = vmul.f32 0.5, %v5038_v60  ;;  %v5040_v35 = vadd.f32 1.0, %v7879_v24 }
0x2154   : > { %v5041_v12 = vadd.f32 1.0, %v7881_v40  ;;  %v5047_v41 = vmul.f32 0.5, %v5039_v63  ;;  %v7676_v63 = vld [vmem:[%s10507_s10 + $0x20] sm:$0xff]  }
0x2155   : > { %v5048_v42 = vmul.f32 0.5, %v5040_v35  ;;  %v5054_v46 = vmul.f32 %v5046_v43, %v4972_v4  ;;  %v7677_v43 = vld [vmem:[%s10507_s10 + $0x28] sm:$0xff]  }
0x2156   : > { %v5049_v45 = vmul.f32 0.5, %v5041_v12  ;;  %v5055_v48 = vmul.f32 %v5047_v41, %v4974_v37  ;;  %v4775_v37 = vsub.f32 %v10142_v15, %v4771_v50  ;;  %v7674_v15 = vld [vmem:[%s10507_s10 + $0x10] sm:$0xff]   ;;  %v7688_v41 = vld [vmem:[%s10508_s19] sm:$0xff]  }
0x2157   : > { %v5056_v47 = vmul.f32 %v5048_v42, %v4976_v0  ;;  %v4776_v0 = vsub.f32 %v10145_v22, %v4772_v10  ;;  %7051 = vmatpush3.bf16.msra.mxu1 %v7674_v15  ;;  %v7683_v10 = vld [vmem:[#allocation35 + $0x18] sm:$0xff]  }
0x2158   : > { %v5057_v18 = vmul.f32 %v5049_v45, %v4978_v36  ;;  %v4779_v31 = vmul.f32 %v4775_v37, %v4775_v37  ;;  %7052 = vmatprep.subr.bf16.mxu1 %v8828_v1  ;;  %v7689_v45 = vld [vmem:[%s10508_s19 + $0x8] sm:$0xff]  }
0x2159   : > { %v5062_v26 = vpack.c.bf16 %v5056_v47, %v5054_v46  ;;  %v4780_v36 = vmul.f32 %v4776_v0, %v4776_v0  ;;  %v7690_v46 = vld [vmem:[%s10508_s19 + $0x10] sm:$0xff]   ;;  %v7691_v47 = vld [vmem:[%s10508_s19 + $0x18] sm:$0xff]  }
0x215a   : > { %v5063_v2 = vpack.c.bf16 %v5057_v18, %v5055_v48  ;;  %v6578_v18 = vld [vmem:[#allocation29 + $0x1] ss:$0 sm:$0xff] }
0x215b   : > { %7053 = vmatpush3.bf16.msra.mxu1 %v7675_v23 }
0x215c   : > { %5235 = vmatprep.mubr.bf16.mxu0 %v5063_v2  ;;  %7054 = vmatprep.subr.bf16.mxu1 %v8828_v1  ;;  %v6579_v2 = vld [vmem:[#allocation30 + $0x1] ss:$0 sm:$0xff] }
0x215d   : > { %5236 = vmatmul.mubr.bf16.vlgmr.msra.gmra.mrb[52].mxu0 %v5062_v26 }
0x215e   : > { %7067 = vmatpush3.bf16.msra.mxu0 %v7688_v41 }
0x215f   : > { %7055 = vmatpush3.bf16.msra.mxu1 %v7676_v63  ;;  %7068 = vmatprep.subr.bf16.mxu0 %v8828_v1  ;;  %v7692_v63 = vld [vmem:[%s10508_s19 + $0x20] sm:$0xff]  }
0x2160   : > { %7056 = vmatprep.subr.bf16.mxu1 %v8828_v1 }
0x2162   : > { %7069 = vmatpush3.bf16.msra.mxu0 %v7689_v45 }
0x2163   : > { %7057 = vmatpush3.bf16.msra.mxu1 %v7677_v43  ;;  %7070 = vmatprep.subr.bf16.mxu0 %v8828_v1  ;;  %v7694_v43 = vld [vmem:[%s10508_s19 + $0x30] sm:$0xff]  }
0x2164   : > { %7058 = vmatprep.subr.bf16.mxu1 %v8828_v1 }
0x2166   : > { %7071 = vmatpush3.bf16.msra.mxu0 %v7690_v46 }
0x2167   : > { %7072 = vmatprep.subr.bf16.mxu0 %v8828_v1 }
0x216a   : > { %7073 = vmatpush3.bf16.msra.mxu0 %v7691_v47  ;;  %v7695_v47 = vld [vmem:[%s10508_s19 + $0x38] sm:$0xff]  }
0x216b   : > { %7074 = vmatprep.subr.bf16.mxu0 %v8828_v1 }
0x216e   : > { %7075 = vmatpush3.bf16.msra.mxu0 %v7692_v63 }
0x216f   : > { %7076 = vmatprep.subr.bf16.mxu0 %v8828_v1 }
0x2230   : > { %v6778_v54 = vpop.f32.mrb[52].mxu0 }
0x2231   : > { %v6779_v59 = vpop.f32.mrb[53].mxu0 }
0x2232   : > { %v6780_v61 = vadd.f32 %v6779_v59, %v6778_v54  ;;  %v6781_v29 = vpop.f32.mrb[54].mxu0  ;;  %v7680_v59 = vld [vmem:[#allocation35] sm:$0xff]  }
0x2233   : > { %v6782_v62 = vpop.f32.mrb[55].mxu0 }
0x2234   : > { %v5238_v4 = vadd.f32 %v6780_v61, %v6561_v58  ;;  %v6783_v5 = vadd.f32 %v6782_v62, %v6781_v29  ;;  %v7681_v29 = vld [vmem:[#allocation35 + $0x8] sm:$0xff]   ;;  %v7682_v62 = vld [vmem:[#allocation35 + $0x10] sm:$0xff]  }
0x2236   : > { %v5241_v7 = vadd.f32 %v6783_v5, %v6561_v58  ;;  %v5250_v52 = vadd.f32 %v5238_v4, %v10169_v39  ;;  %v7684_v4 = vld [vmem:[#allocation35 + $0x20] sm:$0xff]  }
0x2238   : > { %5256 = vadd.xlane.f32.xlu0 %v5250_v52  ;;  %v5251_v6 = vadd.f32 %v5241_v7, %v10172_v25 }
0x223a   : > { %5258 = vadd.xlane.f32.xlu1 %v5251_v6 }
0x223c   : > { %4785 = vadd.xlane.f32.xlu0 %v4779_v31 }
0x223e   : > { %4787 = vadd.xlane.f32.xlu1 %v4780_v36 }
0x22c5   : > { %v5257_v22 = vpop.xlane.xlu0 %5256 }
0x22c6   : > { %v5260_v39 = vmul.f32 0.0078125, %v5257_v22 }
0x22c7   : > { %v5259_v25 = vpop.xlane.xlu1 %5258 }
0x22c8   : > { %v5262_v21 = vsub.f32 %v5250_v52, %v5260_v39  ;;  %v5261_v49 = vmul.f32 0.0078125, %v5259_v25  ;;  %v7686_v52 = vld [vmem:[#allocation35 + $0x30] sm:$0xff]  }
0x22c9   : > { %v4786_v19 = vpop.xlane.xlu0 %4785 }
0x22ca   : > { %v10214_v14 = vsub.f32 %v5251_v6, %v5261_v49  ;;  %v4791_v8 = vmul.f32 0.0078125, %v4786_v19  ;;  %v5264_v16 = vmul.f32 %v5262_v21, %v5262_v21  ;;  %v7687_v6 = vld [vmem:[#allocation35 + $0x38] sm:$0xff]  }
0x22cb   : > { %v4788_v9 = vpop.xlane.xlu1 %4787 }
0x22cc   : > { %v4795_v20 = vadd.f32 1e-12, %v4791_v8  ;;  %v4792_v13 = vmul.f32 0.0078125, %v4788_v9  ;;  %5266 = vadd.xlane.f32.xlu0 %v5264_v16  ;;  %v5265_v27 = vmul.f32 %v10214_v14, %v10214_v14 }
0x22ce   : > { %7882 = vrsqrt.f32 %v4795_v20  ;;  %v4796_v28 = vadd.f32 1e-12, %v4792_v13  ;;  %5268 = vadd.xlane.f32.xlu1 %v5265_v27 }
0x22d0   : > { %7884 = vrsqrt.f32 %v4796_v28 }
0x22d8   : > { %v7883_v30 = vpop.eup %7882 }
0x22d9   : > { %v4803_v51 = vmul.f32 %v7883_v30, %v4775_v37  ;;  %v7685_v37 = vld [vmem:[#allocation35 + $0x28] sm:$0xff]  }
0x22da   : > { %v7885_v33 = vpop.eup %7884 }
0x22db   : > { %v4804_v11 = vmul.f32 %v7885_v33, %v4776_v0  ;;  %v4813_v34 = vmul.f32 %v10162_v57, %v4803_v51 }
0x22dd   : > { %v4814_v55 = vmul.f32 %v10162_v57, %v4804_v11  ;;  %v4823_v60 = vadd.f32 %v10165_v44, %v4813_v34  ;;  %v7678_v57 = vld [vmem:[%s10507_s10 + $0x30] sm:$0xff]  }
0x22de   : > { %7059 = vmatpush3.bf16.msra.mxu1 %v7678_v57 }
0x22df   : > { %v4824_v24 = vadd.f32 %v10165_v44, %v4814_v55  ;;  %7060 = vmatprep.subr.bf16.mxu1 %v8828_v1  ;;  %v7679_v44 = vld [vmem:[%s10507_s10 + $0x38] sm:$0xff]  }
0x22e1   : > { %v4826_v40 = vpack.c.bf16 %v4824_v24, %v4823_v60 }
0x22e2   : > { %7061 = vmatpush3.bf16.msra.mxu1 %v7679_v44 }
0x22e3   : > { %4980 = vmatmul.mubr.bf16.gmra.mrb[68].mxu1 %v4826_v40  ;;  %7086 = vmatprep.subr.bf16.mxu1 %v8828_v1  ;;  %v7693_v40 = vld [vmem:[%s10508_s19 + $0x28] sm:$0xff]  }
0x22e4   : > { %7062 = vmatprep.mubr.msk.bf16.mxu1 %vm8830_vm0, %v8828_v1  ;;  %7077 = vmatpush3.bf16.msra.mxu0 %v7693_v40 }
0x22e5   : > { %7078 = vmatprep.subr.bf16.mxu0 %v8828_v1 }
0x22e8   : > { %7079 = vmatpush3.bf16.msra.mxu0 %v7694_v43 }
0x22e9   : > { %7080 = vmatprep.subr.bf16.mxu0 %v8828_v1 }
0x22ec   : > { %7081 = vmatpush3.bf16.msra.mxu0 %v7695_v47  ;;  %v7699_v47 = vld [vmem:[%s9024_s13 + $0x18] sm:$0xff]  }
0x22ed   : > { %7106 = vmatprep.subr.bf16.mxu0 %v8828_v1 }
0x2359   : > { %v5267_v35 = vpop.xlane.xlu0 %5266 }
0x235a   : > { %v5270_v12 = vmul.f32 0.0078125, %v5267_v35 }
0x235b   : > { %v5269_v54 = vpop.xlane.xlu1 %5268 }
0x235c   : > { %v5272_v42 = vadd.f32 1e-12, %v5270_v12  ;;  %v5271_v58 = vmul.f32 0.0078125, %v5269_v54 }
0x235e   : > { %7886 = vrsqrt.f32 %v5272_v42  ;;  %v5273_v61 = vadd.f32 1e-12, %v5271_v58 }
0x2360   : > { %7888 = vrsqrt.f32 %v5273_v61  ;;  %v5311_v61 = vld [vmem:[#allocation32] sm:$0x1] }
0x2368   : > { %v7887_v48 = vpop.eup %7886 }
0x2369   : > { %v5276_v26 = vmul.f32 %v7887_v48, %v5262_v21 }
0x236a   : > { %v7889_v5 = vpop.eup %7888 }
0x236b   : > { %v5284_v53 = vmul.f32 %v6578_v18, %v5276_v26  ;;  %v5277_v7 = vmul.f32 %v7889_v5, %v10214_v14 }
0x236d   : > { %v5292_v56 = vadd.f32 %v6579_v2, %v5284_v53  ;;  %v5285_v0 = vmul.f32 %v6578_v18, %v5277_v7 }
0x236f   : > { %v5294_v50 = vpack.c.bf16 %v5292_v56, %v5292_v56  ;;  %v5293_v31 = vadd.f32 %v6579_v2, %v5285_v0 }
0x2371   : > { %7063 = vmatmul.mubr.bf16.vlgmr.msra.gmra.mrb[72].mxu1 %v5294_v50  ;;  %v5509_v36 = vpack.c.bf16 %v5293_v31, %v5292_v56 }
0x2372   : > { %7087 = vmatpush3.bf16.msra.mxu1 %v7680_v59  ;;  %7102 = vmatprep.mubr.msk.bf16.mxu1 %vm8830_vm0, %v8828_v1 }
0x2373   : > { %7088 = vmatprep.subr.bf16.mxu1 %v8828_v1 }
0x2376   : > { %7089 = vmatpush3.bf16.msra.mxu1 %v7681_v29 }
0x2377   : > { %7090 = vmatprep.subr.bf16.mxu1 %v8828_v1 }
0x237a   : > { %7091 = vmatpush3.bf16.msra.mxu1 %v7682_v62 }
0x237b   : > { %7092 = vmatprep.subr.bf16.mxu1 %v8828_v1 }
0x237e   : > { %7093 = vmatpush3.bf16.msra.mxu1 %v7683_v10 }
0x237f   : > { %7094 = vmatprep.subr.bf16.mxu1 %v8828_v1 }
0x2382   : > { %7095 = vmatpush3.bf16.msra.mxu1 %v7684_v4 }
0x2383   : > { %7096 = vmatprep.subr.bf16.mxu1 %v8828_v1 }
0x2386   : > { %7097 = vmatpush3.bf16.msra.mxu1 %v7685_v37 }
0x2387   : > { %7098 = vmatprep.subr.bf16.mxu1 %v8828_v1 }
0x238a   : > { %7099 = vmatpush3.bf16.msra.mxu1 %v7686_v52  ;;  %v6596_v52 = vld [vmem:[#allocation36] ss:$0 sm:$0xff] }
0x238b   : > { %7100 = vmatprep.subr.bf16.mxu1 %v8828_v1 }
0x238e   : > { %7101 = vmatpush3.bf16.msra.mxu1 %v7687_v6 }
0x2391   : > { %7103 = vmatmul.mubr.bf16.vlgmr.msra.gmra.mrb[76].mxu1 %v5509_v36 }
0x23b6   : > { %v4981_v32 = vpop.f32.mrb[68].mxu1 }
0x23b7   : > { %v4982_v17 = vadd.f32 %v4981_v32, %v10195_v38  ;;  %v4983_v15 = vpop.f32.mrb[69].mxu1 }
0x23b8   : > { %v4984_v22 = vadd.f32 %v4983_v15, %v10198_v3  ;;  %v4985_v39 = vpop.f32.mrb[70].mxu1 }
0x23b9   : > { %v4994_v25 = vmul.f32 %v4982_v17, %v4982_v17  ;;  %v4986_v21 = vadd.f32 %v4985_v39, %v10195_v38  ;;  %v4987_v49 = vpop.f32.mrb[71].mxu1 }
0x23ba   : > { %v4995_v19 = vmul.f32 %v4984_v22, %v4984_v22  ;;  %v4988_v14 = vadd.f32 %v4987_v49, %v10198_v3 }
0x23bb   : > { %v5002_v8 = vmul.f32 %v4994_v25, %v4982_v17  ;;  %v4996_v16 = vmul.f32 %v4986_v21, %v4986_v21 }
0x23bc   : > { %v5003_v9 = vmul.f32 %v4995_v19, %v4984_v22  ;;  %v4997_v20 = vmul.f32 %v4988_v14, %v4988_v14 }
0x23bd   : > { %v5010_v13 = vmul.f32 0.044715, %v5002_v8  ;;  %v5004_v27 = vmul.f32 %v4996_v16, %v4986_v21 }
0x23be   : > { %v5011_v28 = vmul.f32 0.044715, %v5003_v9  ;;  %v5005_v30 = vmul.f32 %v4997_v20, %v4988_v14 }
0x23bf   : > { %v5018_v51 = vadd.f32 %v5010_v13, %v4982_v17  ;;  %v5012_v33 = vmul.f32 0.044715, %v5004_v27 }
0x23c0   : > { %v5019_v11 = vadd.f32 %v5011_v28, %v4984_v22  ;;  %v5013_v34 = vmul.f32 0.044715, %v5005_v30 }
0x23c1   : > { %v5026_v23 = vmul.f32 0.7978846, %v5018_v51  ;;  %v5020_v38 = vadd.f32 %v5012_v33, %v4986_v21 }
0x23c2   : > { %v5027_v55 = vmul.f32 0.7978846, %v5019_v11  ;;  %v5021_v60 = vadd.f32 %v5013_v34, %v4988_v14  ;;  %v7696_v11 = vld [vmem:[%s9024_s13] sm:$0xff]   ;;  %v7697_v34 = vld [vmem:[%s9024_s13 + $0x8] sm:$0xff]  }
0x23c3   : > { %7890 = vtanh.f32 %v5026_v23  ;;  %v5028_v3 = vmul.f32 0.7978846, %v5020_v38 }
0x23c4   : > { %7892 = vtanh.f32 %v5027_v55  ;;  %v5029_v24 = vmul.f32 0.7978846, %v5021_v60 }
0x23c5   : > { %7894 = vtanh.f32 %v5028_v3 }
0x23c6   : > { %7896 = vtanh.f32 %v5029_v24 }
0x23cd   : > { %v7891_v57 = vpop.eup %7890 }
0x23ce   : > { %v7893_v44 = vpop.eup %7892  ;;  %v5042_v35 = vadd.f32 1.0, %v7891_v57 }
0x23cf   : > { %v7895_v12 = vpop.eup %7894  ;;  %v5043_v41 = vadd.f32 1.0, %v7893_v44 }
0x23d0   : > { %v7897_v42 = vpop.eup %7896  ;;  %v5044_v45 = vadd.f32 1.0, %v7895_v12  ;;  %v5050_v46 = vmul.f32 0.5, %v5042_v35  ;;  %v7698_v12 = vld [vmem:[%s9024_s13 + $0x10] sm:$0xff]  }
0x23d1   : > { %v5045_v48 = vadd.f32 1.0, %v7897_v42  ;;  %v5051_v18 = vmul.f32 0.5, %v5043_v41  ;;  %v5418_v41 = vld [vmem:[#allocation33] sm:$0x1] }
0x23d2   : > { %v5052_v26 = vmul.f32 0.5, %v5044_v45  ;;  %v5058_v53 = vmul.f32 %v5050_v46, %v4982_v17 }
0x23d3   : > { %v5053_v2 = vmul.f32 0.5, %v5045_v48  ;;  %v5059_v56 = vmul.f32 %v5051_v18, %v4984_v22 }
0x23d4   : > { %v5060_v54 = vmul.f32 %v5052_v26, %v4986_v21  ;;  %v7700_v26 = vld [vmem:[%s9024_s13 + $0x20] sm:$0xff]  }
0x23d5   : > { %v5061_v58 = vmul.f32 %v5053_v2, %v4988_v14  ;;  %v7701_v2 = vld [vmem:[%s9024_s13 + $0x28] sm:$0xff]  }
0x23d6   : > { %v5064_v59 = vpack.c.bf16 %v5060_v54, %v5058_v53  ;;  %v7702_v53 = vld [vmem:[%s9024_s13 + $0x30] sm:$0xff]   ;;  %v7703_v54 = vld [vmem:[%s9024_s13 + $0x38] sm:$0xff]  }
0x23d7   : > { %v5065_v50 = vpack.c.bf16 %v5061_v58, %v5059_v56 }
0x23d9   : > { %5243 = vmatprep.mubr.bf16.mxu0 %v5065_v50 }
0x23da   : > { %5244 = vmatmul.mubr.bf16.gmra.mrb[56].mxu0 %v5064_v59 }
0x23db   : > { %7082 = vmatprep.mubr.msk.bf16.mxu0 %vm8830_vm0, %v8828_v1 }
0x2444   : > { %v5394_v29 = vpop.f32.mrb[72].mxu1 }
0x2445   : > { %v5395_v62 = vadd.f32 %v5394_v29, %v5311_v61  ;;  %v7064_v10 = vpop.f32.mrb[73].mxu1 }
0x2446   : > { %v5397_v4 = vpop.f32.mrb[74].mxu1  ;;  %v6605_v10 = vld [vmem:[#allocation38] ss:$0 sm:$0xff] }
0x2447   : > { %7898 = vtanh.f32 %v5395_v62  ;;  %v7065_v5 = vpop.f32.mrb[75].mxu1 }
0x2451   : > { %v7899_v37 = vpop.eup %7898 }
0x2452   : > { %v5401_v7 = vpack.c.bf16 %v7899_v37, %v7899_v37 }
0x2454   : > { %7083 = vmatmul.mubr.bf16.vlgmr.msra.gmra.mrb[60].mxu0 %v5401_v7  ;;  %v6606_v7 = vld [vmem:[#allocation39] ss:$0 sm:$0xff] }
0x2455   : > { %7122 = vmatprep.mubr.msk.bf16.mxu0 %vm8830_vm0, %v8828_v1  ;;  %7107 = vmatpush3.bf16.msra.mxu0 %v7696_v11 }
0x2456   : > { %7108 = vmatprep.subr.bf16.mxu0 %v8828_v1 }
0x2459   : > { %7109 = vmatpush3.bf16.msra.mxu0 %v7697_v34 }
0x245a   : > { %7110 = vmatprep.subr.bf16.mxu0 %v8828_v1 }
0x245d   : > { %7111 = vmatpush3.bf16.msra.mxu0 %v7698_v12 }
0x245e   : > { %7112 = vmatprep.subr.bf16.mxu0 %v8828_v1 }
0x2461   : > { %7113 = vmatpush3.bf16.msra.mxu0 %v7699_v47 }
0x2462   : > { %7114 = vmatprep.subr.bf16.mxu0 %v8828_v1 }
0x2464   : > { %v5615_v0 = vpop.f32.mrb[76].mxu1 }
0x2465   : > { %v5616_v6 = vadd.f32 %v6596_v52, %v5615_v0  ;;  %v7104_v31 = vpop.f32.mrb[77].mxu1  ;;  %7115 = vmatpush3.bf16.msra.mxu0 %v7700_v26 }
0x2466   : > { %v5618_v36 = vpop.f32.mrb[78].mxu1  ;;  %7116 = vmatprep.subr.bf16.mxu0 %v8828_v1 }
0x2467   : > { %v5622_v32 = vmul.f32 %v5616_v6, %v5616_v6  ;;  %v5619_v17 = vadd.f32 %v6596_v52, %v5618_v36  ;;  %v7105_v15 = vpop.f32.mrb[79].mxu1 }
0x2469   : > { %v5624_v22 = vmul.f32 %v5622_v32, %v5616_v6  ;;  %v5623_v39 = vmul.f32 %v5619_v17, %v5619_v17  ;;  %7117 = vmatpush3.bf16.msra.mxu0 %v7701_v2 }
0x246a   : > { %7118 = vmatprep.subr.bf16.mxu0 %v8828_v1 }
0x246b   : > { %v5626_v25 = vmul.f32 0.044715, %v5624_v22  ;;  %v5625_v21 = vmul.f32 %v5623_v39, %v5619_v17 }
0x246d   : > { %v5628_v49 = vadd.f32 %v5626_v25, %v5616_v6  ;;  %v5627_v19 = vmul.f32 0.044715, %v5625_v21  ;;  %7119 = vmatpush3.bf16.msra.mxu0 %v7702_v53 }
0x246e   : > { %7120 = vmatprep.subr.bf16.mxu0 %v8828_v1 }
0x246f   : > { %v5630_v14 = vmul.f32 0.7978846, %v5628_v49  ;;  %v5629_v8 = vadd.f32 %v5627_v19, %v5619_v17 }
0x2471   : > { %v5631_v16 = vmul.f32 0.7978846, %v5629_v8  ;;  %7900 = vtanh.f32 %v5630_v14  ;;  %7121 = vmatpush3.bf16.msra.mxu0 %v7703_v54 }
0x2473   : > { %7902 = vtanh.f32 %v5631_v16 }
0x247b   : > { %v7901_v9 = vpop.eup %7900 }
0x247c   : > { %v5634_v20 = vadd.f32 1.0, %v7901_v9 }
0x247d   : > { %v7903_v13 = vpop.eup %7902 }
0x247e   : > { %v5636_v27 = vmul.f32 0.5, %v5634_v20  ;;  %v5635_v28 = vadd.f32 1.0, %v7903_v13 }
0x2480   : > { %v5638_v30 = vmul.f32 %v5636_v27, %v5616_v6  ;;  %v5637_v51 = vmul.f32 0.5, %v5635_v28 }
0x2482   : > { %5642 = vadd.xlane.f32.xlu0 %v5638_v30  ;;  %v5639_v33 = vmul.f32 %v5637_v51, %v5619_v17 }
0x2484   : > { %5644 = vadd.xlane.f32.xlu1 %v5639_v33 }
0x24ad   : > { %v6784_v23 = vpop.f32.mrb[56].mxu0 }
0x24ae   : > { %v6785_v38 = vpop.f32.mrb[57].mxu0 }
0x24af   : > { %v6787_v55 = vpop.f32.mrb[58].mxu0 }
0x24b0   : > { %v6788_v60 = vpop.f32.mrb[59].mxu0 }
0x250f   : > { %v5643_v3 = vpop.xlane.xlu0 %5642 }
0x2510   : > { %v5646_v24 = vmul.f32 0.0078125, %v5643_v3 }
0x2511   : > { %v5645_v63 = vpop.xlane.xlu1 %5644 }
0x2512   : > { %v5648_v40 = vsub.f32 %v5638_v30, %v5646_v24  ;;  %v5647_v43 = vmul.f32 0.0078125, %v5645_v63 }
0x2514   : > { %v5649_v57 = vsub.f32 %v5639_v33, %v5647_v43  ;;  %v5650_v44 = vmul.f32 %v5648_v40, %v5648_v40 }
0x2516   : > { %5652 = vadd.xlane.f32.xlu0 %v5650_v44  ;;  %v5651_v35 = vmul.f32 %v5649_v57, %v5649_v57 }
0x2518   : > { %5654 = vadd.xlane.f32.xlu1 %v5651_v35 }
0x2527   : > { %v5501_v42 = vpop.f32.mrb[60].mxu0 }
0x2528   : > { %v5502_v45 = vadd.f32 %v5501_v42, %v5418_v41  ;;  %v7084_v46 = vpop.f32.mrb[61].mxu0 }
0x2529   : > { %v5504_v48 = vpop.f32.mrb[62].mxu0 }
0x252a   : > { %v7085_v18 = vpop.f32.mrb[63].mxu0  ;;  %5508 = vst.msk [vmem:[%s1535_s23] sm:$0x1] %vm5507_vm6, %v5502_v45 }
0x25a3   : > { %v5653_v56 = vpop.xlane.xlu0 %5652 }
0x25a4   : > { %v5656_v58 = vmul.f32 0.0078125, %v5653_v56 }
0x25a5   : > { %v5655_v59 = vpop.xlane.xlu1 %5654 }
0x25a6   : > { %v5658_v50 = vadd.f32 1e-12, %v5656_v58  ;;  %v5657_v61 = vmul.f32 0.0078125, %v5655_v59 }
0x25a8   : > { %7904 = vrsqrt.f32 %v5658_v50  ;;  %v5659_v29 = vadd.f32 1e-12, %v5657_v61 }
0x25aa   : > { %7906 = vrsqrt.f32 %v5659_v29 }
0x25b2   : > { %v7905_v62 = vpop.eup %7904 }
0x25b3   : > { %v5662_v4 = vmul.f32 %v7905_v62, %v5648_v40 }
0x25b4   : > { %v7907_v5 = vpop.eup %7906 }
0x25b5   : > { %v5663_v37 = vmul.f32 %v7907_v5, %v5649_v57  ;;  %v5670_v1 = vmul.f32 %v6605_v10, %v5662_v4 }
0x25b7   : > { %v5671_v52 = vmul.f32 %v6605_v10, %v5663_v37  ;;  %v5678_v0 = vadd.f32 %v6606_v7, %v5670_v1 }
0x25b9   : > { %v5679_v6 = vadd.f32 %v6606_v7, %v5671_v52 }
0x25bb   : > { %v5680_v31 = vpack.c.bf16 %v5679_v6, %v5678_v0 }
0x25bd   : > { %7123 = vmatmul.mubr.bf16.vlgmr.msra.gmra.mrb[64].mxu0 %v5680_v31 }
0x25be   : > { %8621 = shalt.err (!%p8618_p5)
}
0x25bf   : > { %s8622_s23 = scalar_lea.hbm %s10291_s11, 16  ;;  %s8626_s3 = scalar_lea.hbm %s10434_s4, 32 }
0x25c0   : > { %p8623_p6 = scmp.ne.s32.totalorder %s10291_s11, %s8622_s23  ;;  %p8627_p7 = scmp.lt.u32.totalorder %s10291_s11, %s10434_s4 }
0x25c1   : > { %p8628_p8 = scmp.lt.u32.totalorder %s8626_s3, %s8622_s23  ;;  %p8630_p13 = scmp.lt.u32.totalorder %s8622_s23, %s10291_s11 }
0x25c2   : > { %p8624_p9 = pnand %p8623_p6, %p10509_p1 }
0x25c3   : > { %p8629_p11 = por %p8628_p8, %p8627_p7 }
0x25c4   : > { %p8625_p10 = pneg %p8624_p9 }
0x25c5   : > { %p8631_p2 = por %p8630_p13, %p8629_p11 }
0x25c7   : > { %p8632_p0 = pnand %p8631_p2, %p8625_p10 }
0x25c9   : > { %8635 = shalt.err (!%p8632_p0)
}
0x25ca   : > { %7242 = dma.vmem_to_hbm [thread:$0]  (%p10509_p1), %s5814_s1, 16, %s10291_s11, %s5796_s15   ;;  %v6607_v36 = vld [vmem:[#allocation41] ss:$0 sm:$0xff] }
0x25cb   : > { %s6293_s2 = sshll.u32 %s10274_s16, 4  ;;  %s6624_s5 = sshll.u32 %s9062_s22, 8 }
0x25cc   : > { %s1542_s8 = scalar_lea.vmem [#allocation43], %s6293_s2  ;;  %s10314_s23 = scalar_lea.hbm %s9039_s14, %s6624_s5 }
0x25cd   : > { %s5826_s6 = sshll.u32 %s1542_s8, 4  ;;  %s5800_s11 = scalar_lea.sflag [#allocation44], %s10274_s16  ;;  %s10311_s6 = int_to_ptr.vmem [resolvable:$true] %s5826_s6 }
0x25ce   : > { %s8636_s1 = scalar_lea.vmem %s10311_s6, 256  ;;  %s8838_s22 = smov [#allocation43]  }
0x25cf   : > { %p8637_p3 = scmp.ne.s32.totalorder %s10311_s6, %s8636_s1  ;;  %s8640_s15 = sshll.u32 %s8838_s22, 4  ;;  %s8641_s15 = int_to_ptr.vmem [resolvable:$false] %s8640_s15 }
0x25d0   : > { %s8642_s3 = scalar_lea.vmem %s8641_s15, 512  ;;  %p8643_p5 = scmp.lt.s32.totalorder %s10311_s6, %s8641_s15 }
0x25d1   : > { %p8638_p4 = pnand %p8637_p3, %p10509_p1  ;;  %p8644_p6 = scmp.lt.s32.totalorder %s8642_s3, %s8636_s1 }
0x25d3   : > { %p8639_p12 = pneg %p8638_p4  ;;  %p8645_p9 = por %p8644_p6, %p8643_p5 }
0x25d5   : > { %p8646_p10 = pnand %p8645_p9, %p8639_p12 }
0x2690   : > { %v5786_v32 = vpop.f32.mrb[64].mxu0 }
0x2691   : > { %v5787_v17 = vadd.f32 %v6607_v36, %v5786_v32  ;;  %v7124_v15 = vpop.f32.mrb[65].mxu0 }
0x2692   : > { %v5789_v22 = vpop.f32.mrb[66].mxu0 }
0x2693   : > { %5793 = vst [vmem:[%s1542_s8] sm:$0xff] %v5787_v17  ;;  %v5790_v39 = vadd.f32 %v6607_v36, %v5789_v22  ;;  %v7125_v25 = vpop.f32.mrb[67].mxu0 }
0x2695   : > { %5794 = vst [vmem:[%s1542_s8 + $0x8] sm:$0xff] %v5790_v39 }
0x2696   : > { %8649 = shalt.err (!%p8646_p10)
}
0x2697   : > { %s8650_s2 = scalar_lea.hbm %s10314_s23, 256  ;;  %s8654_s8 = scalar_lea.hbm %s9039_s14, 512 }
0x2698   : > { %p8651_p7 = scmp.ne.s32.totalorder %s10314_s23, %s8650_s2  ;;  %p8655_p13 = scmp.lt.u32.totalorder %s10314_s23, %s9039_s14 }
0x2699   : > { %p8656_p2 = scmp.lt.u32.totalorder %s8654_s8, %s8650_s2  ;;  %p8658_p3 = scmp.lt.u32.totalorder %s8650_s2, %s10314_s23 }
0x269a   : > { %p8652_p8 = pnand %p8651_p7, %p10509_p1 }
0x269b   : > { %p8657_p0 = por %p8656_p2, %p8655_p13 }
0x269c   : > { %p8653_p11 = pneg %p8652_p8 }
0x269d   : > { %p8659_p4 = por %p8658_p3, %p8657_p0 }
0x269f   : > { %p8660_p12 = pnand %p8659_p4, %p8653_p11 }
0x26a1   : > { %8663 = shalt.err (!%p8660_p12)
}
0x26a2   : > { %s8839_s5 = smov 128   ;;  %s8840_s1 = smov 8  }
0x26a3   : > { %7243 = dma.vmem_to_hbm [thread:$0]  (%p10509_p1), %s10311_s6, 256, %s10314_s23, %s5800_s11, %s8839_s5, %s8839_s5, %s8840_s1  }
0x26a4 PF: > { %s10510_s22 = sld [smem:[#allocation92_spill]]  ;;  %s10511_s15 = sld [smem:[#allocation96_spill]] }
0x26a5   : > { %p7379_p5 = scmp.ge.s32.totalorder %s8754_s18, 2 }
0x26aa   : > { %s5841_s3 = sand.u32 1, %s10510_s22   ;;  %p10512_p6 = scmp.ne.s32.totalorder %s10511_s15, 0 }
0x26ab   : > { %s5842_s2 = scalar_lea.sflag [#allocation5], %s5841_s3 }
0x26ac   : > { %p7323_p9 = pnand %p7379_p5, %p10512_p6 }
0x26ae   : > { %8733 = dma.done.wait (!%p7323_p9), %s5842_s2, 16  }
0x26af   : > { %8735 = vsyncadd (!%p7323_p9), %s5842_s2, 4294967280  ;;  %s5850_s8 = scalar_lea.sflag [#allocation44], %s5841_s3 }
0x26b0   : > { %8737 = dma.done.wait (!%p7323_p9), %s5850_s8, 256  }
0x26b1   : > { %8739 = vsyncadd (!%p7323_p9), %s5850_s8, 4294967040  ;;  %s10513_s18 = sld [smem:[#allocation94_spill]]  ;;  %s10514_s4 = sld [smem:[#allocation93_spill]] }
0x26b2   : > { %s10515_s16 = sld [smem:[#allocation95_spill]]  ;;  %s10516_s15 = smov %s8746_s0 }
0x26b7   : > { %p104_p1 = scmp.ge.s32.totalorder %s10513_s18, 4   ;;  %s10517_s0 = smov %s10514_s4 }
0x26b9   :  { %106 = sbr.rel (!%p104_p1) target bundleno = 99 (0x63), region = 383 }
0x26c0   :  { %5855 = vsyncpa [#allocation4], 1 }
0x26c1   :  { %5857 = vsyncpa [#allocation4 + $0x1], 1 }
0x26c2   :  { %5858 = vsyncpa [#allocation7], 1 }
0x26c3   :  { %5859 = vsyncpa [#allocation10], 1 }
0x26c4   :  { %5860 = vsyncpa [#allocation13], 1 }
0x26c5   :  { %5861 = vsyncpa [#allocation16], 1 }
0x26c6   :  { %5862 = vsyncpa [#allocation19], 1 }
0x26c7   :  { %5863 = vsyncpa [#allocation22], 1 }
0x26c8   :  { %5864 = vsyncpa [#allocation25], 1 }
0x26c9   :  { %5865 = vsyncpa [#allocation28], 1 }
0x26ca   :  { %5866 = vsyncpa [#allocation31], 1 }
0x26cb   :  { %5867 = vsyncpa [#allocation34], 1 }
0x26cc   :  { %5868 = vsyncpa [#allocation37], 1 }
0x26cd   :  { %5869 = vsyncpa [#allocation40], 1 }
0x26ce   :  { %5870 = vsyncpa [#allocation5], 1 }
0x26cf   :  { %5872 = vsyncpa [#allocation5 + $0x1], 1 }
0x26d0   :  { %5873 = vsyncpa [#allocation44], 1 }
0x26d1   :  { %5875 = vsyncpa [#allocation44 + $0x1], 1 }

</bundles_post_ra>
